<compile_context>
chip_gen: v7x
topology: tpu7x:2x2x1
jax: 0.10.0
libtpu: 0.0.40
codegen_flags: <defaults>
</compile_context>

<pallas_src>
import functools

import jax
import jax.numpy as jnp
from jax.experimental import pallas as pl
from jax.experimental.pallas import tpu as pltpu


# ----------------------------------------------------------------------------
# Fused Conv2d(k=3, s=1, p=1) + ReLU (+ optional MaxPool 2x2) — whole batch,
# single invocation, single im2col matmul.
# ----------------------------------------------------------------------------
def conv3x3_relu_pool_kernel(x_ref, w_ref, b_ref, o_ref, xpad_ref, y_ref, *, pool):
    # x_ref:    (B, H, W, Cin)          input activations (f32)
    # w_ref:    (9*Cin, Cout)           conv weights, taps stacked along K
    # b_ref:    (1, Cout)               bias
    # o_ref:    (B, Ho, Wo, Cout)       output (Ho=H/2 if pool else H)
    # xpad_ref: (B, H+2, W+2, Cin)      VMEM scratch for in-kernel halo padding
    # y_ref:    (B, H, W, Cout)         VMEM scratch holding pre-pool activations
    B, H, W, Cin = x_ref.shape
    Cout = o_ref.shape[-1]

    # In-kernel zero padding (padding=1): zero the halo buffer, write interior.
    xpad_ref[...] = jnp.zeros_like(xpad_ref)
    xpad_ref[:, 1:H + 1, 1:W + 1, :] = x_ref[...]

    # im2col: gather the 9 taps into one (B*H*W, 9*Cin) matrix -> one MXU matmul.
    taps = [xpad_ref[:, pl.ds(dh, H), pl.ds(dw, W), :]
            for dh in range(3) for dw in range(3)]        # each (B, H, W, Cin)
    patches = jnp.concatenate(taps, axis=-1).reshape(B * H * W, 9 * Cin)
    acc = jnp.dot(patches, w_ref[...], preferred_element_type=jnp.float32)
    y = jnp.maximum(acc + b_ref[...], 0.0)                # bias bcast + ReLU

    if not pool:
        o_ref[...] = y.reshape(B, H, W, Cout).astype(o_ref.dtype)
    else:
        # Fused MaxPool2d(kernel=2, stride=2): stage in VMEM, strided window max.
        y_ref[...] = y.reshape(B, H, W, Cout)
        Ho, Wo = o_ref.shape[1], o_ref.shape[2]
        p00 = y_ref[:, pl.ds(0, Ho, 2), pl.ds(0, Wo, 2), :]
        p01 = y_ref[:, pl.ds(0, Ho, 2), pl.ds(1, Wo, 2), :]
        p10 = y_ref[:, pl.ds(1, Ho, 2), pl.ds(0, Wo, 2), :]
        p11 = y_ref[:, pl.ds(1, Ho, 2), pl.ds(1, Wo, 2), :]
        o_ref[...] = jnp.maximum(jnp.maximum(p00, p01),
                                 jnp.maximum(p10, p11)).astype(o_ref.dtype)


def conv3x3_relu_block(x_nhwc, w9, b, *, pool):
    # x_nhwc: (B, H, W, Cin); w9: (9*Cin, Cout); b: (Cout,)
    B, H, W, Cin = x_nhwc.shape
    Cout = w9.shape[-1]
    Ho, Wo = (H // 2, W // 2) if pool else (H, W)
    return pl.pallas_call(
        functools.partial(conv3x3_relu_pool_kernel, pool=pool),
        out_shape=jax.ShapeDtypeStruct((B, Ho, Wo, Cout), x_nhwc.dtype),
        scratch_shapes=[
            pltpu.VMEM((B, H + 2, W + 2, Cin), jnp.float32),   # padded input
            pltpu.VMEM((B, H, W, Cout), jnp.float32),          # pre-pool activ.
        ],
    )(x_nhwc, w9, b.reshape(1, Cout))


# ----------------------------------------------------------------------------
# Standalone MaxPool2d(2, 2) — whole batch, one invocation.
# (Only used if an 'M' is not preceded by a conv; not hit by this architecture.)
# ----------------------------------------------------------------------------
def maxpool2x2_kernel(x_ref, o_ref):
    _, Ho, Wo, _ = o_ref.shape
    p00 = x_ref[:, pl.ds(0, Ho, 2), pl.ds(0, Wo, 2), :]
    p01 = x_ref[:, pl.ds(0, Ho, 2), pl.ds(1, Wo, 2), :]
    p10 = x_ref[:, pl.ds(1, Ho, 2), pl.ds(0, Wo, 2), :]
    p11 = x_ref[:, pl.ds(1, Ho, 2), pl.ds(1, Wo, 2), :]
    o_ref[...] = jnp.maximum(jnp.maximum(p00, p01), jnp.maximum(p10, p11))


def maxpool2x2(x_nhwc):
    B, H, W, C = x_nhwc.shape
    return pl.pallas_call(
        maxpool2x2_kernel,
        out_shape=jax.ShapeDtypeStruct((B, H // 2, W // 2, C), x_nhwc.dtype),
    )(x_nhwc)


# ----------------------------------------------------------------------------
# Linear (+ optional ReLU) — bf16 weights/activations, f32 accumulation,
# tiled over (N, K) with K (reduction) last; N is "parallel" (v7x megacore).
# ----------------------------------------------------------------------------
def linear_kernel(x_ref, w_ref, b_ref, o_ref, acc_ref, *, apply_relu):
    k = pl.program_id(1)

    @pl.when(k == 0)
    def _():
        acc_ref[...] = jnp.zeros_like(acc_ref)

    acc_ref[...] += jnp.dot(x_ref[...], w_ref[...],
                            preferred_element_type=jnp.float32)

    @pl.when(k == pl.num_programs(1) - 1)
    def _():
        out = acc_ref[...] + b_ref[...]
        if apply_relu:
            out = jnp.maximum(out, 0.0)
        o_ref[...] = out.astype(o_ref.dtype)


def _pick_tile(dim, candidates=(1024, 512, 256, 128)):
    for c in candidates:
        if dim % c == 0:
            return c
    return dim


def linear(x, w, b, *, apply_relu=False):
    # x: (B, K); w: (K, N) bf16 (already transposed vs PyTorch's (N, K)); b: (N,)
    B, K = x.shape
    N = w.shape[1]
    tn = _pick_tile(N)
    tk = _pick_tile(K)
    xb = x.astype(jnp.bfloat16)          # halve activation bytes; f32 accumulate
    b2 = b.reshape(1, N).astype(jnp.float32)
    return pl.pallas_call(
        functools.partial(linear_kernel, apply_relu=apply_relu),
        out_shape=jax.ShapeDtypeStruct((B, N), jnp.float32),
        grid=(N // tn, K // tk),
        in_specs=[
            pl.BlockSpec((B, tk), lambda n, k: (0, k)),
            pl.BlockSpec((tk, tn), lambda n, k: (k, n)),
            pl.BlockSpec((1, tn), lambda n, k: (0, n)),
        ],
        out_specs=pl.BlockSpec((B, tn), lambda n, k: (0, n)),
        scratch_shapes=[pltpu.VMEM((B, tn), jnp.float32)],
        compiler_params=pltpu.CompilerParams(
            dimension_semantics=("parallel", "arbitrary"),
            vmem_limit_bytes=32 * 1024 * 1024),
    )(xb, w, b2)


# ----------------------------------------------------------------------------
# VGG model (synthetic, deterministic parameters)
# ----------------------------------------------------------------------------
ARCHITECTURE = [8, "M", 16, "M"]   # small VGG-style config
NUM_CLASSES = 16
INPUT_SIZE = 16
_LANE = 128


def init_vgg_params(key, architecture, num_classes, input_size):
    params = {"conv": [], "fc": []}
    in_ch = 3
    h = w = input_size
    for a in architecture:
        if a == "M":
            h //= 2
            w //= 2
        else:
            key, k1, k2 = jax.random.split(key, 3)
            fan_in = in_ch * 9
            wgt = jax.random.normal(k1, (3, 3, in_ch, a), jnp.float32) / jnp.sqrt(fan_in)
            bias = 0.01 * jax.random.normal(k2, (a,), jnp.float32)
            # Pre-reshape to (9*Cin, Cout): kernel does a single im2col matmul.
            params["conv"].append((wgt.reshape(9 * in_ch, a), bias))
            in_ch = a
    flattened = in_ch * h * w            # == _get_flattened_size in the module
    dims = [flattened, 4096, 4096, num_classes]
    for i in range(3):
        key, k1, k2 = jax.random.split(key, 3)
        wgt = jax.random.normal(k1, (dims[i], dims[i + 1]), jnp.float32) / jnp.sqrt(dims[i])
        bias = 0.01 * jax.random.normal(k2, (dims[i + 1],), jnp.float32)
        if i == 0:
            # Rows are conceptually in PyTorch's NCHW view(B, -1) order (C,H,W);
            # permute once to NHWC order so the runtime flatten is a free reshape.
            wgt = wgt.reshape(in_ch, h, w, dims[1])
            wgt = jnp.transpose(wgt, (1, 2, 0, 3)).reshape(flattened, dims[1])
        if i == 2:
            # Pad classifier N up to a lane-dense multiple of 128 (sliced later).
            n_pad = max(_LANE, -(-dims[3] // _LANE) * _LANE)
            wgt = jnp.pad(wgt, ((0, 0), (0, n_pad - dims[3])))
            bias = jnp.pad(bias, ((0, n_pad - dims[3]),))
        # bf16 weights: FC stack is HBM-bandwidth bound; accumulate stays f32.
        params["fc"].append((wgt.astype(jnp.bfloat16), bias))
    return params


def vgg_forward(params, x_nchw, architecture, num_classes):
    # NCHW (PyTorch) -> NHWC for the TPU kernels.
    x = jnp.transpose(x_nchw, (0, 2, 3, 1))
    ci = 0
    i = 0
    while i < len(architecture):
        a = architecture[i]
        if a == "M":
            x = maxpool2x2(x)
            i += 1
        else:
            w9, b = params["conv"][ci]
            fuse = (i + 1 < len(architecture)) and (architecture[i + 1] == "M")
            x = conv3x3_relu_block(x, w9, b, pool=fuse)
            ci += 1
            i += 2 if fuse else 1
    # Flatten NHWC directly; fc[0] rows were permuted at init to match PyTorch's
    # NCHW view(B, -1) ordering, so no runtime transpose is needed.
    x = x.reshape(x.shape[0], -1)
    (w1, b1), (w2, b2), (w3, b3) = params["fc"]
    x = linear(x, w1, b1, apply_relu=True)
    # nn.Dropout(p=0.5): identity under eval/inference semantics.
    # TODO(synk): training-mode stochastic dropout not implemented.
    x = linear(x, w2, b2, apply_relu=True)
    x = linear(x, w3, b3, apply_relu=False)
    return x[:, :num_classes]            # drop lane-padding of the classifier


if __name__ == "__main__":
    key = jax.random.PRNGKey(0)
    key_p, key_x = jax.random.split(key)
    params = init_vgg_params(key_p, ARCHITECTURE, NUM_CLASSES, INPUT_SIZE)

    batch = 2
    x = jax.random.normal(key_x, (batch, 3, INPUT_SIZE, INPUT_SIZE), jnp.float32)

    out = vgg_forward(params, x, ARCHITECTURE, NUM_CLASSES)
    out = jax.block_until_ready(out)
    assert out.shape == (batch, NUM_CLASSES), out.shape
    assert jnp.all(jnp.isfinite(out))
    print("KERNEL_OK")
</pallas_src>

<mosaic_0001>
module attributes {stable_mosaic.version = 11 : i64} {
  func.func @conv3x3_relu_pool_kernel(%arg0: memref<2x16x16x3xf32, #tpu.memory_space<vmem>>, %arg1: memref<27x8xf32, #tpu.memory_space<vmem>>, %arg2: memref<1x8xf32, #tpu.memory_space<vmem>>, %arg3: memref<2x8x8x8xf32, #tpu.memory_space<vmem>>, %arg4: memref<2x18x18x3xf32, #tpu.memory_space<vmem>>, %arg5: memref<2x16x16x8xf32, #tpu.memory_space<vmem>>) attributes {dimension_semantics = [], scalar_prefetch = 0 : i64, scratch_operands = 2 : i64, tpu.core_type = #tpu.core_type<tc>} {
    %cst = arith.constant 0.000000e+00 : f32
    %0 = vector.broadcast %cst : f32 to vector<2x18x18x3xf32>
    %c0 = arith.constant 0 : index
    %c0_0 = arith.constant 0 : index
    %c0_1 = arith.constant 0 : index
    %c0_2 = arith.constant 0 : index
    %1 = vector.load %arg4[%c0, %c0_0, %c0_1, %c0_2] : memref<2x18x18x3xf32, #tpu.memory_space<vmem>>, vector<2x18x18x3xf32>
    tpu.vector_store %arg4[%c0, %c0_0, %c0_1, %c0_2], %0 {strides = array<i32>} : memref<2x18x18x3xf32, #tpu.memory_space<vmem>>, vector<2x18x18x3xf32>,
    %c0_3 = arith.constant 0 : index
    %c0_4 = arith.constant 0 : index
    %c0_5 = arith.constant 0 : index
    %c0_6 = arith.constant 0 : index
    %2 = vector.load %arg0[%c0_3, %c0_4, %c0_5, %c0_6] : memref<2x16x16x3xf32, #tpu.memory_space<vmem>>, vector<2x16x16x3xf32>
    %c0_7 = arith.constant 0 : index
    %c1 = arith.constant 1 : index
    %c1_8 = arith.constant 1 : index
    %c0_9 = arith.constant 0 : index
    %3 = vector.load %arg4[%c0_7, %c1, %c1_8, %c0_9] : memref<2x18x18x3xf32, #tpu.memory_space<vmem>>, vector<2x16x16x3xf32>
    tpu.vector_store %arg4[%c0_7, %c1, %c1_8, %c0_9], %2 {strides = array<i32>} : memref<2x18x18x3xf32, #tpu.memory_space<vmem>>, vector<2x16x16x3xf32>,
    %c0_10 = arith.constant 0 : index
    %c0_11 = arith.constant 0 : index
    %c0_12 = arith.constant 0 : index
    %c0_13 = arith.constant 0 : index
    %4 = vector.load %arg4[%c0_10, %c0_11, %c0_12, %c0_13] : memref<2x18x18x3xf32, #tpu.memory_space<vmem>>, vector<2x16x16x3xf32>
    %c0_14 = arith.constant 0 : index
    %c0_15 = arith.constant 0 : index
    %c1_16 = arith.constant 1 : index
    %c0_17 = arith.constant 0 : index
    %5 = vector.load %arg4[%c0_14, %c0_15, %c1_16, %c0_17] : memref<2x18x18x3xf32, #tpu.memory_space<vmem>>, vector<2x16x16x3xf32>
    %c0_18 = arith.constant 0 : index
    %c0_19 = arith.constant 0 : index
    %c2 = arith.constant 2 : index
    %c0_20 = arith.constant 0 : index
    %6 = vector.load %arg4[%c0_18, %c0_19, %c2, %c0_20] : memref<2x18x18x3xf32, #tpu.memory_space<vmem>>, vector<2x16x16x3xf32>
    %c0_21 = arith.constant 0 : index
    %c1_22 = arith.constant 1 : index
    %c0_23 = arith.constant 0 : index
    %c0_24 = arith.constant 0 : index
    %7 = vector.load %arg4[%c0_21, %c1_22, %c0_23, %c0_24] : memref<2x18x18x3xf32, #tpu.memory_space<vmem>>, vector<2x16x16x3xf32>
    %c0_25 = arith.constant 0 : index
    %c1_26 = arith.constant 1 : index
    %c1_27 = arith.constant 1 : index
    %c0_28 = arith.constant 0 : index
    %8 = vector.load %arg4[%c0_25, %c1_26, %c1_27, %c0_28] : memref<2x18x18x3xf32, #tpu.memory_space<vmem>>, vector<2x16x16x3xf32>
    %c0_29 = arith.constant 0 : index
    %c1_30 = arith.constant 1 : index
    %c2_31 = arith.constant 2 : index
    %c0_32 = arith.constant 0 : index
    %9 = vector.load %arg4[%c0_29, %c1_30, %c2_31, %c0_32] : memref<2x18x18x3xf32, #tpu.memory_space<vmem>>, vector<2x16x16x3xf32>
    %c0_33 = arith.constant 0 : index
    %c2_34 = arith.constant 2 : index
    %c0_35 = arith.constant 0 : index
    %c0_36 = arith.constant 0 : index
    %10 = vector.load %arg4[%c0_33, %c2_34, %c0_35, %c0_36] : memref<2x18x18x3xf32, #tpu.memory_space<vmem>>, vector<2x16x16x3xf32>
    %c0_37 = arith.constant 0 : index
    %c2_38 = arith.constant 2 : index
    %c1_39 = arith.constant 1 : index
    %c0_40 = arith.constant 0 : index
    %11 = vector.load %arg4[%c0_37, %c2_38, %c1_39, %c0_40] : memref<2x18x18x3xf32, #tpu.memory_space<vmem>>, vector<2x16x16x3xf32>
    %c0_41 = arith.constant 0 : index
    %c2_42 = arith.constant 2 : index
    %c2_43 = arith.constant 2 : index
    %c0_44 = arith.constant 0 : index
    %12 = vector.load %arg4[%c0_41, %c2_42, %c2_43, %c0_44] : memref<2x18x18x3xf32, #tpu.memory_space<vmem>>, vector<2x16x16x3xf32>
    %13 = tpu.concatenate %4, %5, %6, %7, %8, %9, %10, %11, %12 in 3 : vector<2x16x16x3xf32>, vector<2x16x16x3xf32>, vector<2x16x16x3xf32>, vector<2x16x16x3xf32>, vector<2x16x16x3xf32>, vector<2x16x16x3xf32>, vector<2x16x16x3xf32>, vector<2x16x16x3xf32>, vector<2x16x16x3xf32> -> vector<2x16x16x27xf32>
    %14 = vector.shape_cast %13 : vector<2x16x16x27xf32> to vector<512x27xf32>
    %c0_45 = arith.constant 0 : index
    %c0_46 = arith.constant 0 : index
    %15 = vector.load %arg1[%c0_45, %c0_46] : memref<27x8xf32, #tpu.memory_space<vmem>>, vector<27x8xf32>
    %cst_47 = arith.constant dense<0.000000e+00> : vector<512x8xf32>
    %16 = tpu.matmul %14, %15, %cst_47 {dimension_numbers = #tpu.dot_dimension_numbers<[1], [0], [0], [1], [0, 0, 1, 1], [], []>} : vector<512x27xf32>, vector<27x8xf32>, vector<512x8xf32> -> vector<512x8xf32>
    %c0_48 = arith.constant 0 : index
    %c0_49 = arith.constant 0 : index
    %17 = vector.load %arg2[%c0_48, %c0_49] : memref<1x8xf32, #tpu.memory_space<vmem>>, vector<1x8xf32>
    %18 = vector.broadcast %17 : vector<1x8xf32> to vector<512x8xf32>
    %19 = arith.addf %16, %18 : vector<512x8xf32>
    %cst_50 = arith.constant 0.000000e+00 : f32
    %20 = vector.broadcast %cst_50 : f32 to vector<512x8xf32>
    %21 = arith.maximumf %19, %20 : vector<512x8xf32>
    %22 = vector.shape_cast %21 : vector<512x8xf32> to vector<2x16x16x8xf32>
    %c0_51 = arith.constant 0 : index
    %c0_52 = arith.constant 0 : index
    %c0_53 = arith.constant 0 : index
    %c0_54 = arith.constant 0 : index
    %23 = vector.load %arg5[%c0_51, %c0_52, %c0_53, %c0_54] : memref<2x16x16x8xf32, #tpu.memory_space<vmem>>, vector<2x16x16x8xf32>
    tpu.vector_store %arg5[%c0_51, %c0_52, %c0_53, %c0_54], %22 {strides = array<i32>} : memref<2x16x16x8xf32, #tpu.memory_space<vmem>>, vector<2x16x16x8xf32>,
    %c0_55 = arith.constant 0 : index
    %c0_56 = arith.constant 0 : index
    %c0_57 = arith.constant 0 : index
    %c0_58 = arith.constant 0 : index
    %24 = tpu.strided_load %arg5[%c0_55, %c0_56, %c0_57, %c0_58] {strides = array<i32: 1, 2, 2, 1>} : memref<2x16x16x8xf32, #tpu.memory_space<vmem>>, vector<2x8x8x8xf32>
    %c0_59 = arith.constant 0 : index
    %c0_60 = arith.constant 0 : index
    %c1_61 = arith.constant 1 : index
    %c0_62 = arith.constant 0 : index
    %25 = tpu.strided_load %arg5[%c0_59, %c0_60, %c1_61, %c0_62] {strides = array<i32: 1, 2, 2, 1>} : memref<2x16x16x8xf32, #tpu.memory_space<vmem>>, vector<2x8x8x8xf32>
    %c0_63 = arith.constant 0 : index
    %c1_64 = arith.constant 1 : index
    %c0_65 = arith.constant 0 : index
    %c0_66 = arith.constant 0 : index
    %26 = tpu.strided_load %arg5[%c0_63, %c1_64, %c0_65, %c0_66] {strides = array<i32: 1, 2, 2, 1>} : memref<2x16x16x8xf32, #tpu.memory_space<vmem>>, vector<2x8x8x8xf32>
    %c0_67 = arith.constant 0 : index
    %c1_68 = arith.constant 1 : index
    %c1_69 = arith.constant 1 : index
    %c0_70 = arith.constant 0 : index
    %27 = tpu.strided_load %arg5[%c0_67, %c1_68, %c1_69, %c0_70] {strides = array<i32: 1, 2, 2, 1>} : memref<2x16x16x8xf32, #tpu.memory_space<vmem>>, vector<2x8x8x8xf32>
    %28 = arith.maximumf %24, %25 : vector<2x8x8x8xf32>
    %29 = arith.maximumf %26, %27 : vector<2x8x8x8xf32>
    %30 = arith.maximumf %28, %29 : vector<2x8x8x8xf32>
    %c0_71 = arith.constant 0 : index
    %c0_72 = arith.constant 0 : index
    %c0_73 = arith.constant 0 : index
    %c0_74 = arith.constant 0 : index
    %31 = vector.load %arg3[%c0_71, %c0_72, %c0_73, %c0_74] : memref<2x8x8x8xf32, #tpu.memory_space<vmem>>, vector<2x8x8x8xf32>
    tpu.vector_store %arg3[%c0_71, %c0_72, %c0_73, %c0_74], %30 {strides = array<i32>} : memref<2x8x8x8xf32, #tpu.memory_space<vmem>>, vector<2x8x8x8xf32>,
    return
  }
}

</mosaic_0001>

<bundles_post_ra>
// kernel: tpu_custom_call.1
= control target key start
LH: loop header
LB: loop body
LE: loop exit
PB: predicated region body
PF: predicated region fallthrough
CT: control target
= control target key end

     0   :  { %vm15_vm0 = vcmask 23552   ;;  %vm18_vm1 = vcmask 17408   ;;  %v4708_v2 = vmov 0.0   ;;  %s4709_s6 = smov 3   ;;  %s7634_s0 = inlined_call_operand.vmem [shape: f32[2,16,16,3], index: 0, kind: input, shape index: {}]   ;;  %s7635_s1 = inlined_call_operand.vmem [shape: f32[27,8], index: 1, kind: input, shape index: {}]   ;;  %s7636_s2 = inlined_call_operand.vmem [shape: f32[1,8], index: 2, kind: input, shape index: {}]   ;;  %s7637_s3 = inlined_call_operand.hbm [shape: f32[2,8,8,8], index: 3, kind: output, shape index: {}]  }
   0x1   :  { %v4744_v0 = vld [vmem:[%s7634_s0] sm:$0xff]  ;;  %v4749_v1 = vld [vmem:[%s7634_s0 + $0x8] sm:$0xff]  ;;  %16 = vst.msk [vmem:[#allocation2] sm:$0xff] %vm15_vm0, %v4708_v2  ;;  %17 = vst.msk [vmem:[#allocation2 + $0x8] sm:$0xff] %vm15_vm0, %v4708_v2 }
   0x2   :  { %20 = vst.msk [vmem:[#allocation2 + $0x18] sm:$0xff] %vm15_vm0, %v4708_v2  ;;  %21 = vst.msk [vmem:[#allocation2 + $0x20] sm:$0xff] %vm15_vm0, %v4708_v2  ;;  %v127_v3 = vld [vmem:[%s7634_s0 + $0x10] sm:$0xff]  ;;  %v128_v4 = vld [vmem:[%s7634_s0 + $0x18] sm:$0xff] }
   0x3   :  { %23 = vst.msk [vmem:[#allocation2 + $0x30] sm:$0xff] %vm15_vm0, %v4708_v2  ;;  %24 = vst.msk [vmem:[#allocation2 + $0x38] sm:$0xff] %vm15_vm0, %v4708_v2  ;;  %v129_v5 = vld [vmem:[%s7634_s0 + $0x20] sm:$0xff]  ;;  %v130_v6 = vld [vmem:[%s7634_s0 + $0x28] sm:$0xff] }
   0x4   :  { %26 = vst.msk [vmem:[#allocation2 + $0x48] sm:$0xff] %vm15_vm0, %v4708_v2  ;;  %27 = vst.msk [vmem:[#allocation2 + $0x50] sm:$0xff] %vm15_vm0, %v4708_v2  ;;  %v131_v7 = vld [vmem:[%s7634_s0 + $0x30] sm:$0xff]  ;;  %v132_v8 = vld [vmem:[%s7634_s0 + $0x38] sm:$0xff] }
   0x5   :  { %29 = vst.msk [vmem:[#allocation2 + $0x60] sm:$0xff] %vm15_vm0, %v4708_v2  ;;  %30 = vst.msk [vmem:[#allocation2 + $0x68] sm:$0xff] %vm15_vm0, %v4708_v2  ;;  %v133_v9 = vld [vmem:[%s7634_s0 + $0x40] sm:$0xff]  ;;  %v134_v10 = vld [vmem:[%s7634_s0 + $0x48] sm:$0xff] }
   0x6   :  { %32 = vst.msk [vmem:[#allocation2 + $0x78] sm:$0xff] %vm15_vm0, %v4708_v2  ;;  %33 = vst.msk [vmem:[#allocation2 + $0x80] sm:$0xff] %vm15_vm0, %v4708_v2  ;;  %v135_v11 = vld [vmem:[%s7634_s0 + $0x50] sm:$0xff]  ;;  %v136_v12 = vld [vmem:[%s7634_s0 + $0x58] sm:$0xff] }
   0x7   :  { %35 = vst.msk [vmem:[#allocation2 + $0x90] sm:$0xff] %vm15_vm0, %v4708_v2  ;;  %36 = vst.msk [vmem:[#allocation2 + $0x98] sm:$0xff] %vm15_vm0, %v4708_v2  ;;  %v137_v13 = vld [vmem:[%s7634_s0 + $0x60] sm:$0xff]  ;;  %v138_v14 = vld [vmem:[%s7634_s0 + $0x68] sm:$0xff] }
   0x8   :  { %38 = vst.msk [vmem:[#allocation2 + $0xa8] sm:$0xff] %vm15_vm0, %v4708_v2  ;;  %39 = vst.msk [vmem:[#allocation2 + $0xb0] sm:$0xff] %vm15_vm0, %v4708_v2  ;;  %v139_v15 = vld [vmem:[%s7634_s0 + $0x70] sm:$0xff]  ;;  %v140_v16 = vld [vmem:[%s7634_s0 + $0x78] sm:$0xff] }
   0x9   :  { %41 = vst.msk [vmem:[#allocation2 + $0xc0] sm:$0xff] %vm15_vm0, %v4708_v2  ;;  %42 = vst.msk [vmem:[#allocation2 + $0xc8] sm:$0xff] %vm15_vm0, %v4708_v2  ;;  %v141_v17 = vld [vmem:[%s7634_s0 + $0x80] sm:$0xff]  ;;  %v142_v18 = vld [vmem:[%s7634_s0 + $0x88] sm:$0xff] }
   0xa   :  { %44 = vst.msk [vmem:[#allocation2 + $0xd8] sm:$0xff] %vm15_vm0, %v4708_v2  ;;  %45 = vst.msk [vmem:[#allocation2 + $0xe0] sm:$0xff] %vm15_vm0, %v4708_v2  ;;  %v143_v19 = vld [vmem:[%s7634_s0 + $0x90] sm:$0xff]  ;;  %v144_v20 = vld [vmem:[%s7634_s0 + $0x98] sm:$0xff] }
   0xb   :  { %47 = vst.msk [vmem:[#allocation2 + $0xf0] sm:$0xff] %vm15_vm0, %v4708_v2  ;;  %48 = vst.msk [vmem:[#allocation2 + $0xf8] sm:$0xff] %vm15_vm0, %v4708_v2  ;;  %v145_v21 = vld [vmem:[%s7634_s0 + $0xa0] sm:$0xff]  ;;  %v146_v22 = vld [vmem:[%s7634_s0 + $0xa8] sm:$0xff] }
   0xc   :  { %50 = vst.msk [vmem:[#allocation2 + $0x108] sm:$0xff] %vm15_vm0, %v4708_v2  ;;  %51 = vst.msk [vmem:[#allocation2 + $0x110] sm:$0xff] %vm15_vm0, %v4708_v2  ;;  %v147_v23 = vld [vmem:[%s7634_s0 + $0xb0] sm:$0xff]  ;;  %v318_v24 = vld [vmem:[#allocation2 + $0x1] sm:$0xff] }
   0xd   :  { %53 = vst.msk [vmem:[#allocation2 + $0x120] sm:$0xff] %vm15_vm0, %v4708_v2  ;;  %54 = vst.msk [vmem:[#allocation2 + $0x128] sm:$0xff] %vm15_vm0, %v4708_v2  ;;  %v148_v25 = vld [vmem:[%s7634_s0 + $0xb8] sm:$0xff]  ;;  %895 = vrot.lane.b32.xlu0 %v318_v24, %s4709_s6  ;;  %v149_v32 = vld [vmem:[%s7634_s0 + $0xc0] sm:$0xff] }
   0xe   :  { %56 = vst.msk [vmem:[#allocation2 + $0x138] sm:$0xff] %vm15_vm0, %v4708_v2  ;;  %57 = vst.msk [vmem:[#allocation2 + $0x140] sm:$0xff] %vm15_vm0, %v4708_v2  ;;  %v150_v33 = vld [vmem:[%s7634_s0 + $0xc8] sm:$0xff]  ;;  %v151_v34 = vld [vmem:[%s7634_s0 + $0xd0] sm:$0xff] }
   0xf   :  { %59 = vst.msk [vmem:[#allocation2 + $0x150] sm:$0xff] %vm15_vm0, %v4708_v2  ;;  %60 = vst.msk [vmem:[#allocation2 + $0x158] sm:$0xff] %vm15_vm0, %v4708_v2  ;;  %v152_v35 = vld [vmem:[%s7634_s0 + $0xd8] sm:$0xff]  ;;  %v153_v36 = vld [vmem:[%s7634_s0 + $0xe0] sm:$0xff] }
  0x10   :  { %62 = vst.msk [vmem:[#allocation2 + $0x168] sm:$0xff] %vm15_vm0, %v4708_v2  ;;  %63 = vst.msk [vmem:[#allocation2 + $0x170] sm:$0xff] %vm15_vm0, %v4708_v2  ;;  %v154_v37 = vld [vmem:[%s7634_s0 + $0xe8] sm:$0xff]  ;;  %v157_v39 = vld [vmem:[%s7634_s0 + $0x100] sm:$0xff] }
  0x11   :  { %65 = vst.msk [vmem:[#allocation2 + $0x180] sm:$0xff] %vm15_vm0, %v4708_v2  ;;  %66 = vst.msk [vmem:[#allocation2 + $0x188] sm:$0xff] %vm15_vm0, %v4708_v2  ;;  %v158_v41 = vld [vmem:[%s7634_s0 + $0x108] sm:$0xff]  ;;  %v159_v42 = vld [vmem:[%s7634_s0 + $0x110] sm:$0xff] }
  0x12   :  { %68 = vst.msk [vmem:[#allocation2 + $0x198] sm:$0xff] %vm15_vm0, %v4708_v2  ;;  %69 = vst.msk [vmem:[#allocation2 + $0x1a0] sm:$0xff] %vm15_vm0, %v4708_v2  ;;  %v160_v43 = vld [vmem:[%s7634_s0 + $0x118] sm:$0xff]  ;;  %v161_v45 = vld [vmem:[%s7634_s0 + $0x120] sm:$0xff] }
  0x13   :  { %71 = vst.msk [vmem:[#allocation2 + $0x1b0] sm:$0xff] %vm15_vm0, %v4708_v2  ;;  %72 = vst.msk [vmem:[#allocation2 + $0x1b8] sm:$0xff] %vm15_vm0, %v4708_v2  ;;  %v162_v46 = vld [vmem:[%s7634_s0 + $0x128] sm:$0xff]  ;;  %v163_v47 = vld [vmem:[%s7634_s0 + $0x130] sm:$0xff] }
  0x14   :  { %74 = vst.msk [vmem:[#allocation2 + $0x1c8] sm:$0xff] %vm15_vm0, %v4708_v2  ;;  %75 = vst.msk [vmem:[#allocation2 + $0x1d0] sm:$0xff] %vm15_vm0, %v4708_v2  ;;  %v164_v48 = vld [vmem:[%s7634_s0 + $0x138] sm:$0xff]  ;;  %v165_v49 = vld [vmem:[%s7634_s0 + $0x140] sm:$0xff] }
  0x15   :  { %77 = vst.msk [vmem:[#allocation2 + $0x1e0] sm:$0xff] %vm15_vm0, %v4708_v2  ;;  %78 = vst.msk [vmem:[#allocation2 + $0x1e8] sm:$0xff] %vm15_vm0, %v4708_v2  ;;  %v166_v50 = vld [vmem:[%s7634_s0 + $0x148] sm:$0xff]  ;;  %v167_v51 = vld [vmem:[%s7634_s0 + $0x150] sm:$0xff] }
  0x16   :  { %80 = vst.msk [vmem:[#allocation2 + $0x1f8] sm:$0xff] %vm15_vm0, %v4708_v2  ;;  %81 = vst.msk [vmem:[#allocation2 + $0x200] sm:$0xff] %vm15_vm0, %v4708_v2  ;;  %v168_v52 = vld [vmem:[%s7634_s0 + $0x158] sm:$0xff]  ;;  %v169_v53 = vld [vmem:[%s7634_s0 + $0x160] sm:$0xff] }
  0x17   :  { %83 = vst.msk [vmem:[#allocation2 + $0x210] sm:$0xff] %vm15_vm0, %v4708_v2  ;;  %84 = vst.msk [vmem:[#allocation2 + $0x218] sm:$0xff] %vm15_vm0, %v4708_v2  ;;  %v170_v54 = vld [vmem:[%s7634_s0 + $0x168] sm:$0xff]  ;;  %v171_v55 = vld [vmem:[%s7634_s0 + $0x170] sm:$0xff] }
  0x18   :  { %86 = vst.msk [vmem:[#allocation2 + $0x228] sm:$0xff] %vm15_vm0, %v4708_v2  ;;  %87 = vst.msk [vmem:[#allocation2 + $0x230] sm:$0xff] %vm15_vm0, %v4708_v2  ;;  %v172_v56 = vld [vmem:[%s7634_s0 + $0x178] sm:$0xff]  ;;  %v173_v59 = vld [vmem:[%s7634_s0 + $0x180] sm:$0xff] }
  0x19   :  { %89 = vst.msk [vmem:[#allocation2 + $0x240] sm:$0xff] %vm15_vm0, %v4708_v2  ;;  %90 = vst.msk [vmem:[#allocation2 + $0x248] sm:$0xff] %vm15_vm0, %v4708_v2  ;;  %v174_v60 = vld [vmem:[%s7634_s0 + $0x188] sm:$0xff] }
  0x1a   :  { %92 = vst.msk [vmem:[#allocation2 + $0x258] sm:$0xff] %vm15_vm0, %v4708_v2  ;;  %93 = vst.msk [vmem:[#allocation2 + $0x260] sm:$0xff] %vm15_vm0, %v4708_v2 }
  0x1b   :  { %95 = vst.msk [vmem:[#allocation2 + $0x270] sm:$0xff] %vm15_vm0, %v4708_v2  ;;  %96 = vst.msk [vmem:[#allocation2 + $0x278] sm:$0xff] %vm15_vm0, %v4708_v2 }
  0x1c   :  { %98 = vst.msk [vmem:[#allocation2 + $0x288] sm:$0xff] %vm15_vm0, %v4708_v2  ;;  %99 = vst.msk [vmem:[#allocation2 + $0x290] sm:$0xff] %vm15_vm0, %v4708_v2 }
  0x1d   :  { %101 = vst.msk [vmem:[#allocation2 + $0x2a0] sm:$0xff] %vm15_vm0, %v4708_v2  ;;  %102 = vst.msk [vmem:[#allocation2 + $0x2a8] sm:$0xff] %vm15_vm0, %v4708_v2 }
  0x1e   :  { %104 = vst.msk [vmem:[#allocation2 + $0x2b8] sm:$0xff] %vm15_vm0, %v4708_v2  ;;  %105 = vst.msk [vmem:[#allocation2 + $0x2c0] sm:$0xff] %vm15_vm0, %v4708_v2 }
  0x1f   :  { %107 = vst.msk [vmem:[#allocation2 + $0x2d0] sm:$0xff] %vm15_vm0, %v4708_v2  ;;  %108 = vst.msk [vmem:[#allocation2 + $0x2d8] sm:$0xff] %vm15_vm0, %v4708_v2 }
  0x20   :  { %110 = vst.msk [vmem:[#allocation2 + $0x2e8] sm:$0xff] %vm15_vm0, %v4708_v2  ;;  %111 = vst.msk [vmem:[#allocation2 + $0x2f0] sm:$0xff] %vm15_vm0, %v4708_v2 }
  0x21   :  { %113 = vst.msk [vmem:[#allocation2 + $0x300] sm:$0xff] %vm15_vm0, %v4708_v2  ;;  %114 = vst.msk [vmem:[#allocation2 + $0x308] sm:$0xff] %vm15_vm0, %v4708_v2 }
  0x22   :  { %116 = vst.msk [vmem:[#allocation2 + $0x318] sm:$0xff] %vm15_vm0, %v4708_v2  ;;  %117 = vst.msk [vmem:[#allocation2 + $0x320] sm:$0xff] %vm15_vm0, %v4708_v2 }
  0x23   :  { %119 = vst.msk [vmem:[#allocation2 + $0x330] sm:$0xff] %vm15_vm0, %v4708_v2  ;;  %120 = vst.msk [vmem:[#allocation2 + $0x338] sm:$0xff] %vm15_vm0, %v4708_v2 }
  0x24   :  { %122 = vst.msk [vmem:[#allocation2 + $0x348] sm:$0xff] %vm15_vm0, %v4708_v2  ;;  %123 = vst.msk [vmem:[#allocation2 + $0x350] sm:$0xff] %vm15_vm0, %v4708_v2 }
  0x25   :  { %19 = vst.msk [vmem:[#allocation2 + $0x10] sm:$0x3] %vm18_vm1, %v4708_v2  ;;  %22 = vst.msk [vmem:[#allocation2 + $0x28] sm:$0x3] %vm18_vm1, %v4708_v2 }
  0x26   :  { %25 = vst.msk [vmem:[#allocation2 + $0x40] sm:$0x3] %vm18_vm1, %v4708_v2  ;;  %28 = vst.msk [vmem:[#allocation2 + $0x58] sm:$0x3] %vm18_vm1, %v4708_v2 }
  0x27   :  { %31 = vst.msk [vmem:[#allocation2 + $0x70] sm:$0x3] %vm18_vm1, %v4708_v2  ;;  %34 = vst.msk [vmem:[#allocation2 + $0x88] sm:$0x3] %vm18_vm1, %v4708_v2 }
  0x28   :  { %37 = vst.msk [vmem:[#allocation2 + $0xa0] sm:$0x3] %vm18_vm1, %v4708_v2  ;;  %40 = vst.msk [vmem:[#allocation2 + $0xb8] sm:$0x3] %vm18_vm1, %v4708_v2 }
  0x29   :  { %43 = vst.msk [vmem:[#allocation2 + $0xd0] sm:$0x3] %vm18_vm1, %v4708_v2  ;;  %46 = vst.msk [vmem:[#allocation2 + $0xe8] sm:$0x3] %vm18_vm1, %v4708_v2 }
  0x2a   :  { %49 = vst.msk [vmem:[#allocation2 + $0x100] sm:$0x3] %vm18_vm1, %v4708_v2  ;;  %52 = vst.msk [vmem:[#allocation2 + $0x118] sm:$0x3] %vm18_vm1, %v4708_v2 }
  0x2b   :  { %55 = vst.msk [vmem:[#allocation2 + $0x130] sm:$0x3] %vm18_vm1, %v4708_v2  ;;  %58 = vst.msk [vmem:[#allocation2 + $0x148] sm:$0x3] %vm18_vm1, %v4708_v2 }
  0x2c   :  { %61 = vst.msk [vmem:[#allocation2 + $0x160] sm:$0x3] %vm18_vm1, %v4708_v2  ;;  %64 = vst.msk [vmem:[#allocation2 + $0x178] sm:$0x3] %vm18_vm1, %v4708_v2  ;;  %v319_v27 = vld [vmem:[#allocation2 + $0x9] sm:$0xff] }
  0x2d   :  { %67 = vst.msk [vmem:[#allocation2 + $0x190] sm:$0x3] %vm18_vm1, %v4708_v2  ;;  %70 = vst.msk [vmem:[#allocation2 + $0x1a8] sm:$0x3] %vm18_vm1, %v4708_v2  ;;  %897 = vrot.lane.b32.xlu0 %v319_v27, %s4709_s6 }
  0x2e   :  { %73 = vst.msk [vmem:[#allocation2 + $0x1c0] sm:$0x3] %vm18_vm1, %v4708_v2  ;;  %76 = vst.msk [vmem:[#allocation2 + $0x1d8] sm:$0x3] %vm18_vm1, %v4708_v2 }
  0x2f   :  { %79 = vst.msk [vmem:[#allocation2 + $0x1f0] sm:$0x3] %vm18_vm1, %v4708_v2  ;;  %82 = vst.msk [vmem:[#allocation2 + $0x208] sm:$0x3] %vm18_vm1, %v4708_v2 }
  0x30   :  { %85 = vst.msk [vmem:[#allocation2 + $0x220] sm:$0x3] %vm18_vm1, %v4708_v2  ;;  %88 = vst.msk [vmem:[#allocation2 + $0x238] sm:$0x3] %vm18_vm1, %v4708_v2 }
  0x31   :  { %91 = vst.msk [vmem:[#allocation2 + $0x250] sm:$0x3] %vm18_vm1, %v4708_v2  ;;  %94 = vst.msk [vmem:[#allocation2 + $0x268] sm:$0x3] %vm18_vm1, %v4708_v2 }
  0x32   :  { %97 = vst.msk [vmem:[#allocation2 + $0x280] sm:$0x3] %vm18_vm1, %v4708_v2  ;;  %100 = vst.msk [vmem:[#allocation2 + $0x298] sm:$0x3] %vm18_vm1, %v4708_v2 }
  0x33   :  { %103 = vst.msk [vmem:[#allocation2 + $0x2b0] sm:$0x3] %vm18_vm1, %v4708_v2  ;;  %106 = vst.msk [vmem:[#allocation2 + $0x2c8] sm:$0x3] %vm18_vm1, %v4708_v2 }
  0x34   :  { %109 = vst.msk [vmem:[#allocation2 + $0x2e0] sm:$0x3] %vm18_vm1, %v4708_v2  ;;  %112 = vst.msk [vmem:[#allocation2 + $0x2f8] sm:$0x3] %vm18_vm1, %v4708_v2 }
  0x35   :  { %115 = vst.msk [vmem:[#allocation2 + $0x310] sm:$0x3] %vm18_vm1, %v4708_v2  ;;  %118 = vst.msk [vmem:[#allocation2 + $0x328] sm:$0x3] %vm18_vm1, %v4708_v2 }
  0x36   :  { %121 = vst.msk [vmem:[#allocation2 + $0x340] sm:$0x3] %vm18_vm1, %v4708_v2  ;;  %124 = vst.msk [vmem:[#allocation2 + $0x358] sm:$0x3] %vm18_vm1, %v4708_v2  ;;  %v177_v2 = vld [vmem:[%s7634_s0 + $0x1a0] sm:$0xff] }
  0x37   :  { %190 = vst.msk [vmem:[#allocation2 + $0x19] sm:$0xff] %vm15_vm0, %v4744_v0  ;;  %191 = vst.msk [vmem:[#allocation2 + $0x21] sm:$0xff] %vm15_vm0, %v4749_v1  ;;  %v175_v0 = vld [vmem:[%s7634_s0 + $0x190] sm:$0xff]  ;;  %v176_v1 = vld [vmem:[%s7634_s0 + $0x198] sm:$0xff] }
  0x38   :  { %192 = vst.msk [vmem:[#allocation2 + $0x31] sm:$0xff] %vm15_vm0, %v127_v3  ;;  %193 = vst.msk [vmem:[#allocation2 + $0x39] sm:$0xff] %vm15_vm0, %v128_v4  ;;  %v178_v3 = vld [vmem:[%s7634_s0 + $0x1a8] sm:$0xff]  ;;  %v179_v4 = vld [vmem:[%s7634_s0 + $0x1b0] sm:$0xff] }
  0x39   :  { %194 = vst.msk [vmem:[#allocation2 + $0x49] sm:$0xff] %vm15_vm0, %v129_v5  ;;  %195 = vst.msk [vmem:[#allocation2 + $0x51] sm:$0xff] %vm15_vm0, %v130_v6  ;;  %v180_v5 = vld [vmem:[%s7634_s0 + $0x1b8] sm:$0xff] }
  0x3a   :  { %196 = vst.msk [vmem:[#allocation2 + $0x61] sm:$0xff] %vm15_vm0, %v131_v7  ;;  %197 = vst.msk [vmem:[#allocation2 + $0x69] sm:$0xff] %vm15_vm0, %v132_v8  ;;  %v181_v7 = vld [vmem:[%s7634_s0 + $0x1c0] sm:$0xff]  ;;  %v182_v8 = vld [vmem:[%s7634_s0 + $0x1c8] sm:$0xff] }
  0x3b   :  { %198 = vst.msk [vmem:[#allocation2 + $0x79] sm:$0xff] %vm15_vm0, %v133_v9  ;;  %199 = vst.msk [vmem:[#allocation2 + $0x81] sm:$0xff] %vm15_vm0, %v134_v10  ;;  %v183_v9 = vld [vmem:[%s7634_s0 + $0x1d0] sm:$0xff] }
  0x3c   :  { %200 = vst.msk [vmem:[#allocation2 + $0x91] sm:$0xff] %vm15_vm0, %v135_v11  ;;  %201 = vst.msk [vmem:[#allocation2 + $0x99] sm:$0xff] %vm15_vm0, %v136_v12  ;;  %v184_v11 = vld [vmem:[%s7634_s0 + $0x1d8] sm:$0xff] }
  0x3d   :  { %202 = vst.msk [vmem:[#allocation2 + $0xa9] sm:$0xff] %vm15_vm0, %v137_v13  ;;  %203 = vst.msk [vmem:[#allocation2 + $0xb1] sm:$0xff] %vm15_vm0, %v138_v14  ;;  %v185_v13 = vld [vmem:[%s7634_s0 + $0x1e0] sm:$0xff]  ;;  %v186_v14 = vld [vmem:[%s7634_s0 + $0x1e8] sm:$0xff] }
  0x3e   :  { %204 = vst.msk [vmem:[#allocation2 + $0xc1] sm:$0xff] %vm15_vm0, %v139_v15  ;;  %205 = vst.msk [vmem:[#allocation2 + $0xc9] sm:$0xff] %vm15_vm0, %v140_v16  ;;  %v320_v26 = vld [vmem:[#allocation2 + $0x19] sm:$0xff]  ;;  %v321_v28 = vld [vmem:[#allocation2 + $0x21] sm:$0xff] }
  0x3f   :  { %206 = vst.msk [vmem:[#allocation2 + $0xd9] sm:$0xff] %vm15_vm0, %v141_v17  ;;  %207 = vst.msk [vmem:[#allocation2 + $0xe1] sm:$0xff] %vm15_vm0, %v142_v18  ;;  %899 = vrot.lane.b32.xlu1 %v320_v26, %s4709_s6  ;;  %v322_v29 = vld [vmem:[#allocation2 + $0x31] sm:$0xff]  ;;  %v323_v30 = vld [vmem:[#allocation2 + $0x39] sm:$0xff] }
  0x40   :  { %208 = vst.msk [vmem:[#allocation2 + $0xf1] sm:$0xff] %vm15_vm0, %v143_v19  ;;  %209 = vst.msk [vmem:[#allocation2 + $0xf9] sm:$0xff] %vm15_vm0, %v144_v20  ;;  %v324_v31 = vld [vmem:[#allocation2 + $0x49] sm:$0xff]  ;;  %903 = vrot.lane.b32.xlu0 %v322_v29, %s4709_s6  ;;  %v325_v38 = vld [vmem:[#allocation2 + $0x51] sm:$0xff] }
  0x41   :  { %210 = vst.msk [vmem:[#allocation2 + $0x109] sm:$0xff] %vm15_vm0, %v145_v21  ;;  %211 = vst.msk [vmem:[#allocation2 + $0x111] sm:$0xff] %vm15_vm0, %v146_v22  ;;  %v326_v40 = vld [vmem:[#allocation2 + $0x61] sm:$0xff]  ;;  %v327_v44 = vld [vmem:[#allocation2 + $0x69] sm:$0xff] }
  0x42   :  { %212 = vst.msk [vmem:[#allocation2 + $0x121] sm:$0xff] %vm15_vm0, %v147_v23  ;;  %213 = vst.msk [vmem:[#allocation2 + $0x129] sm:$0xff] %vm15_vm0, %v148_v25  ;;  %v328_v57 = vld [vmem:[#allocation2 + $0x79] sm:$0xff]  ;;  %v329_v58 = vld [vmem:[#allocation2 + $0x81] sm:$0xff] }
  0x43   :  { %901 = vrot.lane.b32.xlu1 %v321_v28, %s4709_s6  ;;  %214 = vst.msk [vmem:[#allocation2 + $0x139] sm:$0xff] %vm15_vm0, %v149_v32  ;;  %215 = vst.msk [vmem:[#allocation2 + $0x141] sm:$0xff] %vm15_vm0, %v150_v33  ;;  %v330_v61 = vld [vmem:[#allocation2 + $0x91] sm:$0xff]  ;;  %v331_v62 = vld [vmem:[#allocation2 + $0x99] sm:$0xff] }
  0x44   :  { %216 = vst.msk [vmem:[#allocation2 + $0x151] sm:$0xff] %vm15_vm0, %v151_v34  ;;  %217 = vst.msk [vmem:[#allocation2 + $0x159] sm:$0xff] %vm15_vm0, %v152_v35  ;;  %907 = vrot.lane.b32.xlu0 %v324_v31, %s4709_s6  ;;  %v332_v63 = vld [vmem:[#allocation2 + $0xa9] sm:$0xff]  ;;  %v333_v6 = vld [vmem:[#allocation2 + $0xb1] sm:$0xff] }
  0x45   :  { %218 = vst.msk [vmem:[#allocation2 + $0x169] sm:$0xff] %vm15_vm0, %v153_v36  ;;  %219 = vst.msk [vmem:[#allocation2 + $0x171] sm:$0xff] %vm15_vm0, %v154_v37  ;;  %v334_v10 = vld [vmem:[#allocation2 + $0xc1] sm:$0xff]  ;;  %v335_v12 = vld [vmem:[#allocation2 + $0xc9] sm:$0xff] }
  0x46   :  { %222 = vst.msk [vmem:[#allocation2 + $0x1c9] sm:$0xff] %vm15_vm0, %v157_v39  ;;  %223 = vst.msk [vmem:[#allocation2 + $0x1d1] sm:$0xff] %vm15_vm0, %v158_v41  ;;  %v336_v15 = vld [vmem:[#allocation2 + $0xd9] sm:$0xff]  ;;  %v337_v16 = vld [vmem:[#allocation2 + $0xe1] sm:$0xff] }
  0x47   :  { %905 = vrot.lane.b32.xlu1 %v323_v30, %s4709_s6  ;;  %224 = vst.msk [vmem:[#allocation2 + $0x1e1] sm:$0xff] %vm15_vm0, %v159_v42  ;;  %225 = vst.msk [vmem:[#allocation2 + $0x1e9] sm:$0xff] %vm15_vm0, %v160_v43  ;;  %v338_v17 = vld [vmem:[#allocation2 + $0xf1] sm:$0xff]  ;;  %v339_v18 = vld [vmem:[#allocation2 + $0xf9] sm:$0xff] }
  0x48   :  { %226 = vst.msk [vmem:[#allocation2 + $0x1f9] sm:$0xff] %vm15_vm0, %v161_v45  ;;  %227 = vst.msk [vmem:[#allocation2 + $0x201] sm:$0xff] %vm15_vm0, %v162_v46  ;;  %911 = vrot.lane.b32.xlu0 %v326_v40, %s4709_s6  ;;  %v340_v19 = vld [vmem:[#allocation2 + $0x109] sm:$0xff]  ;;  %v341_v20 = vld [vmem:[#allocation2 + $0x111] sm:$0xff] }
  0x49   :  { %228 = vst.msk [vmem:[#allocation2 + $0x211] sm:$0xff] %vm15_vm0, %v163_v47  ;;  %229 = vst.msk [vmem:[#allocation2 + $0x219] sm:$0xff] %vm15_vm0, %v164_v48  ;;  %v342_v21 = vld [vmem:[#allocation2 + $0x121] sm:$0xff]  ;;  %v343_v22 = vld [vmem:[#allocation2 + $0x129] sm:$0xff] }
  0x4a   :  { %230 = vst.msk [vmem:[#allocation2 + $0x229] sm:$0xff] %vm15_vm0, %v165_v49  ;;  %231 = vst.msk [vmem:[#allocation2 + $0x231] sm:$0xff] %vm15_vm0, %v166_v50  ;;  %v344_v23 = vld [vmem:[#allocation2 + $0x139] sm:$0xff]  ;;  %v345_v24 = vld [vmem:[#allocation2 + $0x141] sm:$0xff] }
  0x4b   :  { %909 = vrot.lane.b32.xlu1 %v325_v38, %s4709_s6  ;;  %232 = vst.msk [vmem:[#allocation2 + $0x241] sm:$0xff] %vm15_vm0, %v167_v51  ;;  %233 = vst.msk [vmem:[#allocation2 + $0x249] sm:$0xff] %vm15_vm0, %v168_v52  ;;  %v346_v25 = vld [vmem:[#allocation2 + $0x151] sm:$0xff] }
  0x4c   :  { %234 = vst.msk [vmem:[#allocation2 + $0x259] sm:$0xff] %vm15_vm0, %v169_v53  ;;  %235 = vst.msk [vmem:[#allocation2 + $0x261] sm:$0xff] %vm15_vm0, %v170_v54  ;;  %915 = vrot.lane.b32.xlu0 %v328_v57, %s4709_s6 }
  0x4d   :  { %236 = vst.msk [vmem:[#allocation2 + $0x271] sm:$0xff] %vm15_vm0, %v171_v55  ;;  %237 = vst.msk [vmem:[#allocation2 + $0x279] sm:$0xff] %vm15_vm0, %v172_v56 }
  0x4e   :  { %238 = vst.msk [vmem:[#allocation2 + $0x289] sm:$0xff] %vm15_vm0, %v173_v59  ;;  %239 = vst.msk [vmem:[#allocation2 + $0x291] sm:$0xff] %vm15_vm0, %v174_v60 }
  0x4f   :  { %913 = vrot.lane.b32.xlu1 %v327_v44, %s4709_s6  ;;  %240 = vst.msk [vmem:[#allocation2 + $0x2a1] sm:$0xff] %vm15_vm0, %v175_v0  ;;  %241 = vst.msk [vmem:[#allocation2 + $0x2a9] sm:$0xff] %vm15_vm0, %v176_v1 }
  0x50   :  { %919 = vrot.lane.b32.xlu0 %v330_v61, %s4709_s6  ;;  %242 = vst.msk [vmem:[#allocation2 + $0x2b9] sm:$0xff] %vm15_vm0, %v177_v2  ;;  %243 = vst.msk [vmem:[#allocation2 + $0x2c1] sm:$0xff] %vm15_vm0, %v178_v3 }
  0x51   :  { %244 = vst.msk [vmem:[#allocation2 + $0x2d1] sm:$0xff] %vm15_vm0, %v179_v4  ;;  %245 = vst.msk [vmem:[#allocation2 + $0x2d9] sm:$0xff] %vm15_vm0, %v180_v5 }
  0x52   :  { %246 = vst.msk [vmem:[#allocation2 + $0x2e9] sm:$0xff] %vm15_vm0, %v181_v7  ;;  %247 = vst.msk [vmem:[#allocation2 + $0x2f1] sm:$0xff] %vm15_vm0, %v182_v8 }
  0x53   :  { %917 = vrot.lane.b32.xlu1 %v329_v58, %s4709_s6  ;;  %248 = vst.msk [vmem:[#allocation2 + $0x301] sm:$0xff] %vm15_vm0, %v183_v9  ;;  %249 = vst.msk [vmem:[#allocation2 + $0x309] sm:$0xff] %vm15_vm0, %v184_v11 }
  0x54   :  { %923 = vrot.lane.b32.xlu0 %v332_v63, %s4709_s6  ;;  %250 = vst.msk [vmem:[#allocation2 + $0x319] sm:$0xff] %vm15_vm0, %v185_v13  ;;  %251 = vst.msk [vmem:[#allocation2 + $0x321] sm:$0xff] %vm15_vm0, %v186_v14 }
  0x57   :  { %921 = vrot.lane.b32.xlu1 %v331_v62, %s4709_s6 }
  0x58   :  { %927 = vrot.lane.b32.xlu0 %v334_v10, %s4709_s6 }
  0x5b   :  { %925 = vrot.lane.b32.xlu1 %v333_v6, %s4709_s6 }
  0x5c   :  { %931 = vrot.lane.b32.xlu0 %v336_v15, %s4709_s6 }
  0x5f   :  { %929 = vrot.lane.b32.xlu1 %v335_v12, %s4709_s6 }
  0x60   :  { %935 = vrot.lane.b32.xlu0 %v338_v17, %s4709_s6 }
  0x63   :  { %933 = vrot.lane.b32.xlu1 %v337_v16, %s4709_s6 }
  0x64   :  { %939 = vrot.lane.b32.xlu0 %v340_v19, %s4709_s6 }
  0x67   :  { %937 = vrot.lane.b32.xlu1 %v339_v18, %s4709_s6 }
  0x68   :  { %943 = vrot.lane.b32.xlu0 %v342_v21, %s4709_s6 }
  0x6b   :  { %941 = vrot.lane.b32.xlu1 %v341_v20, %s4709_s6 }
  0x6c   :  { %947 = vrot.lane.b32.xlu0 %v344_v23, %s4709_s6 }
  0x6f   :  { %945 = vrot.lane.b32.xlu1 %v343_v22, %s4709_s6 }
  0x73   :  { %949 = vrot.lane.b32.xlu1 %v345_v24, %s4709_s6 }
  0x74   :  { %8 = vsyncpa [#allocation5], 0  ;;  %v347_v26 = vld [vmem:[#allocation2 + $0x159] sm:$0xff]  ;;  %951 = vrot.lane.b32.xlu0 %v346_v25, %s4709_s6  ;;  %v348_v27 = vld [vmem:[#allocation2 + $0x169] sm:$0xff]  ;;  %s4710_s27 = smov 6   ;;  %s4712_s9 = smov 12  }
  0x75   :  { %v349_v28 = vld [vmem:[#allocation2 + $0x171] sm:$0xff]  ;;  %v351_v30 = vld [vmem:[#allocation2 + $0x1b9] sm:$0xff]  ;;  %v352_v31 = vld [vmem:[#allocation2 + $0x1c9] sm:$0xff]  ;;  %s4713_s10 = smov 15   ;;  %s4714_s11 = smov 18   ;;  %vm3602_vm2 = vcmask 1042432  }
  0x76   :  { %v350_v29 = vld [vmem:[#allocation2 + $0x1b1] sm:$0xff]  ;;  %v354_v33 = vld [vmem:[#allocation2 + $0x1e1] sm:$0xff]  ;;  %v355_v34 = vld [vmem:[#allocation2 + $0x1e9] sm:$0xff]  ;;  %vm4715_vm3 = vmmov 1   ;;  %s4717_s20 = smov 24   ;;  %vm2943_vm5 = vcmask 48128  }
  0x77   :  { %953 = vrot.lane.b32.xlu1 %v347_v26, %s4709_s6  ;;  %v353_v32 = vld [vmem:[#allocation2 + $0x1d1] sm:$0xff]  ;;  %v356_v35 = vld [vmem:[#allocation2 + $0x1f9] sm:$0xff]  ;;  %v357_v36 = vld [vmem:[#allocation2 + $0x201] sm:$0xff]  ;;  %vm3008_vm6 = vcmask 72704   ;;  %vm3073_vm7 = vcmask 97280   ;;  %vm3138_vm8 = vcmask 121856  }
  0x78   :  { %955 = vrot.lane.b32.xlu0 %v348_v27, %s4709_s6  ;;  %v358_v37 = vld [vmem:[#allocation2 + $0x211] sm:$0xff]  ;;  %v359_v38 = vld [vmem:[#allocation2 + $0x219] sm:$0xff]  ;;  %v360_v39 = vld [vmem:[#allocation2 + $0x229] sm:$0xff]  ;;  %vm3203_vm9 = vcmask 146432   ;;  %vm3268_vm10 = vcmask 171008   ;;  %vm3333_vm11 = vcmask 195584  }
  0x79   :  { %v361_v40 = vld [vmem:[#allocation2 + $0x231] sm:$0xff]  ;;  %v362_v41 = vld [vmem:[#allocation2 + $0x241] sm:$0xff]  ;;  %v363_v42 = vld [vmem:[#allocation2 + $0x249] sm:$0xff]  ;;  %vm3409_vm12 = vcmask 220160   ;;  %vm4055_vm13 = vcmask 64512  }
  0x7a   :  { %v364_v43 = vld [vmem:[#allocation2 + $0x259] sm:$0xff]  ;;  %v365_v44 = vld [vmem:[#allocation2 + $0x261] sm:$0xff]  ;;  %v366_v45 = vld [vmem:[#allocation2 + $0x271] sm:$0xff] }
  0x7b   :  { %957 = vrot.lane.b32.xlu1 %v349_v28, %s4709_s6  ;;  %v367_v46 = vld [vmem:[#allocation2 + $0x279] sm:$0xff]  ;;  %v368_v47 = vld [vmem:[#allocation2 + $0x289] sm:$0xff]  ;;  %v369_v48 = vld [vmem:[#allocation2 + $0x291] sm:$0xff] }
  0x7c   :  { %959 = vrot.lane.b32.xlu0 %v350_v29, %s4709_s6  ;;  %v370_v49 = vld [vmem:[#allocation2 + $0x2a1] sm:$0xff]  ;;  %v371_v50 = vld [vmem:[#allocation2 + $0x2a9] sm:$0xff]  ;;  %v372_v51 = vld [vmem:[#allocation2 + $0x2b9] sm:$0xff] }
  0x7d   :  { %v373_v52 = vld [vmem:[#allocation2 + $0x2c1] sm:$0xff]  ;;  %v374_v53 = vld [vmem:[#allocation2 + $0x2d1] sm:$0xff]  ;;  %v375_v54 = vld [vmem:[#allocation2 + $0x2d9] sm:$0xff] }
  0x7e   :  { %v376_v55 = vld [vmem:[#allocation2 + $0x2e9] sm:$0xff]  ;;  %v377_v57 = vld [vmem:[#allocation2 + $0x2f1] sm:$0xff]  ;;  %v378_v59 = vld [vmem:[#allocation2 + $0x301] sm:$0xff] }
  0x7f   :  { %961 = vrot.lane.b32.xlu1 %v351_v30, %s4709_s6  ;;  %v5261_v56 = vpop.permute.xlu0 %895  ;;  %v379_v61 = vld [vmem:[#allocation2 + $0x309] sm:$0xff]  ;;  %v380_v63 = vld [vmem:[#allocation2 + $0x319] sm:$0xff]  ;;  %v381_v1 = vld [vmem:[#allocation2 + $0x321] sm:$0xff] }
  0x80   :  { %963 = vrot.lane.b32.xlu0 %v352_v31, %s4709_s6  ;;  %v382_v3 = vld [vmem:[#allocation2 + $0x2] sm:$0xff]  ;;  %v383_v5 = vld [vmem:[#allocation2 + $0xa] sm:$0xff]  ;;  %v384_v7 = vld [vmem:[#allocation2 + $0x1a] sm:$0xff] }
  0x81   :  { %v385_v9 = vld [vmem:[#allocation2 + $0x22] sm:$0xff]  ;;  %v386_v11 = vld [vmem:[#allocation2 + $0x32] sm:$0xff]  ;;  %v387_v13 = vld [vmem:[#allocation2 + $0x3a] sm:$0xff] }
  0x82   :  { %v388_v15 = vld [vmem:[#allocation2 + $0x4a] sm:$0xff]  ;;  %v389_v17 = vld [vmem:[#allocation2 + $0x52] sm:$0xff]  ;;  %v390_v19 = vld [vmem:[#allocation2 + $0x62] sm:$0xff] }
  0x83   :  { %965 = vrot.lane.b32.xlu1 %v353_v32, %s4709_s6  ;;  %v391_v21 = vld [vmem:[#allocation2 + $0x6a] sm:$0xff]  ;;  %v392_v23 = vld [vmem:[#allocation2 + $0x7a] sm:$0xff]  ;;  %v393_v25 = vld [vmem:[#allocation2 + $0x82] sm:$0xff] }
  0x84   :  { %967 = vrot.lane.b32.xlu0 %v354_v33, %s4709_s6  ;;  %v394_v27 = vld [vmem:[#allocation2 + $0x92] sm:$0xff]  ;;  %v395_v29 = vld [vmem:[#allocation2 + $0x9a] sm:$0xff]  ;;  %v396_v31 = vld [vmem:[#allocation2 + $0xaa] sm:$0xff] }
  0x85   :  { %v397_v33 = vld [vmem:[#allocation2 + $0xb2] sm:$0xff]  ;;  %vm4601_vm4 = vmpackc.low %vm3602_vm2, %vm4715_vm3 }
  0x87   :  { %969 = vrot.lane.b32.xlu1 %v355_v34, %s4709_s6 }
  0x88   :  { %971 = vrot.lane.b32.xlu0 %v356_v35, %s4709_s6  ;;  %v398_v35 = vld [vmem:[#allocation2 + $0xc2] sm:$0xff] }
  0x8b   :  { %973 = vrot.lane.b32.xlu1 %v357_v36, %s4709_s6 }
  0x8c   :  { %975 = vrot.lane.b32.xlu0 %v358_v37, %s4709_s6  ;;  %v399_v37 = vld [vmem:[#allocation2 + $0xca] sm:$0xff] }
  0x8f   :  { %977 = vrot.lane.b32.xlu1 %v359_v38, %s4709_s6 }
  0x90   :  { %979 = vrot.lane.b32.xlu0 %v360_v39, %s4709_s6  ;;  %v400_v39 = vld [vmem:[#allocation2 + $0xda] sm:$0xff] }
  0x93   :  { %981 = vrot.lane.b32.xlu1 %v361_v40, %s4709_s6 }
  0x94   :  { %983 = vrot.lane.b32.xlu0 %v362_v41, %s4709_s6  ;;  %v401_v41 = vld [vmem:[#allocation2 + $0xe2] sm:$0xff] }
  0x97   :  { %985 = vrot.lane.b32.xlu1 %v363_v42, %s4709_s6 }
  0x98   :  { %987 = vrot.lane.b32.xlu0 %v364_v43, %s4709_s6  ;;  %v402_v43 = vld [vmem:[#allocation2 + $0xf2] sm:$0xff] }
  0x9b   :  { %989 = vrot.lane.b32.xlu1 %v365_v44, %s4709_s6 }
  0x9c   :  { %991 = vrot.lane.b32.xlu0 %v366_v45, %s4709_s6  ;;  %v403_v45 = vld [vmem:[#allocation2 + $0xfa] sm:$0xff] }
  0x9f   :  { %993 = vrot.lane.b32.xlu1 %v367_v46, %s4709_s6  ;;  %v5267_v60 = vpop.permute.xlu0 %897 }
  0xa0   :  { %995 = vrot.lane.b32.xlu0 %v368_v47, %s4709_s6  ;;  %v404_v47 = vld [vmem:[#allocation2 + $0x10a] sm:$0xff] }
  0xa3   :  { %997 = vrot.lane.b32.xlu1 %v369_v48, %s4709_s6 }
  0xa4   :  { %999 = vrot.lane.b32.xlu0 %v370_v49, %s4709_s6  ;;  %v405_v49 = vld [vmem:[#allocation2 + $0x112] sm:$0xff] }
  0xa7   :  { %1001 = vrot.lane.b32.xlu1 %v371_v50, %s4709_s6 }
  0xa8   :  { %1003 = vrot.lane.b32.xlu0 %v372_v51, %s4709_s6  ;;  %v406_v51 = vld [vmem:[#allocation2 + $0x122] sm:$0xff] }
  0xab   :  { %1005 = vrot.lane.b32.xlu1 %v373_v52, %s4709_s6 }
  0xac   :  { %1007 = vrot.lane.b32.xlu0 %v374_v53, %s4709_s6  ;;  %v407_v53 = vld [vmem:[#allocation2 + $0x12a] sm:$0xff] }
  0xaf   :  { %1009 = vrot.lane.b32.xlu1 %v375_v54, %s4709_s6 }
  0xb0   :  { %1011 = vrot.lane.b32.xlu0 %v376_v55, %s4709_s6  ;;  %v408_v55 = vld [vmem:[#allocation2 + $0x13a] sm:$0xff] }
  0xb1   :  { %v5263_v58 = vpop.permute.xlu1 %899 }
  0xb2   :  { %v5273_v0 = vpop.permute.xlu0 %903 }
  0xb3   :  { %1013 = vrot.lane.b32.xlu1 %v377_v57, %s4709_s6  ;;  %7642 = vst [vmem:[#allocation8_spill] sm:$0xff] %v5273_v0 }
  0xb4   :  { %1015 = vrot.lane.b32.xlu0 %v378_v59, %s4709_s6  ;;  %v409_v59 = vld [vmem:[#allocation2 + $0x142] sm:$0xff] }
  0xb5   :  { %v5269_v62 = vpop.permute.xlu1 %901 }
  0xb6   :  { %7641 = vst [vmem:[#allocation7_spill] sm:$0xff] %v5269_v62  ;;  %v5279_v4 = vpop.permute.xlu0 %907 }
  0xb7   :  { %1017 = vrot.lane.b32.xlu1 %v379_v61, %s4709_s6  ;;  %7644 = vst [vmem:[#allocation10_spill] sm:$0xff] %v5279_v4 }
  0xb8   :  { %1019 = vrot.lane.b32.xlu0 %v380_v63, %s4709_s6  ;;  %v155_v63 = vld [vmem:[%s7634_s0 + $0xf0] sm:$0xff] }
  0xb9   :  { %v5275_v2 = vpop.permute.xlu1 %905  ;;  %220 = vst.msk [vmem:[#allocation2 + $0x181] sm:$0xff] %vm15_vm0, %v155_v63  ;;  %v424_v63 = vld [vmem:[#allocation2 + $0x22a] sm:$0xff] }
  0xba   :  { %7643 = vst [vmem:[#allocation9_spill] sm:$0xff] %v5275_v2  ;;  %v5285_v8 = vpop.permute.xlu0 %911  ;;  %v607_v2 = vld [vmem:[#allocation2 + $0x1d2] sm:$0xff] }
  0xbb   :  { %1021 = vrot.lane.b32.xlu1 %v381_v1, %s4709_s6  ;;  %7646 = vst [vmem:[#allocation12_spill] sm:$0xff] %v5285_v8  ;;  %v156_v1 = vld [vmem:[%s7634_s0 + $0xf8] sm:$0xff] }
  0xbc   :  { %1151 = vrot.lane.b32.xlu0 %v382_v3, %s4710_s27  ;;  %v410_v3 = vld [vmem:[#allocation2 + $0x152] sm:$0xff]  ;;  %221 = vst.msk [vmem:[#allocation2 + $0x189] sm:$0xff] %vm15_vm0, %v156_v1 }
  0xbd   :  { %v5281_v6 = vpop.permute.xlu1 %909 }
  0xbe   :  { %7645 = vst [vmem:[#allocation11_spill] sm:$0xff] %v5281_v6  ;;  %v5291_v12 = vpop.permute.xlu0 %915  ;;  %v5929_v6 = vld [vmem:[#allocation2 + $0x82] sm:$0xff] }
  0xbf   :  { %1153 = vrot.lane.b32.xlu1 %v383_v5, %s4710_s27  ;;  %7648 = vst [vmem:[#allocation14_spill] sm:$0xff] %v5291_v12 }
  0xc0   :  { %1155 = vrot.lane.b32.xlu0 %v384_v7, %s4710_s27  ;;  %v411_v7 = vld [vmem:[#allocation2 + $0x15a] sm:$0xff] }
  0xc1   :  { %v5287_v10 = vpop.permute.xlu1 %913 }
  0xc2   :  { %7647 = vst [vmem:[#allocation13_spill] sm:$0xff] %v5287_v10  ;;  %v5297_v16 = vpop.permute.xlu0 %919 }
  0xc3   :  { %1157 = vrot.lane.b32.xlu1 %v385_v9, %s4710_s27  ;;  %7650 = vst [vmem:[#allocation16_spill] sm:$0xff] %v5297_v16 }
  0xc4   :  { %1159 = vrot.lane.b32.xlu0 %v386_v11, %s4710_s27  ;;  %v412_v11 = vld [vmem:[#allocation2 + $0x16a] sm:$0xff] }
  0xc5   :  { %v5293_v14 = vpop.permute.xlu1 %917 }
  0xc6   :  { %7649 = vst [vmem:[#allocation15_spill] sm:$0xff] %v5293_v14  ;;  %v5303_v20 = vpop.permute.xlu0 %923 }
  0xc7   :  { %1161 = vrot.lane.b32.xlu1 %v387_v13, %s4710_s27  ;;  %7652 = vst [vmem:[#allocation18_spill] sm:$0xff] %v5303_v20  ;;  %v297_v20 = vld [vmem:[#allocation2 + $0x230] sm:$0xff] }
  0xc8   :  { %1163 = vrot.lane.b32.xlu0 %v388_v15, %s4710_s27  ;;  %v413_v15 = vld [vmem:[#allocation2 + $0x172] sm:$0xff] }
  0xc9   :  { %v5299_v18 = vpop.permute.xlu1 %921 }
  0xca   :  { %7651 = vst [vmem:[#allocation17_spill] sm:$0xff] %v5299_v18  ;;  %v5309_v24 = vpop.permute.xlu0 %927 }
  0xcb   :  { %1165 = vrot.lane.b32.xlu1 %v389_v17, %s4710_s27  ;;  %7654 = vst [vmem:[#allocation20_spill] sm:$0xff] %v5309_v24  ;;  %v291_v24 = vld [vmem:[#allocation2 + $0x1e8] sm:$0xff] }
  0xcc   :  { %1167 = vrot.lane.b32.xlu0 %v390_v19, %s4710_s27  ;;  %v414_v19 = vld [vmem:[#allocation2 + $0x1b2] sm:$0xff] }
  0xcd   :  { %v5305_v22 = vpop.permute.xlu1 %925 }
  0xce   :  { %7653 = vst [vmem:[#allocation19_spill] sm:$0xff] %v5305_v22  ;;  %v5315_v28 = vpop.permute.xlu0 %931 }
  0xcf   :  { %1169 = vrot.lane.b32.xlu1 %v391_v21, %s4710_s27  ;;  %7656 = vst [vmem:[#allocation22_spill] sm:$0xff] %v5315_v28  ;;  %v271_v28 = vld [vmem:[#allocation2 + $0xc8] sm:$0xff] }
  0xd0   :  { %1171 = vrot.lane.b32.xlu0 %v392_v23, %s4710_s27  ;;  %v415_v23 = vld [vmem:[#allocation2 + $0x1ba] sm:$0xff] }
  0xd1   :  { %v5311_v26 = vpop.permute.xlu1 %929 }
  0xd2   :  { %7655 = vst [vmem:[#allocation21_spill] sm:$0xff] %v5311_v26  ;;  %v5321_v32 = vpop.permute.xlu0 %935 }
  0xd3   :  { %1173 = vrot.lane.b32.xlu1 %v393_v25, %s4710_s27  ;;  %7658 = vst [vmem:[#allocation24_spill] sm:$0xff] %v5321_v32  ;;  %v267_v32 = vld [vmem:[#allocation2 + $0x98] sm:$0xff] }
  0xd4   :  { %1175 = vrot.lane.b32.xlu0 %v394_v27, %s4710_s27  ;;  %v416_v27 = vld [vmem:[#allocation2 + $0x1ca] sm:$0xff] }
  0xd5   :  { %v5317_v30 = vpop.permute.xlu1 %933 }
  0xd6   :  { %7657 = vst [vmem:[#allocation23_spill] sm:$0xff] %v5317_v30  ;;  %v5327_v36 = vpop.permute.xlu0 %939  ;;  %v269_v30 = vld [vmem:[#allocation2 + $0xb0] sm:$0xff] }
  0xd7   :  { %1177 = vrot.lane.b32.xlu1 %v395_v29, %s4710_s27  ;;  %7660 = vst [vmem:[#allocation26_spill] sm:$0xff] %v5327_v36  ;;  %v263_v36 = vld [vmem:[#allocation2 + $0x68] sm:$0xff] }
  0xd8   :  { %1179 = vrot.lane.b32.xlu0 %v396_v31, %s4710_s27  ;;  %v417_v31 = vld [vmem:[#allocation2 + $0x1d2] sm:$0xff] }
  0xd9   :  { %v5323_v34 = vpop.permute.xlu1 %937 }
  0xda   :  { %7659 = vst [vmem:[#allocation25_spill] sm:$0xff] %v5323_v34  ;;  %v5333_v40 = vpop.permute.xlu0 %943  ;;  %v265_v34 = vld [vmem:[#allocation2 + $0x80] sm:$0xff] }
  0xdb   :  { %1181 = vrot.lane.b32.xlu1 %v397_v33, %s4710_s27  ;;  %7662 = vst [vmem:[#allocation28_spill] sm:$0xff] %v5333_v40  ;;  %v259_v40 = vld [vmem:[#allocation2 + $0x38] sm:$0xff] }
  0xdc   :  { %1183 = vrot.lane.b32.xlu0 %v398_v35, %s4710_s27  ;;  %v418_v35 = vld [vmem:[#allocation2 + $0x1e2] sm:$0xff] }
  0xdd   :  { %v5329_v38 = vpop.permute.xlu1 %941 }
  0xde   :  { %7661 = vst [vmem:[#allocation27_spill] sm:$0xff] %v5329_v38  ;;  %v5339_v44 = vpop.permute.xlu0 %947  ;;  %v261_v38 = vld [vmem:[#allocation2 + $0x50] sm:$0xff] }
  0xdf   :  { %1185 = vrot.lane.b32.xlu1 %v399_v37, %s4710_s27  ;;  %7664 = vst [vmem:[#allocation30_spill] sm:$0xff] %v5339_v44 }
  0xe0   :  { %1187 = vrot.lane.b32.xlu0 %v400_v39, %s4710_s27  ;;  %v419_v39 = vld [vmem:[#allocation2 + $0x1ea] sm:$0xff] }
  0xe1   :  { %v5335_v42 = vpop.permute.xlu1 %945 }
  0xe2   :  { %7663 = vst [vmem:[#allocation29_spill] sm:$0xff] %v5335_v42 }
  0xe3   :  { %1189 = vrot.lane.b32.xlu1 %v401_v41, %s4710_s27 }
  0xe4   :  { %1191 = vrot.lane.b32.xlu0 %v402_v43, %s4710_s27  ;;  %v420_v43 = vld [vmem:[#allocation2 + $0x1fa] sm:$0xff] }
  0xe5   :  { %v5341_v46 = vpop.permute.xlu1 %949 }
  0xe6   :  { %7665 = vst [vmem:[#allocation31_spill] sm:$0xff] %v5341_v46  ;;  %v5345_v48 = vpop.permute.xlu0 %951  ;;  %v439_v46 = vld [vmem:[#allocation2 + $0x2da] sm:$0xff] }
  0xe7   :  { %1193 = vrot.lane.b32.xlu1 %v403_v45, %s4710_s27  ;;  %7666 = vst [vmem:[#allocation32_spill] sm:$0xff] %v5345_v48 }
  0xe8   :  { %1195 = vrot.lane.b32.xlu0 %v404_v47, %s4710_s27  ;;  %v421_v47 = vld [vmem:[#allocation2 + $0x202] sm:$0xff] }
  0xe9   :  { %v5347_v50 = vpop.permute.xlu1 %953 }
  0xea   :  { %7667 = vst [vmem:[#allocation33_spill] sm:$0xff] %v5347_v50  ;;  %v5351_v52 = vpop.permute.xlu0 %955  ;;  %v437_v50 = vld [vmem:[#allocation2 + $0x2c2] sm:$0xff] }
  0xeb   :  { %1197 = vrot.lane.b32.xlu1 %v405_v49, %s4710_s27  ;;  %7668 = vst [vmem:[#allocation34_spill] sm:$0xff] %v5351_v52 }
  0xec   :  { %1199 = vrot.lane.b32.xlu0 %v406_v51, %s4710_s27  ;;  %v422_v51 = vld [vmem:[#allocation2 + $0x212] sm:$0xff] }
  0xed   :  { %v5353_v54 = vpop.permute.xlu1 %957 }
  0xee   :  { %7669 = vst [vmem:[#allocation35_spill] sm:$0xff] %v5353_v54  ;;  %v5357_v57 = vpop.permute.xlu0 %959  ;;  %v435_v54 = vld [vmem:[#allocation2 + $0x2aa] sm:$0xff] }
  0xef   :  { %1201 = vrot.lane.b32.xlu1 %v407_v53, %s4710_s27 }
  0xf0   :  { %1203 = vrot.lane.b32.xlu0 %v408_v55, %s4710_s27  ;;  %v423_v55 = vld [vmem:[#allocation2 + $0x21a] sm:$0xff] }
  0xf1   :  { %v5359_v61 = vpop.permute.xlu1 %961 }
  0xf2   :  { %v5371_v5 = vpop.permute.xlu0 %963 }
  0xf3   :  { %1205 = vrot.lane.b32.xlu1 %v409_v59, %s4710_s27 }
  0xf4   :  { %1207 = vrot.lane.b32.xlu0 %v410_v3, %s4710_s27  ;;  %v425_v3 = vld [vmem:[#allocation2 + $0x232] sm:$0xff] }
  0xf5   :  { %v5373_v9 = vpop.permute.xlu1 %965 }
  0xf6   :  { %7670 = vst [vmem:[#allocation36_spill] sm:$0xff] %v5373_v9  ;;  %v5377_v13 = vpop.permute.xlu0 %967  ;;  %v627_v9 = vld [vmem:[#allocation2 + $0x2c2] sm:$0xff] }
  0xf7   :  { %1209 = vrot.lane.b32.xlu1 %v411_v7, %s4710_s27  ;;  %7671 = vst [vmem:[#allocation37_spill] sm:$0xff] %v5377_v13  ;;  %v6085_v13 = vld [vmem:[#allocation2 + $0x262] sm:$0xff] }
  0xf8   :  { %1211 = vrot.lane.b32.xlu0 %v412_v11, %s4710_s27  ;;  %v426_v11 = vld [vmem:[#allocation2 + $0x242] sm:$0xff] }
  0xf9   :  { %v5379_v17 = vpop.permute.xlu1 %969 }
  0xfa   :  { %7672 = vst [vmem:[#allocation38_spill] sm:$0xff] %v5379_v17  ;;  %v5383_v21 = vpop.permute.xlu0 %971 }
  0xfb   :  { %1213 = vrot.lane.b32.xlu1 %v413_v15, %s4710_s27  ;;  %7673 = vst [vmem:[#allocation39_spill] sm:$0xff] %v5383_v21  ;;  %v589_v21 = vld [vmem:[#allocation2 + $0xca] sm:$0xff] }
  0xfc   :  { %1215 = vrot.lane.b32.xlu0 %v414_v19, %s4710_s27  ;;  %v427_v19 = vld [vmem:[#allocation2 + $0x24a] sm:$0xff] }
  0xfd   :  { %v5385_v25 = vpop.permute.xlu1 %973 }
  0xfe   :  { %7674 = vst [vmem:[#allocation40_spill] sm:$0xff] %v5385_v25  ;;  %v5389_v29 = vpop.permute.xlu0 %975 }
  0xff   :  { %1217 = vrot.lane.b32.xlu1 %v415_v23, %s4710_s27  ;;  %7675 = vst [vmem:[#allocation41_spill] sm:$0xff] %v5389_v29 }
 0x100   :  { %1219 = vrot.lane.b32.xlu0 %v416_v27, %s4710_s27  ;;  %v428_v27 = vld [vmem:[#allocation2 + $0x25a] sm:$0xff] }
 0x101   :  { %v5391_v33 = vpop.permute.xlu1 %977 }
 0x102   :  { %7676 = vst [vmem:[#allocation42_spill] sm:$0xff] %v5391_v33  ;;  %v5395_v37 = vpop.permute.xlu0 %979  ;;  %v549_v33 = vld [vmem:[#allocation2 + $0x219] sm:$0xff] }
 0x103   :  { %1221 = vrot.lane.b32.xlu1 %v417_v31, %s4710_s27  ;;  %7677 = vst [vmem:[#allocation43_spill] sm:$0xff] %v5395_v37  ;;  %v543_v37 = vld [vmem:[#allocation2 + $0x1d1] sm:$0xff] }
 0x104   :  { %1223 = vrot.lane.b32.xlu0 %v418_v35, %s4710_s27  ;;  %v429_v35 = vld [vmem:[#allocation2 + $0x262] sm:$0xff] }
 0x105   :  { %v5397_v41 = vpop.permute.xlu1 %981 }
 0x106   :  { %7678 = vst [vmem:[#allocation44_spill] sm:$0xff] %v5397_v41  ;;  %v5401_v45 = vpop.permute.xlu0 %983  ;;  %v517_v41 = vld [vmem:[#allocation2 + $0x69] sm:$0xff] }
 0x107   :  { %1225 = vrot.lane.b32.xlu1 %v419_v39, %s4710_s27  ;;  %7679 = vst [vmem:[#allocation45_spill] sm:$0xff] %v5401_v45  ;;  %v513_v45 = vld [vmem:[#allocation2 + $0x39] sm:$0xff] }
 0x108   :  { %1227 = vrot.lane.b32.xlu0 %v420_v43, %s4710_s27  ;;  %v430_v43 = vld [vmem:[#allocation2 + $0x272] sm:$0xff] }
 0x109   :  { %v5403_v49 = vpop.permute.xlu1 %985 }
 0x10a   :  { %7680 = vst [vmem:[#allocation46_spill] sm:$0xff] %v5403_v49  ;;  %v5407_v53 = vpop.permute.xlu0 %987 }
 0x10b   :  { %1229 = vrot.lane.b32.xlu1 %v421_v47, %s4710_s27  ;;  %7681 = vst [vmem:[#allocation47_spill] sm:$0xff] %v5407_v53 }
 0x10c   :  { %1231 = vrot.lane.b32.xlu0 %v422_v51, %s4710_s27  ;;  %v431_v51 = vld [vmem:[#allocation2 + $0x27a] sm:$0xff] }
 0x10d   :  { %v5409_v59 = vpop.permute.xlu1 %989 }
 0x10e   :  { %7682 = vst [vmem:[#allocation48_spill] sm:$0xff] %v5409_v59  ;;  %v5413_v1 = vpop.permute.xlu0 %991  ;;  %v293_v59 = vld [vmem:[#allocation2 + $0x200] sm:$0xff] }
 0x10f   :  { %1233 = vrot.lane.b32.xlu1 %v423_v55, %s4710_s27  ;;  %7683 = vst [vmem:[#allocation49_spill] sm:$0xff] %v5413_v1 }
 0x110   :  { %1235 = vrot.lane.b32.xlu0 %v424_v63, %s4710_s27  ;;  %v432_v63 = vld [vmem:[#allocation2 + $0x28a] sm:$0xff] }
 0x111   :  { %v5415_v7 = vpop.permute.xlu1 %993 }
 0x112   :  { %7684 = vst [vmem:[#allocation50_spill] sm:$0xff] %v5415_v7  ;;  %v5419_v15 = vpop.permute.xlu0 %995 }
 0x113   :  { %1237 = vrot.lane.b32.xlu1 %v425_v3, %s4710_s27  ;;  %7685 = vst [vmem:[#allocation51_spill] sm:$0xff] %v5419_v15 }
 0x114   :  { %1239 = vrot.lane.b32.xlu0 %v426_v11, %s4710_s27  ;;  %v433_v11 = vld [vmem:[#allocation2 + $0x292] sm:$0xff] }
 0x115   :  { %v5421_v23 = vpop.permute.xlu1 %997 }
 0x116   :  { %7686 = vst [vmem:[#allocation52_spill] sm:$0xff] %v5421_v23  ;;  %v5425_v31 = vpop.permute.xlu0 %999 }
 0x117   :  { %1241 = vrot.lane.b32.xlu1 %v427_v19, %s4710_s27  ;;  %7687 = vst [vmem:[#allocation53_spill] sm:$0xff] %v5425_v31 }
 0x118   :  { %1243 = vrot.lane.b32.xlu0 %v428_v27, %s4710_s27  ;;  %v434_v27 = vld [vmem:[#allocation2 + $0x2a2] sm:$0xff] }
 0x119   :  { %v5427_v39 = vpop.permute.xlu1 %1001 }
 0x11a   :  { %7688 = vst [vmem:[#allocation54_spill] sm:$0xff] %v5427_v39  ;;  %v5431_v47 = vpop.permute.xlu0 %1003 }
 0x11b   :  { %1245 = vrot.lane.b32.xlu1 %v429_v35, %s4710_s27  ;;  %7689 = vst [vmem:[#allocation55_spill] sm:$0xff] %v5431_v47 }
 0x11c   :  { %1247 = vrot.lane.b32.xlu0 %v430_v43, %s4710_s27  ;;  %v436_v43 = vld [vmem:[#allocation2 + $0x2ba] sm:$0xff] }
 0x11d   :  { %v5433_v55 = vpop.permute.xlu1 %1005 }
 0x11e   :  { %7690 = vst [vmem:[#allocation56_spill] sm:$0xff] %v5433_v55  ;;  %v5437_v3 = vpop.permute.xlu0 %1007 }
 0x11f   :  { %1249 = vrot.lane.b32.xlu1 %v431_v51, %s4710_s27  ;;  %7691 = vst [vmem:[#allocation57_spill] sm:$0xff] %v5437_v3  ;;  %v257_v3 = vld [vmem:[#allocation2 + $0x20] sm:$0xff] }
 0x120   :  { %1251 = vrot.lane.b32.xlu0 %v432_v63, %s4710_s27  ;;  %v438_v63 = vld [vmem:[#allocation2 + $0x2d2] sm:$0xff] }
 0x121   :  { %v5439_v19 = vpop.permute.xlu1 %1009 }
 0x122   :  { %7692 = vst [vmem:[#allocation58_spill] sm:$0xff] %v5439_v19  ;;  %v5443_v35 = vpop.permute.xlu0 %1011 }
 0x123   :  { %1253 = vrot.lane.b32.xlu1 %v433_v11, %s4710_s27  ;;  %7693 = vst [vmem:[#allocation59_spill] sm:$0xff] %v5443_v35 }
 0x124   :  { %1255 = vrot.lane.b32.xlu0 %v434_v27, %s4710_s27 }
 0x125   :  { %v5445_v52 = vpop.permute.xlu1 %1013 }
 0x126   :  { %7694 = vst [vmem:[#allocation60_spill] sm:$0xff] %v5445_v52  ;;  %v5449_v51 = vpop.permute.xlu0 %1015 }
 0x127   :  { %1257 = vrot.lane.b32.xlu1 %v435_v54, %s4710_s27  ;;  %7695 = vst [vmem:[#allocation61_spill] sm:$0xff] %v5449_v51  ;;  %v440_v54 = vld [vmem:[#allocation2 + $0x2ea] sm:$0xff]  ;;  %v441_v51 = vld [vmem:[#allocation2 + $0x2f2] sm:$0xff] }
 0x128   :  { %1259 = vrot.lane.b32.xlu0 %v436_v43, %s4710_s27  ;;  %v188_v43 = vld [vmem:[%s7634_s0 + $0x1f8] sm:$0xff] }
 0x129   :  { %v5451_v48 = vpop.permute.xlu1 %1017  ;;  %253 = vst.msk [vmem:[#allocation2 + $0x339] sm:$0xff] %vm15_vm0, %v188_v43  ;;  %v256_v43 = vld [vmem:[#allocation2 + $0x18] sm:$0xff] }
 0x12a   :  { %7696 = vst [vmem:[#allocation62_spill] sm:$0xff] %v5451_v48  ;;  %v5455_v11 = vpop.permute.xlu0 %1019  ;;  %v445_v48 = vld [vmem:[#allocation2 + $0x322] sm:$0xff] }
 0x12b   :  { %1261 = vrot.lane.b32.xlu1 %v437_v50, %s4710_s27  ;;  %7697 = vst [vmem:[#allocation63_spill] sm:$0xff] %v5455_v11  ;;  %v187_v50 = vld [vmem:[%s7634_s0 + $0x1f0] sm:$0xff]  ;;  %s4711_s0 = smov 9  }
 0x12c   :  { %1263 = vrot.lane.b32.xlu0 %v438_v63, %s4710_s27  ;;  %252 = vst.msk [vmem:[#allocation2 + $0x331] sm:$0xff] %vm15_vm0, %v187_v50 }
 0x12d   :  { %v5457_v35 = vpop.permute.xlu1 %1021 }
 0x12e   :  { %7698 = vst [vmem:[#allocation64_spill] sm:$0xff] %v5457_v35  ;;  %v5461_v27 = vpop.permute.xlu0 %1151  ;;  %v443_v35 = vld [vmem:[#allocation2 + $0x30a] sm:$0xff] }
 0x12f   :  { %1265 = vrot.lane.b32.xlu1 %v439_v46, %s4710_s27  ;;  %v442_v46 = vld [vmem:[#allocation2 + $0x302] sm:$0xff] }
 0x130   :  { %1267 = vrot.lane.b32.xlu0 %v440_v54, %s4710_s27  ;;  %v444_v54 = vld [vmem:[#allocation2 + $0x31a] sm:$0xff] }
 0x131   :  { %v5463_v52 = vpop.permute.xlu1 %1153 }
 0x132   :  { %v5475_v63 = vpop.permute.xlu0 %1155 }
 0x133   :  { %1269 = vrot.lane.b32.xlu1 %v441_v51, %s4710_s27  ;;  %v509_v49 = vld [vmem:[#allocation2 + $0x338] sm:$0xff] }
 0x134   :  { %1271 = vrot.lane.b32.xlu0 %v442_v46, %s4710_s27  ;;  %v258_v46 = vld [vmem:[#allocation2 + $0x30] sm:$0xff] }
 0x135   :  { %v5477_v11 = vpop.permute.xlu1 %1157 }
 0x136   :  { %7699 = vst [vmem:[#allocation65_spill] sm:$0xff] %v5477_v11  ;;  %v5481_v50 = vpop.permute.xlu0 %1159 }
 0x137   :  { %1273 = vrot.lane.b32.xlu1 %v443_v35, %s4710_s27  ;;  %7700 = vst [vmem:[#allocation66_spill] sm:$0xff] %v5481_v50 }
 0x138   :  { %1275 = vrot.lane.b32.xlu0 %v444_v54, %s4710_s27  ;;  %v260_v54 = vld [vmem:[#allocation2 + $0x48] sm:$0xff] }
 0x139   :  { %v5483_v44 = vpop.permute.xlu1 %1161 }
 0x13a   :  { %7701 = vst [vmem:[#allocation67_spill] sm:$0xff] %v5483_v44  ;;  %v5487_v51 = vpop.permute.xlu0 %1163 }
 0x13b   :  { %1277 = vrot.lane.b32.xlu1 %v445_v48, %s4710_s27  ;;  %7702 = vst [vmem:[#allocation68_spill] sm:$0xff] %v5487_v51 }
 0x13c   :  { %1407 = vrot.lane.b32.xlu0 %v256_v43, %s4711_s0  ;;  %v262_v43 = vld [vmem:[#allocation2 + $0x60] sm:$0xff] }
 0x13d   :  { %v5489_v19 = vpop.permute.xlu1 %1165 }
 0x13e   :  { %7703 = vst [vmem:[#allocation69_spill] sm:$0xff] %v5489_v19  ;;  %v5493_v35 = vpop.permute.xlu0 %1167  ;;  %v5917_v19 = vld [vmem:[#allocation2 + $0x6a] sm:$0xff] }
 0x13f   :  { %1409 = vrot.lane.b32.xlu1 %v257_v3, %s4711_s0  ;;  %7704 = vst [vmem:[#allocation70_spill] sm:$0xff] %v5493_v35 }
 0x140   :  { %1411 = vrot.lane.b32.xlu0 %v258_v46, %s4711_s0  ;;  %v264_v46 = vld [vmem:[#allocation2 + $0x78] sm:$0xff] }
 0x141   :  { %v5495_v42 = vpop.permute.xlu1 %1169 }
 0x142   :  { %7705 = vst [vmem:[#allocation71_spill] sm:$0xff] %v5495_v42  ;;  %v5499_v48 = vpop.permute.xlu0 %1171 }
 0x143   :  { %1413 = vrot.lane.b32.xlu1 %v259_v40, %s4711_s0  ;;  %7706 = vst [vmem:[#allocation72_spill] sm:$0xff] %v5499_v48 }
 0x144   :  { %1415 = vrot.lane.b32.xlu0 %v260_v54, %s4711_s0  ;;  %v266_v54 = vld [vmem:[#allocation2 + $0x90] sm:$0xff] }
 0x145   :  { %v5501_v55 = vpop.permute.xlu1 %1173 }
 0x146   :  { %7707 = vst [vmem:[#allocation73_spill] sm:$0xff] %v5501_v55  ;;  %v5505_v3 = vpop.permute.xlu0 %1175 }
 0x147   :  { %1417 = vrot.lane.b32.xlu1 %v261_v38, %s4711_s0  ;;  %7708 = vst [vmem:[#allocation74_spill] sm:$0xff] %v5505_v3 }
 0x148   :  { %1419 = vrot.lane.b32.xlu0 %v262_v43, %s4711_s0  ;;  %v268_v43 = vld [vmem:[#allocation2 + $0xa8] sm:$0xff] }
 0x149   :  { %v5507_v47 = vpop.permute.xlu1 %1177 }
 0x14a   :  { %7709 = vst [vmem:[#allocation75_spill] sm:$0xff] %v5507_v47  ;;  %v5511_v40 = vpop.permute.xlu0 %1179 }
 0x14b   :  { %1421 = vrot.lane.b32.xlu1 %v263_v36, %s4711_s0  ;;  %7710 = vst [vmem:[#allocation76_spill] sm:$0xff] %v5511_v40  ;;  %v295_v40 = vld [vmem:[#allocation2 + $0x218] sm:$0xff] }
 0x14c   :  { %1423 = vrot.lane.b32.xlu0 %v264_v46, %s4711_s0  ;;  %v270_v46 = vld [vmem:[#allocation2 + $0xc0] sm:$0xff] }
 0x14d   :  { %v5513_v39 = vpop.permute.xlu1 %1181 }
 0x14e   :  { %7711 = vst [vmem:[#allocation77_spill] sm:$0xff] %v5513_v39  ;;  %v5517_v38 = vpop.permute.xlu0 %1183 }
 0x14f   :  { %1425 = vrot.lane.b32.xlu1 %v265_v34, %s4711_s0  ;;  %7712 = vst [vmem:[#allocation78_spill] sm:$0xff] %v5517_v38  ;;  %v289_v38 = vld [vmem:[#allocation2 + $0x1d0] sm:$0xff] }
 0x150   :  { %1427 = vrot.lane.b32.xlu0 %v266_v54, %s4711_s0  ;;  %v272_v54 = vld [vmem:[#allocation2 + $0xd8] sm:$0xff] }
 0x151   :  { %v5519_v31 = vpop.permute.xlu1 %1185 }
 0x152   :  { %7713 = vst [vmem:[#allocation79_spill] sm:$0xff] %v5519_v31  ;;  %v5523_v36 = vpop.permute.xlu0 %1187  ;;  %v477_v31 = vld [vmem:[#allocation2 + $0x188] sm:$0xff] }
 0x153   :  { %1429 = vrot.lane.b32.xlu1 %v267_v32, %s4711_s0  ;;  %7714 = vst [vmem:[#allocation80_spill] sm:$0xff] %v5523_v36 }
 0x154   :  { %1431 = vrot.lane.b32.xlu0 %v268_v43, %s4711_s0  ;;  %v274_v43 = vld [vmem:[#allocation2 + $0xf0] sm:$0xff] }
 0x155   :  { %v5525_v23 = vpop.permute.xlu1 %1189 }
 0x156   :  { %7715 = vst [vmem:[#allocation81_spill] sm:$0xff] %v5525_v23  ;;  %v5529_v34 = vpop.permute.xlu0 %1191  ;;  %v273_v23 = vld [vmem:[#allocation2 + $0xe0] sm:$0xff] }
 0x157   :  { %1433 = vrot.lane.b32.xlu1 %v269_v30, %s4711_s0  ;;  %7716 = vst [vmem:[#allocation82_spill] sm:$0xff] %v5529_v34 }
 0x158   :  { %1435 = vrot.lane.b32.xlu0 %v270_v46, %s4711_s0  ;;  %v276_v46 = vld [vmem:[#allocation2 + $0x108] sm:$0xff] }
 0x159   :  { %v5531_v15 = vpop.permute.xlu1 %1193 }
 0x15a   :  { %7717 = vst [vmem:[#allocation83_spill] sm:$0xff] %v5531_v15  ;;  %v5535_v32 = vpop.permute.xlu0 %1195  ;;  %v275_v15 = vld [vmem:[#allocation2 + $0xf8] sm:$0xff] }
 0x15b   :  { %1437 = vrot.lane.b32.xlu1 %v271_v28, %s4711_s0  ;;  %7718 = vst [vmem:[#allocation84_spill] sm:$0xff] %v5535_v32 }
 0x15c   :  { %1439 = vrot.lane.b32.xlu0 %v272_v54, %s4711_s0  ;;  %v278_v54 = vld [vmem:[#allocation2 + $0x120] sm:$0xff] }
 0x15d   :  { %v5537_v36 = vpop.permute.xlu1 %1197 }
 0x15e   :  { %7719 = vst [vmem:[#allocation85_spill] sm:$0xff] %v5537_v36  ;;  %v5541_v30 = vpop.permute.xlu0 %1199  ;;  %v277_v36 = vld [vmem:[#allocation2 + $0x110] sm:$0xff] }
 0x15f   :  { %1441 = vrot.lane.b32.xlu1 %v273_v23, %s4711_s0  ;;  %7720 = vst [vmem:[#allocation86_spill] sm:$0xff] %v5541_v30 }
 0x160   :  { %1443 = vrot.lane.b32.xlu0 %v274_v43, %s4711_s0  ;;  %v280_v43 = vld [vmem:[#allocation2 + $0x138] sm:$0xff] }
 0x161   :  { %v5543_v34 = vpop.permute.xlu1 %1201 }
 0x162   :  { %7721 = vst [vmem:[#allocation87_spill] sm:$0xff] %v5543_v34  ;;  %v5547_v28 = vpop.permute.xlu0 %1203  ;;  %v279_v34 = vld [vmem:[#allocation2 + $0x128] sm:$0xff] }
 0x163   :  { %1445 = vrot.lane.b32.xlu1 %v275_v15, %s4711_s0  ;;  %7722 = vst [vmem:[#allocation88_spill] sm:$0xff] %v5547_v28 }
 0x164   :  { %1447 = vrot.lane.b32.xlu0 %v276_v46, %s4711_s0  ;;  %v282_v46 = vld [vmem:[#allocation2 + $0x150] sm:$0xff] }
 0x165   :  { %v5549_v32 = vpop.permute.xlu1 %1205 }
 0x166   :  { %7723 = vst [vmem:[#allocation89_spill] sm:$0xff] %v5549_v32  ;;  %v5553_v23 = vpop.permute.xlu0 %1207  ;;  %v281_v32 = vld [vmem:[#allocation2 + $0x140] sm:$0xff] }
 0x167   :  { %1449 = vrot.lane.b32.xlu1 %v277_v36, %s4711_s0  ;;  %7724 = vst [vmem:[#allocation90_spill] sm:$0xff] %v5553_v23 }
 0x168   :  { %1451 = vrot.lane.b32.xlu0 %v278_v54, %s4711_s0  ;;  %v284_v54 = vld [vmem:[#allocation2 + $0x168] sm:$0xff] }
 0x169   :  { %v5555_v30 = vpop.permute.xlu1 %1209 }
 0x16a   :  { %7725 = vst [vmem:[#allocation91_spill] sm:$0xff] %v5555_v30  ;;  %v5559_v15 = vpop.permute.xlu0 %1211  ;;  %v283_v30 = vld [vmem:[#allocation2 + $0x158] sm:$0xff] }
 0x16b   :  { %1453 = vrot.lane.b32.xlu1 %v279_v34, %s4711_s0  ;;  %7726 = vst [vmem:[#allocation92_spill] sm:$0xff] %v5559_v15 }
 0x16c   :  { %1455 = vrot.lane.b32.xlu0 %v280_v43, %s4711_s0 }
 0x16d   :  { %v5561_v28 = vpop.permute.xlu1 %1213 }
 0x16e   :  { %7727 = vst [vmem:[#allocation93_spill] sm:$0xff] %v5561_v28  ;;  %v5565_v36 = vpop.permute.xlu0 %1215  ;;  %v285_v28 = vld [vmem:[#allocation2 + $0x170] sm:$0xff] }
 0x16f   :  { %1457 = vrot.lane.b32.xlu1 %v281_v32, %s4711_s0  ;;  %v476_v32 = vld [vmem:[#allocation2 + $0x180] sm:$0xff] }
 0x170   :  { %1459 = vrot.lane.b32.xlu0 %v282_v46, %s4711_s0  ;;  %v288_v46 = vld [vmem:[#allocation2 + $0x1c8] sm:$0xff] }
 0x171   :  { %v5567_v23 = vpop.permute.xlu1 %1217 }
 0x172   :  { %v5571_v34 = vpop.permute.xlu0 %1219 }
 0x173   :  { %1461 = vrot.lane.b32.xlu1 %v283_v30, %s4711_s0 }
 0x174   :  { %1463 = vrot.lane.b32.xlu0 %v284_v54, %s4711_s0  ;;  %v290_v54 = vld [vmem:[#allocation2 + $0x1e0] sm:$0xff] }
 0x175   :  { %v5573_v15 = vpop.permute.xlu1 %1221 }
 0x176   :  { %7728 = vst [vmem:[#allocation94_spill] sm:$0xff] %v5573_v15  ;;  %v5577_v43 = vpop.permute.xlu0 %1223  ;;  %v625_v15 = vld [vmem:[#allocation2 + $0x2aa] sm:$0xff] }
 0x177   :  { %1465 = vrot.lane.b32.xlu1 %v285_v28, %s4711_s0  ;;  %7729 = vst [vmem:[#allocation95_spill] sm:$0xff] %v5577_v43  ;;  %v6073_v43 = vld [vmem:[#allocation2 + $0x24a] sm:$0xff] }
 0x178   :  { %1467 = vrot.lane.b32.xlu0 %v476_v32, %s4711_s0  ;;  %v292_v32 = vld [vmem:[#allocation2 + $0x1f8] sm:$0xff] }
 0x179   :  { %v5579_v7 = vpop.permute.xlu1 %1225 }
 0x17a   :  { %7730 = vst [vmem:[#allocation96_spill] sm:$0xff] %v5579_v7  ;;  %v5583_v30 = vpop.permute.xlu0 %1227 }
 0x17b   :  { %1469 = vrot.lane.b32.xlu1 %v477_v31, %s4711_s0  ;;  %7731 = vst [vmem:[#allocation97_spill] sm:$0xff] %v5583_v30  ;;  %v5953_v30 = vld [vmem:[#allocation2 + $0xb2] sm:$0xff] }
 0x17c   :  { %1471 = vrot.lane.b32.xlu0 %v288_v46, %s4711_s0  ;;  %v294_v46 = vld [vmem:[#allocation2 + $0x210] sm:$0xff] }
 0x17d   :  { %v5585_v26 = vpop.permute.xlu1 %1229 }
 0x17e   :  { %7732 = vst [vmem:[#allocation98_spill] sm:$0xff] %v5585_v26  ;;  %v5589_v28 = vpop.permute.xlu0 %1231  ;;  %v5893_v26 = vld [vmem:[#allocation2 + $0x3a] sm:$0xff] }
 0x17f   :  { %1473 = vrot.lane.b32.xlu1 %v289_v38, %s4711_s0  ;;  %7733 = vst [vmem:[#allocation99_spill] sm:$0xff] %v5589_v28  ;;  %v552_v28 = vld [vmem:[#allocation2 + $0x241] sm:$0xff] }
 0x180   :  { %1475 = vrot.lane.b32.xlu0 %v290_v54, %s4711_s0  ;;  %v296_v54 = vld [vmem:[#allocation2 + $0x228] sm:$0xff] }
 0x181   :  { %v5591_v1 = vpop.permute.xlu1 %1233 }
 0x182   :  { %7734 = vst [vmem:[#allocation100_spill] sm:$0xff] %v5591_v1  ;;  %v5595_v31 = vpop.permute.xlu0 %1235 }
 0x183   :  { %1477 = vrot.lane.b32.xlu1 %v291_v24, %s4711_s0  ;;  %7735 = vst [vmem:[#allocation101_spill] sm:$0xff] %v5595_v31 }
 0x184   :  { %1479 = vrot.lane.b32.xlu0 %v292_v32, %s4711_s0  ;;  %v298_v32 = vld [vmem:[#allocation2 + $0x240] sm:$0xff] }
 0x185   :  { %v5597_v39 = vpop.permute.xlu1 %1237 }
 0x186   :  { %7736 = vst [vmem:[#allocation102_spill] sm:$0xff] %v5597_v39  ;;  %v5601_v38 = vpop.permute.xlu0 %1239  ;;  %v515_v39 = vld [vmem:[#allocation2 + $0x51] sm:$0xff] }
 0x187   :  { %1481 = vrot.lane.b32.xlu1 %v293_v59, %s4711_s0  ;;  %7737 = vst [vmem:[#allocation103_spill] sm:$0xff] %v5601_v38  ;;  %v511_v38 = vld [vmem:[#allocation2 + $0x21] sm:$0xff] }
 0x188   :  { %1483 = vrot.lane.b32.xlu0 %v294_v46, %s4711_s0  ;;  %v300_v46 = vld [vmem:[#allocation2 + $0x258] sm:$0xff] }
 0x189   :  { %v5603_v22 = vpop.permute.xlu1 %1241 }
 0x18a   :  { %7738 = vst [vmem:[#allocation104_spill] sm:$0xff] %v5603_v22  ;;  %v5607_v24 = vpop.permute.xlu0 %1243  ;;  %v299_v22 = vld [vmem:[#allocation2 + $0x248] sm:$0xff] }
 0x18b   :  { %1485 = vrot.lane.b32.xlu1 %v295_v40, %s4711_s0  ;;  %7739 = vst [vmem:[#allocation105_spill] sm:$0xff] %v5607_v24 }
 0x18c   :  { %1487 = vrot.lane.b32.xlu0 %v296_v54, %s4711_s0  ;;  %v302_v54 = vld [vmem:[#allocation2 + $0x270] sm:$0xff] }
 0x18d   :  { %v5609_v53 = vpop.permute.xlu1 %1245 }
 0x18e   :  { %7740 = vst [vmem:[#allocation106_spill] sm:$0xff] %v5609_v53  ;;  %v5613_v59 = vpop.permute.xlu0 %1247  ;;  %v301_v53 = vld [vmem:[#allocation2 + $0x260] sm:$0xff] }
 0x18f   :  { %1489 = vrot.lane.b32.xlu1 %v297_v20, %s4711_s0  ;;  %7741 = vst [vmem:[#allocation107_spill] sm:$0xff] %v5613_v59 }
 0x190   :  { %1491 = vrot.lane.b32.xlu0 %v298_v32, %s4711_s0  ;;  %v304_v32 = vld [vmem:[#allocation2 + $0x288] sm:$0xff] }
 0x191   :  { %v5615_v47 = vpop.permute.xlu1 %1249 }
 0x192   :  { %7742 = vst [vmem:[#allocation108_spill] sm:$0xff] %v5615_v47  ;;  %v5619_v40 = vpop.permute.xlu0 %1251  ;;  %v303_v47 = vld [vmem:[#allocation2 + $0x278] sm:$0xff] }
 0x193   :  { %1493 = vrot.lane.b32.xlu1 %v299_v22, %s4711_s0  ;;  %7743 = vst [vmem:[#allocation109_spill] sm:$0xff] %v5619_v40 }
 0x194   :  { %1495 = vrot.lane.b32.xlu0 %v300_v46, %s4711_s0  ;;  %v306_v46 = vld [vmem:[#allocation2 + $0x2a0] sm:$0xff] }
 0x195   :  { %v5621_v24 = vpop.permute.xlu1 %1253 }
 0x196   :  { %7744 = vst [vmem:[#allocation110_spill] sm:$0xff] %v5621_v24  ;;  %v5625_v20 = vpop.permute.xlu0 %1255  ;;  %v305_v24 = vld [vmem:[#allocation2 + $0x290] sm:$0xff] }
 0x197   :  { %1497 = vrot.lane.b32.xlu1 %v301_v53, %s4711_s0  ;;  %7745 = vst [vmem:[#allocation111_spill] sm:$0xff] %v5625_v20 }
 0x198   :  { %1499 = vrot.lane.b32.xlu0 %v302_v54, %s4711_s0  ;;  %v308_v54 = vld [vmem:[#allocation2 + $0x2b8] sm:$0xff] }
 0x199   :  { %v5627_v59 = vpop.permute.xlu1 %1257 }
 0x19a   :  { %7746 = vst [vmem:[#allocation112_spill] sm:$0xff] %v5627_v59  ;;  %v5631_v22 = vpop.permute.xlu0 %1259  ;;  %v307_v59 = vld [vmem:[#allocation2 + $0x2a8] sm:$0xff] }
 0x19b   :  { %1501 = vrot.lane.b32.xlu1 %v303_v47, %s4711_s0  ;;  %7747 = vst [vmem:[#allocation113_spill] sm:$0xff] %v5631_v22 }
 0x19c   :  { %1503 = vrot.lane.b32.xlu0 %v304_v32, %s4711_s0  ;;  %v310_v32 = vld [vmem:[#allocation2 + $0x2d0] sm:$0xff] }
 0x19d   :  { %v5633_v40 = vpop.permute.xlu1 %1261 }
 0x19e   :  { %7748 = vst [vmem:[#allocation114_spill] sm:$0xff] %v5633_v40  ;;  %v5637_v53 = vpop.permute.xlu0 %1263  ;;  %v309_v40 = vld [vmem:[#allocation2 + $0x2c0] sm:$0xff] }
 0x19f   :  { %1505 = vrot.lane.b32.xlu1 %v305_v24, %s4711_s0  ;;  %7749 = vst [vmem:[#allocation115_spill] sm:$0xff] %v5637_v53 }
 0x1a0   :  { %1507 = vrot.lane.b32.xlu0 %v306_v46, %s4711_s0  ;;  %v312_v46 = vld [vmem:[#allocation2 + $0x2e8] sm:$0xff] }
 0x1a1   :  { %v5639_v20 = vpop.permute.xlu1 %1265 }
 0x1a2   :  { %7750 = vst [vmem:[#allocation116_spill] sm:$0xff] %v5639_v20  ;;  %v5643_v47 = vpop.permute.xlu0 %1267  ;;  %v311_v20 = vld [vmem:[#allocation2 + $0x2d8] sm:$0xff] }
 0x1a3   :  { %1509 = vrot.lane.b32.xlu1 %v307_v59, %s4711_s0  ;;  %7751 = vst [vmem:[#allocation117_spill] sm:$0xff] %v5643_v47 }
 0x1a4   :  { %1511 = vrot.lane.b32.xlu0 %v308_v54, %s4711_s0  ;;  %v314_v54 = vld [vmem:[#allocation2 + $0x300] sm:$0xff] }
 0x1a5   :  { %v5645_v22 = vpop.permute.xlu1 %1269 }
 0x1a6   :  { %7752 = vst [vmem:[#allocation118_spill] sm:$0xff] %v5645_v22  ;;  %v5649_v24 = vpop.permute.xlu0 %1271  ;;  %v313_v22 = vld [vmem:[#allocation2 + $0x2f0] sm:$0xff] }
 0x1a7   :  { %1513 = vrot.lane.b32.xlu1 %v309_v40, %s4711_s0  ;;  %7753 = vst [vmem:[#allocation119_spill] sm:$0xff] %v5649_v24 }
 0x1a8   :  { %1515 = vrot.lane.b32.xlu0 %v310_v32, %s4711_s0  ;;  %v316_v32 = vld [vmem:[#allocation2 + $0x318] sm:$0xff] }
 0x1a9   :  { %v5651_v53 = vpop.permute.xlu1 %1273 }
 0x1aa   :  { %7754 = vst [vmem:[#allocation120_spill] sm:$0xff] %v5651_v53  ;;  %v5655_v59 = vpop.permute.xlu0 %1275  ;;  %v315_v53 = vld [vmem:[#allocation2 + $0x308] sm:$0xff] }
 0x1ab   :  { %1517 = vrot.lane.b32.xlu1 %v311_v20, %s4711_s0  ;;  %7755 = vst [vmem:[#allocation121_spill] sm:$0xff] %v5655_v59 }
 0x1ac   :  { %1519 = vrot.lane.b32.xlu0 %v312_v46, %s4711_s0 }
 0x1ad   :  { %v5657_v47 = vpop.permute.xlu1 %1277 }
 0x1ae   :  { %7756 = vst [vmem:[#allocation122_spill] sm:$0xff] %v5657_v47  ;;  %v5661_v40 = vpop.permute.xlu0 %1407  ;;  %v317_v47 = vld [vmem:[#allocation2 + $0x320] sm:$0xff] }
 0x1af   :  { %1521 = vrot.lane.b32.xlu1 %v313_v22, %s4711_s0  ;;  %v508_v22 = vld [vmem:[#allocation2 + $0x330] sm:$0xff] }
 0x1b0   :  { %1523 = vrot.lane.b32.xlu0 %v314_v54, %s4711_s0 }
 0x1b1   :  { %v5663_v24 = vpop.permute.xlu1 %1409 }
 0x1b2   :  { %v5667_v20 = vpop.permute.xlu0 %1411 }
 0x1b3   :  { %1525 = vrot.lane.b32.xlu1 %v315_v53, %s4711_s0  ;;  %v510_v53 = vld [vmem:[#allocation2 + $0x19] sm:$0xff] }
 0x1b4   :  { %1527 = vrot.lane.b32.xlu0 %v316_v32, %s4711_s0 }
 0x1b5   :  { %v5669_v59 = vpop.permute.xlu1 %1413 }
 0x1b6   :  { %7757 = vst [vmem:[#allocation123_spill] sm:$0xff] %v5669_v59  ;;  %v5673_v46 = vpop.permute.xlu0 %1415 }
 0x1b7   :  { %1529 = vrot.lane.b32.xlu1 %v317_v47, %s4711_s0  ;;  %7758 = vst [vmem:[#allocation124_spill] sm:$0xff] %v5673_v46  ;;  %v512_v47 = vld [vmem:[#allocation2 + $0x31] sm:$0xff] }
 0x1b8   :  { %1531 = vrot.lane.b32.xlu0 %v508_v22, %s4711_s0 }
 0x1b9   :  { %v5675_v18 = vpop.permute.xlu1 %1417 }
 0x1ba   :  { %7759 = vst [vmem:[#allocation125_spill] sm:$0xff] %v5675_v18  ;;  %v5679_v54 = vpop.permute.xlu0 %1419  ;;  %v592_v18 = vld [vmem:[#allocation2 + $0xf2] sm:$0xff] }
 0x1bb   :  { %1533 = vrot.lane.b32.xlu1 %v509_v49, %s4711_s0  ;;  %7760 = vst [vmem:[#allocation126_spill] sm:$0xff] %v5679_v54  ;;  %v514_v49 = vld [vmem:[#allocation2 + $0x49] sm:$0xff] }
 0x1bc   :  { %1663 = vrot.lane.b32.xlu0 %v510_v53, %s4712_s9 }
 0x1bd   :  { %v5681_v3 = vpop.permute.xlu1 %1421 }
 0x1be   :  { %7761 = vst [vmem:[#allocation127_spill] sm:$0xff] %v5681_v3  ;;  %v5685_v32 = vpop.permute.xlu0 %1423 }
 0x1bf   :  { %1665 = vrot.lane.b32.xlu1 %v511_v38, %s4712_s9  ;;  %7762 = vst [vmem:[#allocation128_spill] sm:$0xff] %v5685_v32  ;;  %v516_v38 = vld [vmem:[#allocation2 + $0x61] sm:$0xff] }
 0x1c0   :  { %1667 = vrot.lane.b32.xlu0 %v512_v47, %s4712_s9 }
 0x1c1   :  { %v5687_v16 = vpop.permute.xlu1 %1425 }
 0x1c2   :  { %7763 = vst [vmem:[#allocation129_spill] sm:$0xff] %v5687_v16  ;;  %v5691_v22 = vpop.permute.xlu0 %1427  ;;  %v5785_v16 = vld [vmem:[#allocation2 + $0x1e9] sm:$0xff] }
 0x1c3   :  { %1669 = vrot.lane.b32.xlu1 %v513_v45, %s4712_s9  ;;  %7764 = vst [vmem:[#allocation130_spill] sm:$0xff] %v5691_v22  ;;  %v518_v45 = vld [vmem:[#allocation2 + $0x79] sm:$0xff]  ;;  %v519_v22 = vld [vmem:[#allocation2 + $0x81] sm:$0xff] }
 0x1c4   :  { %1671 = vrot.lane.b32.xlu0 %v514_v49, %s4712_s9 }
 0x1c5   :  { %v5693_v55 = vpop.permute.xlu1 %1429 }
 0x1c6   :  { %7765 = vst [vmem:[#allocation131_spill] sm:$0xff] %v5693_v55  ;;  %v5697_v53 = vpop.permute.xlu0 %1431 }
 0x1c7   :  { %1673 = vrot.lane.b32.xlu1 %v515_v39, %s4712_s9  ;;  %7766 = vst [vmem:[#allocation132_spill] sm:$0xff] %v5697_v53  ;;  %v520_v39 = vld [vmem:[#allocation2 + $0x91] sm:$0xff]  ;;  %v521_v53 = vld [vmem:[#allocation2 + $0x99] sm:$0xff] }
 0x1c8   :  { %1675 = vrot.lane.b32.xlu0 %v516_v38, %s4712_s9 }
 0x1c9   :  { %v5699_v14 = vpop.permute.xlu1 %1433 }
 0x1ca   :  { %7767 = vst [vmem:[#allocation133_spill] sm:$0xff] %v5699_v14  ;;  %v5703_v47 = vpop.permute.xlu0 %1435 }
 0x1cb   :  { %1677 = vrot.lane.b32.xlu1 %v517_v41, %s4712_s9  ;;  %7768 = vst [vmem:[#allocation134_spill] sm:$0xff] %v5703_v47  ;;  %v522_v41 = vld [vmem:[#allocation2 + $0xa9] sm:$0xff]  ;;  %v523_v47 = vld [vmem:[#allocation2 + $0xb1] sm:$0xff] }
 0x1cc   :  { %1679 = vrot.lane.b32.xlu0 %v518_v45, %s4712_s9 }
 0x1cd   :  { %v5705_v31 = vpop.permute.xlu1 %1437 }
 0x1ce   :  { %7769 = vst [vmem:[#allocation135_spill] sm:$0xff] %v5705_v31  ;;  %v5709_v49 = vpop.permute.xlu0 %1439 }
 0x1cf   :  { %1681 = vrot.lane.b32.xlu1 %v519_v22, %s4712_s9  ;;  %7770 = vst [vmem:[#allocation136_spill] sm:$0xff] %v5709_v49  ;;  %v524_v22 = vld [vmem:[#allocation2 + $0xc1] sm:$0xff]  ;;  %v525_v49 = vld [vmem:[#allocation2 + $0xc9] sm:$0xff] }
 0x1d0   :  { %1683 = vrot.lane.b32.xlu0 %v520_v39, %s4712_s9 }
 0x1d1   :  { %v5711_v55 = vpop.permute.xlu1 %1441 }
 0x1d2   :  { %7771 = vst [vmem:[#allocation137_spill] sm:$0xff] %v5711_v55  ;;  %v5715_v38 = vpop.permute.xlu0 %1443 }
 0x1d3   :  { %1685 = vrot.lane.b32.xlu1 %v521_v53, %s4712_s9  ;;  %7772 = vst [vmem:[#allocation138_spill] sm:$0xff] %v5715_v38  ;;  %v526_v53 = vld [vmem:[#allocation2 + $0xd9] sm:$0xff]  ;;  %v527_v38 = vld [vmem:[#allocation2 + $0xe1] sm:$0xff] }
 0x1d4   :  { %1687 = vrot.lane.b32.xlu0 %v522_v41, %s4712_s9 }
 0x1d5   :  { %v5717_v14 = vpop.permute.xlu1 %1445 }
 0x1d6   :  { %7773 = vst [vmem:[#allocation139_spill] sm:$0xff] %v5717_v14  ;;  %v5721_v45 = vpop.permute.xlu0 %1447 }
 0x1d7   :  { %1689 = vrot.lane.b32.xlu1 %v523_v47, %s4712_s9  ;;  %7774 = vst [vmem:[#allocation140_spill] sm:$0xff] %v5721_v45  ;;  %v528_v47 = vld [vmem:[#allocation2 + $0xf1] sm:$0xff]  ;;  %v529_v45 = vld [vmem:[#allocation2 + $0xf9] sm:$0xff] }
 0x1d8   :  { %1691 = vrot.lane.b32.xlu0 %v524_v22, %s4712_s9 }
 0x1d9   :  { %v5723_v31 = vpop.permute.xlu1 %1449 }
 0x1da   :  { %7775 = vst [vmem:[#allocation141_spill] sm:$0xff] %v5723_v31  ;;  %v5727_v39 = vpop.permute.xlu0 %1451 }
 0x1db   :  { %1693 = vrot.lane.b32.xlu1 %v525_v49, %s4712_s9  ;;  %7776 = vst [vmem:[#allocation142_spill] sm:$0xff] %v5727_v39  ;;  %v530_v49 = vld [vmem:[#allocation2 + $0x109] sm:$0xff]  ;;  %v531_v39 = vld [vmem:[#allocation2 + $0x111] sm:$0xff] }
 0x1dc   :  { %1695 = vrot.lane.b32.xlu0 %v526_v53, %s4712_s9 }
 0x1dd   :  { %v5729_v55 = vpop.permute.xlu1 %1453 }
 0x1de   :  { %7777 = vst [vmem:[#allocation143_spill] sm:$0xff] %v5729_v55  ;;  %v5733_v41 = vpop.permute.xlu0 %1455 }
 0x1df   :  { %1697 = vrot.lane.b32.xlu1 %v527_v38, %s4712_s9  ;;  %7778 = vst [vmem:[#allocation144_spill] sm:$0xff] %v5733_v41  ;;  %v532_v38 = vld [vmem:[#allocation2 + $0x121] sm:$0xff]  ;;  %v533_v41 = vld [vmem:[#allocation2 + $0x129] sm:$0xff] }
 0x1e0   :  { %1699 = vrot.lane.b32.xlu0 %v528_v47, %s4712_s9 }
 0x1e1   :  { %v5735_v14 = vpop.permute.xlu1 %1457 }
 0x1e2   :  { %7779 = vst [vmem:[#allocation145_spill] sm:$0xff] %v5735_v14  ;;  %v5739_v22 = vpop.permute.xlu0 %1459 }
 0x1e3   :  { %1701 = vrot.lane.b32.xlu1 %v529_v45, %s4712_s9  ;;  %7780 = vst [vmem:[#allocation146_spill] sm:$0xff] %v5739_v22  ;;  %v534_v45 = vld [vmem:[#allocation2 + $0x139] sm:$0xff]  ;;  %v535_v22 = vld [vmem:[#allocation2 + $0x141] sm:$0xff] }
 0x1e4   :  { %1703 = vrot.lane.b32.xlu0 %v530_v49, %s4712_s9 }
 0x1e5   :  { %v5741_v31 = vpop.permute.xlu1 %1461 }
 0x1e6   :  { %7781 = vst [vmem:[#allocation147_spill] sm:$0xff] %v5741_v31  ;;  %v5745_v53 = vpop.permute.xlu0 %1463 }
 0x1e7   :  { %1705 = vrot.lane.b32.xlu1 %v531_v39, %s4712_s9  ;;  %7782 = vst [vmem:[#allocation148_spill] sm:$0xff] %v5745_v53  ;;  %v536_v39 = vld [vmem:[#allocation2 + $0x151] sm:$0xff]  ;;  %v537_v53 = vld [vmem:[#allocation2 + $0x159] sm:$0xff] }
 0x1e8   :  { %1707 = vrot.lane.b32.xlu0 %v532_v38, %s4712_s9 }
 0x1e9   :  { %v5747_v55 = vpop.permute.xlu1 %1465 }
 0x1ea   :  { %7783 = vst [vmem:[#allocation149_spill] sm:$0xff] %v5747_v55  ;;  %v5751_v47 = vpop.permute.xlu0 %1467 }
 0x1eb   :  { %1709 = vrot.lane.b32.xlu1 %v533_v41, %s4712_s9  ;;  %7784 = vst [vmem:[#allocation150_spill] sm:$0xff] %v5751_v47  ;;  %v538_v41 = vld [vmem:[#allocation2 + $0x169] sm:$0xff]  ;;  %v539_v47 = vld [vmem:[#allocation2 + $0x171] sm:$0xff] }
 0x1ec   :  { %1711 = vrot.lane.b32.xlu0 %v534_v45, %s4712_s9 }
 0x1ed   :  { %v5753_v14 = vpop.permute.xlu1 %1469 }
 0x1ee   :  { %7785 = vst [vmem:[#allocation151_spill] sm:$0xff] %v5753_v14  ;;  %v5757_v49 = vpop.permute.xlu0 %1471  ;;  %v541_v14 = vld [vmem:[#allocation2 + $0x189] sm:$0xff] }
 0x1ef   :  { %1713 = vrot.lane.b32.xlu1 %v535_v22, %s4712_s9  ;;  %v540_v22 = vld [vmem:[#allocation2 + $0x181] sm:$0xff] }
 0x1f0   :  { %1715 = vrot.lane.b32.xlu0 %v536_v39, %s4712_s9 }
 0x1f1   :  { %v5759_v31 = vpop.permute.xlu1 %1473 }
 0x1f2   :  { %v5763_v38 = vpop.permute.xlu0 %1475 }
 0x1f3   :  { %1717 = vrot.lane.b32.xlu1 %v537_v53, %s4712_s9  ;;  %7786 = vst [vmem:[#allocation152_spill] sm:$0xff] %v5763_v38  ;;  %v542_v53 = vld [vmem:[#allocation2 + $0x1c9] sm:$0xff] }
 0x1f4   :  { %1719 = vrot.lane.b32.xlu0 %v538_v41, %s4712_s9 }
 0x1f5   :  { %v5765_v55 = vpop.permute.xlu1 %1477 }
 0x1f6   :  { %7787 = vst [vmem:[#allocation153_spill] sm:$0xff] %v5765_v55  ;;  %v5769_v45 = vpop.permute.xlu0 %1479  ;;  %v6109_v55 = vld [vmem:[#allocation2 + $0x292] sm:$0xff] }
 0x1f7   :  { %1721 = vrot.lane.b32.xlu1 %v539_v47, %s4712_s9  ;;  %7788 = vst [vmem:[#allocation154_spill] sm:$0xff] %v5769_v45  ;;  %v5781_v47 = vld [vmem:[#allocation2 + $0x1e1] sm:$0xff]  ;;  %v6061_v45 = vld [vmem:[#allocation2 + $0x232] sm:$0xff]  ;;  %7868 = vst [vmem:[#allocation234_spill] sm:$0xff] %v6109_v55 }
 0x1f8   :  { %1723 = vrot.lane.b32.xlu0 %v540_v22, %s4712_s9 }
 0x1f9   :  { %v5771_v48 = vpop.permute.xlu1 %1481 }
 0x1fa   :  { %7789 = vst [vmem:[#allocation155_spill] sm:$0xff] %v5771_v48  ;;  %v5775_v39 = vpop.permute.xlu0 %1483 }
 0x1fb   :  { %1725 = vrot.lane.b32.xlu1 %v541_v14, %s4712_s9  ;;  %7790 = vst [vmem:[#allocation156_spill] sm:$0xff] %v5775_v39  ;;  %v5793_v14 = vld [vmem:[#allocation2 + $0x1f9] sm:$0xff] }
 0x1fc   :  { %1727 = vrot.lane.b32.xlu0 %v542_v53, %s4712_s9  ;;  %v5797_v53 = vld [vmem:[#allocation2 + $0x201] sm:$0xff] }
 0x1fd   :  { %v5777_v12 = vpop.permute.xlu1 %1485  ;;  %v5941_v39 = vld [vmem:[#allocation2 + $0x9a] sm:$0xff] }
 0x1fe   :  { %7791 = vst [vmem:[#allocation157_spill] sm:$0xff] %v5777_v12  ;;  %v5783_v41 = vpop.permute.xlu0 %1487  ;;  %v575_v12 = vld [vmem:[#allocation2 + $0x22] sm:$0xff] }
 0x1ff   :  { %1729 = vrot.lane.b32.xlu1 %v543_v37, %s4712_s9  ;;  %7792 = vst [vmem:[#allocation158_spill] sm:$0xff] %v5783_v41 }
 0x200   :  { %1731 = vrot.lane.b32.xlu0 %v5781_v47, %s4712_s9 }
 0x201   :  { %v5787_v1 = vpop.permute.xlu1 %1489 }
 0x202   :  { %7793 = vst [vmem:[#allocation159_spill] sm:$0xff] %v5787_v1  ;;  %v5795_v22 = vpop.permute.xlu0 %1491  ;;  %v548_v1 = vld [vmem:[#allocation2 + $0x211] sm:$0xff] }
 0x203   :  { %1733 = vrot.lane.b32.xlu1 %v5785_v16, %s4712_s9  ;;  %7794 = vst [vmem:[#allocation160_spill] sm:$0xff] %v5795_v22  ;;  %v550_v22 = vld [vmem:[#allocation2 + $0x229] sm:$0xff] }
 0x204   :  { %1735 = vrot.lane.b32.xlu0 %v5793_v14, %s4712_s9 }
 0x205   :  { %v5799_v37 = vpop.permute.xlu1 %1493 }
 0x206   :  { %7795 = vst [vmem:[#allocation161_spill] sm:$0xff] %v5799_v37  ;;  %v5805_v42 = vpop.permute.xlu0 %1495  ;;  %v551_v37 = vld [vmem:[#allocation2 + $0x231] sm:$0xff] }
 0x207   :  { %1737 = vrot.lane.b32.xlu1 %v5797_v53, %s4712_s9  ;;  %7796 = vst [vmem:[#allocation162_spill] sm:$0xff] %v5805_v42  ;;  %v553_v42 = vld [vmem:[#allocation2 + $0x249] sm:$0xff] }
 0x208   :  { %1739 = vrot.lane.b32.xlu0 %v548_v1, %s4712_s9 }
 0x209   :  { %v5807_v10 = vpop.permute.xlu1 %1497 }
 0x20a   :  { %7797 = vst [vmem:[#allocation163_spill] sm:$0xff] %v5807_v10  ;;  %v5811_v41 = vpop.permute.xlu0 %1499 }
 0x20b   :  { %1741 = vrot.lane.b32.xlu1 %v549_v33, %s4712_s9  ;;  %7798 = vst [vmem:[#allocation164_spill] sm:$0xff] %v5811_v41  ;;  %v554_v33 = vld [vmem:[#allocation2 + $0x259] sm:$0xff]  ;;  %v555_v41 = vld [vmem:[#allocation2 + $0x261] sm:$0xff] }
 0x20c   :  { %1743 = vrot.lane.b32.xlu0 %v550_v22, %s4712_s9  ;;  %v556_v22 = vld [vmem:[#allocation2 + $0x271] sm:$0xff] }
 0x20d   :  { %v5813_v32 = vpop.permute.xlu1 %1501 }
 0x20e   :  { %7799 = vst [vmem:[#allocation165_spill] sm:$0xff] %v5813_v32  ;;  %v5817_v35 = vpop.permute.xlu0 %1503 }
 0x20f   :  { %1745 = vrot.lane.b32.xlu1 %v551_v37, %s4712_s9  ;;  %7800 = vst [vmem:[#allocation166_spill] sm:$0xff] %v5817_v35  ;;  %v557_v35 = vld [vmem:[#allocation2 + $0x279] sm:$0xff] }
 0x210   :  { %1747 = vrot.lane.b32.xlu0 %v552_v28, %s4712_s9 }
 0x211   :  { %v5819_v29 = vpop.permute.xlu1 %1505 }
 0x212   :  { %7801 = vst [vmem:[#allocation167_spill] sm:$0xff] %v5819_v29  ;;  %v5823_v1 = vpop.permute.xlu0 %1507 }
 0x213   :  { %1749 = vrot.lane.b32.xlu1 %v553_v42, %s4712_s9  ;;  %7802 = vst [vmem:[#allocation168_spill] sm:$0xff] %v5823_v1  ;;  %v558_v42 = vld [vmem:[#allocation2 + $0x289] sm:$0xff]  ;;  %v559_v1 = vld [vmem:[#allocation2 + $0x291] sm:$0xff] }
 0x214   :  { %1751 = vrot.lane.b32.xlu0 %v554_v33, %s4712_s9 }
 0x215   :  { %v5825_v10 = vpop.permute.xlu1 %1509 }
 0x216   :  { %7803 = vst [vmem:[#allocation169_spill] sm:$0xff] %v5825_v10  ;;  %v5829_v37 = vpop.permute.xlu0 %1511 }
 0x217   :  { %1753 = vrot.lane.b32.xlu1 %v555_v41, %s4712_s9  ;;  %7804 = vst [vmem:[#allocation170_spill] sm:$0xff] %v5829_v37  ;;  %v560_v41 = vld [vmem:[#allocation2 + $0x2a1] sm:$0xff]  ;;  %v561_v37 = vld [vmem:[#allocation2 + $0x2a9] sm:$0xff] }
 0x218   :  { %1755 = vrot.lane.b32.xlu0 %v556_v22, %s4712_s9 }
 0x219   :  { %v5831_v32 = vpop.permute.xlu1 %1513 }
 0x21a   :  { %7805 = vst [vmem:[#allocation171_spill] sm:$0xff] %v5831_v32  ;;  %v5835_v28 = vpop.permute.xlu0 %1515 }
 0x21b   :  { %1757 = vrot.lane.b32.xlu1 %v557_v35, %s4712_s9  ;;  %7806 = vst [vmem:[#allocation172_spill] sm:$0xff] %v5835_v28  ;;  %v562_v35 = vld [vmem:[#allocation2 + $0x2b9] sm:$0xff]  ;;  %v563_v28 = vld [vmem:[#allocation2 + $0x2c1] sm:$0xff] }
 0x21c   :  { %1759 = vrot.lane.b32.xlu0 %v558_v42, %s4712_s9 }
 0x21d   :  { %v5837_v29 = vpop.permute.xlu1 %1517 }
 0x21e   :  { %7807 = vst [vmem:[#allocation173_spill] sm:$0xff] %v5837_v29  ;;  %v5841_v33 = vpop.permute.xlu0 %1519 }
 0x21f   :  { %1761 = vrot.lane.b32.xlu1 %v559_v1, %s4712_s9  ;;  %7808 = vst [vmem:[#allocation174_spill] sm:$0xff] %v5841_v33  ;;  %v564_v1 = vld [vmem:[#allocation2 + $0x2d1] sm:$0xff]  ;;  %v565_v33 = vld [vmem:[#allocation2 + $0x2d9] sm:$0xff] }
 0x220   :  { %1763 = vrot.lane.b32.xlu0 %v560_v41, %s4712_s9 }
 0x221   :  { %v5843_v10 = vpop.permute.xlu1 %1521 }
 0x222   :  { %7809 = vst [vmem:[#allocation175_spill] sm:$0xff] %v5843_v10  ;;  %v5847_v22 = vpop.permute.xlu0 %1523 }
 0x223   :  { %1765 = vrot.lane.b32.xlu1 %v561_v37, %s4712_s9  ;;  %7810 = vst [vmem:[#allocation176_spill] sm:$0xff] %v5847_v22  ;;  %v566_v37 = vld [vmem:[#allocation2 + $0x2e9] sm:$0xff]  ;;  %v567_v22 = vld [vmem:[#allocation2 + $0x2f1] sm:$0xff] }
 0x224   :  { %1767 = vrot.lane.b32.xlu0 %v562_v35, %s4712_s9 }
 0x225   :  { %v5849_v32 = vpop.permute.xlu1 %1525 }
 0x226   :  { %7811 = vst [vmem:[#allocation177_spill] sm:$0xff] %v5849_v32  ;;  %v5853_v42 = vpop.permute.xlu0 %1527 }
 0x227   :  { %1769 = vrot.lane.b32.xlu1 %v563_v28, %s4712_s9  ;;  %7812 = vst [vmem:[#allocation178_spill] sm:$0xff] %v5853_v42  ;;  %v568_v28 = vld [vmem:[#allocation2 + $0x301] sm:$0xff]  ;;  %v569_v42 = vld [vmem:[#allocation2 + $0x309] sm:$0xff] }
 0x228   :  { %1771 = vrot.lane.b32.xlu0 %v564_v1, %s4712_s9 }
 0x229   :  { %v5855_v29 = vpop.permute.xlu1 %1529 }
 0x22a   :  { %7813 = vst [vmem:[#allocation179_spill] sm:$0xff] %v5855_v29  ;;  %v5859_v41 = vpop.permute.xlu0 %1531 }
 0x22b   :  { %1773 = vrot.lane.b32.xlu1 %v565_v33, %s4712_s9  ;;  %7814 = vst [vmem:[#allocation180_spill] sm:$0xff] %v5859_v41  ;;  %v570_v33 = vld [vmem:[#allocation2 + $0x319] sm:$0xff]  ;;  %v571_v41 = vld [vmem:[#allocation2 + $0x321] sm:$0xff] }
 0x22c   :  { %1775 = vrot.lane.b32.xlu0 %v566_v37, %s4712_s9 }
 0x22d   :  { %v5861_v10 = vpop.permute.xlu1 %1533 }
 0x22e   :  { %7815 = vst [vmem:[#allocation181_spill] sm:$0xff] %v5861_v10  ;;  %v5865_v35 = vpop.permute.xlu0 %1663  ;;  %v573_v10 = vld [vmem:[#allocation2 + $0x339] sm:$0xff] }
 0x22f   :  { %1777 = vrot.lane.b32.xlu1 %v567_v22, %s4712_s9  ;;  %v572_v22 = vld [vmem:[#allocation2 + $0x331] sm:$0xff] }
 0x230   :  { %1779 = vrot.lane.b32.xlu0 %v568_v28, %s4712_s9 }
 0x231   :  { %v5867_v32 = vpop.permute.xlu1 %1665 }
 0x232   :  { %v5871_v1 = vpop.permute.xlu0 %1667 }
 0x233   :  { %1781 = vrot.lane.b32.xlu1 %v569_v42, %s4712_s9  ;;  %7816 = vst [vmem:[#allocation182_spill] sm:$0xff] %v5871_v1  ;;  %v574_v42 = vld [vmem:[#allocation2 + $0x1a] sm:$0xff] }
 0x234   :  { %1783 = vrot.lane.b32.xlu0 %v570_v33, %s4712_s9 }
 0x235   :  { %v5873_v29 = vpop.permute.xlu1 %1669 }
 0x236   :  { %7817 = vst [vmem:[#allocation183_spill] sm:$0xff] %v5873_v29  ;;  %v5877_v37 = vpop.permute.xlu0 %1671 }
 0x237   :  { %1785 = vrot.lane.b32.xlu1 %v571_v41, %s4712_s9  ;;  %7818 = vst [vmem:[#allocation184_spill] sm:$0xff] %v5877_v37  ;;  %v5889_v41 = vld [vmem:[#allocation2 + $0x32] sm:$0xff] }
 0x238   :  { %1787 = vrot.lane.b32.xlu0 %v572_v22, %s4712_s9 }
 0x239   :  { %v5879_v8 = vpop.permute.xlu1 %1673 }
 0x23a   :  { %7819 = vst [vmem:[#allocation185_spill] sm:$0xff] %v5879_v8  ;;  %v5883_v28 = vpop.permute.xlu0 %1675 }
 0x23b   :  { %1789 = vrot.lane.b32.xlu1 %v573_v10, %s4712_s9  ;;  %7820 = vst [vmem:[#allocation186_spill] sm:$0xff] %v5883_v28  ;;  %v5901_v10 = vld [vmem:[#allocation2 + $0x4a] sm:$0xff] }
 0x23c   :  { %1919 = vrot.lane.b32.xlu0 %v574_v42, %s4713_s10  ;;  %v5905_v42 = vld [vmem:[#allocation2 + $0x52] sm:$0xff] }
 0x23d   :  { %v5885_v3 = vpop.permute.xlu1 %1677 }
 0x23e   :  { %7821 = vst [vmem:[#allocation187_spill] sm:$0xff] %v5885_v3  ;;  %v5891_v33 = vpop.permute.xlu0 %1679 }
 0x23f   :  { %1921 = vrot.lane.b32.xlu1 %v575_v12, %s4713_s10  ;;  %7822 = vst [vmem:[#allocation188_spill] sm:$0xff] %v5891_v33 }
 0x240   :  { %1923 = vrot.lane.b32.xlu0 %v5889_v41, %s4713_s10 }
 0x241   :  { %v5895_v22 = vpop.permute.xlu1 %1681 }
 0x242   :  { %7823 = vst [vmem:[#allocation189_spill] sm:$0xff] %v5895_v22  ;;  %v5903_v3 = vpop.permute.xlu0 %1683  ;;  %v5913_v22 = vld [vmem:[#allocation2 + $0x62] sm:$0xff] }
 0x243   :  { %1925 = vrot.lane.b32.xlu1 %v5893_v26, %s4713_s10  ;;  %7824 = vst [vmem:[#allocation190_spill] sm:$0xff] %v5903_v3 }
 0x244   :  { %1927 = vrot.lane.b32.xlu0 %v5901_v10, %s4713_s10 }
 0x245   :  { %v5907_v12 = vpop.permute.xlu1 %1685 }
 0x246   :  { %7825 = vst [vmem:[#allocation191_spill] sm:$0xff] %v5907_v12  ;;  %v5915_v33 = vpop.permute.xlu0 %1687  ;;  %v5925_v12 = vld [vmem:[#allocation2 + $0x7a] sm:$0xff] }
 0x247   :  { %1929 = vrot.lane.b32.xlu1 %v5905_v42, %s4713_s10  ;;  %7826 = vst [vmem:[#allocation192_spill] sm:$0xff] %v5915_v33 }
 0x248   :  { %1931 = vrot.lane.b32.xlu0 %v5913_v22, %s4713_s10 }
 0x249   :  { %v5919_v25 = vpop.permute.xlu1 %1689 }
 0x24a   :  { %7827 = vst [vmem:[#allocation193_spill] sm:$0xff] %v5919_v25  ;;  %v5927_v3 = vpop.permute.xlu0 %1691  ;;  %v5937_v25 = vld [vmem:[#allocation2 + $0x92] sm:$0xff] }
 0x24b   :  { %1933 = vrot.lane.b32.xlu1 %v5917_v19, %s4713_s10  ;;  %7828 = vst [vmem:[#allocation194_spill] sm:$0xff] %v5927_v3 }
 0x24c   :  { %1935 = vrot.lane.b32.xlu0 %v5925_v12, %s4713_s10 }
 0x24d   :  { %v5931_v28 = vpop.permute.xlu1 %1693 }
 0x24e   :  { %7829 = vst [vmem:[#allocation195_spill] sm:$0xff] %v5931_v28  ;;  %v5939_v33 = vpop.permute.xlu0 %1695  ;;  %v5949_v28 = vld [vmem:[#allocation2 + $0xaa] sm:$0xff] }
 0x24f   :  { %1937 = vrot.lane.b32.xlu1 %v5929_v6, %s4713_s10  ;;  %7830 = vst [vmem:[#allocation196_spill] sm:$0xff] %v5939_v33 }
 0x250   :  { %1939 = vrot.lane.b32.xlu0 %v5937_v25, %s4713_s10 }
 0x251   :  { %v5943_v54 = vpop.permute.xlu1 %1697 }
 0x252   :  { %7831 = vst [vmem:[#allocation197_spill] sm:$0xff] %v5943_v54  ;;  %v5951_v3 = vpop.permute.xlu0 %1699  ;;  %v588_v54 = vld [vmem:[#allocation2 + $0xc2] sm:$0xff] }
 0x253   :  { %1941 = vrot.lane.b32.xlu1 %v5941_v39, %s4713_s10  ;;  %7832 = vst [vmem:[#allocation198_spill] sm:$0xff] %v5951_v3  ;;  %v590_v3 = vld [vmem:[#allocation2 + $0xda] sm:$0xff] }
 0x254   :  { %1943 = vrot.lane.b32.xlu0 %v5949_v28, %s4713_s10 }
 0x255   :  { %v5955_v51 = vpop.permute.xlu1 %1701 }
 0x256   :  { %7833 = vst [vmem:[#allocation199_spill] sm:$0xff] %v5955_v51  ;;  %v5961_v33 = vpop.permute.xlu0 %1703  ;;  %v591_v51 = vld [vmem:[#allocation2 + $0xe2] sm:$0xff] }
 0x257   :  { %1945 = vrot.lane.b32.xlu1 %v5953_v30, %s4713_s10  ;;  %7834 = vst [vmem:[#allocation200_spill] sm:$0xff] %v5961_v33  ;;  %v593_v33 = vld [vmem:[#allocation2 + $0xfa] sm:$0xff] }
 0x258   :  { %1947 = vrot.lane.b32.xlu0 %v588_v54, %s4713_s10 }
 0x259   :  { %v5963_v4 = vpop.permute.xlu1 %1705 }
 0x25a   :  { %7835 = vst [vmem:[#allocation201_spill] sm:$0xff] %v5963_v4  ;;  %v5967_v8 = vpop.permute.xlu0 %1707 }
 0x25b   :  { %1949 = vrot.lane.b32.xlu1 %v589_v21, %s4713_s10  ;;  %7836 = vst [vmem:[#allocation202_spill] sm:$0xff] %v5967_v8  ;;  %v594_v21 = vld [vmem:[#allocation2 + $0x10a] sm:$0xff]  ;;  %v595_v8 = vld [vmem:[#allocation2 + $0x112] sm:$0xff] }
 0x25c   :  { %1951 = vrot.lane.b32.xlu0 %v590_v3, %s4713_s10 }
 0x25d   :  { %v5969_v48 = vpop.permute.xlu1 %1709 }
 0x25e   :  { %7837 = vst [vmem:[#allocation203_spill] sm:$0xff] %v5969_v48  ;;  %v5973_v7 = vpop.permute.xlu0 %1711 }
 0x25f   :  { %1953 = vrot.lane.b32.xlu1 %v591_v51, %s4713_s10  ;;  %7838 = vst [vmem:[#allocation204_spill] sm:$0xff] %v5973_v7  ;;  %v596_v51 = vld [vmem:[#allocation2 + $0x122] sm:$0xff]  ;;  %v597_v7 = vld [vmem:[#allocation2 + $0x12a] sm:$0xff] }
 0x260   :  { %1955 = vrot.lane.b32.xlu0 %v592_v18, %s4713_s10  ;;  %v598_v18 = vld [vmem:[#allocation2 + $0x13a] sm:$0xff] }
 0x261   :  { %v5975_v44 = vpop.permute.xlu1 %1713 }
 0x262   :  { %7839 = vst [vmem:[#allocation205_spill] sm:$0xff] %v5975_v44  ;;  %v5979_v54 = vpop.permute.xlu0 %1715 }
 0x263   :  { %1957 = vrot.lane.b32.xlu1 %v593_v33, %s4713_s10  ;;  %7840 = vst [vmem:[#allocation206_spill] sm:$0xff] %v5979_v54  ;;  %v599_v54 = vld [vmem:[#allocation2 + $0x142] sm:$0xff] }
 0x264   :  { %1959 = vrot.lane.b32.xlu0 %v594_v21, %s4713_s10 }
 0x265   :  { %v5981_v4 = vpop.permute.xlu1 %1717 }
 0x266   :  { %7841 = vst [vmem:[#allocation207_spill] sm:$0xff] %v5981_v4  ;;  %v5985_v3 = vpop.permute.xlu0 %1719 }
 0x267   :  { %1961 = vrot.lane.b32.xlu1 %v595_v8, %s4713_s10  ;;  %7842 = vst [vmem:[#allocation208_spill] sm:$0xff] %v5985_v3  ;;  %v600_v8 = vld [vmem:[#allocation2 + $0x152] sm:$0xff]  ;;  %v601_v3 = vld [vmem:[#allocation2 + $0x15a] sm:$0xff] }
 0x268   :  { %1963 = vrot.lane.b32.xlu0 %v596_v51, %s4713_s10 }
 0x269   :  { %v5987_v48 = vpop.permute.xlu1 %1721 }
 0x26a   :  { %7843 = vst [vmem:[#allocation209_spill] sm:$0xff] %v5987_v48  ;;  %v5991_v33 = vpop.permute.xlu0 %1723 }
 0x26b   :  { %1965 = vrot.lane.b32.xlu1 %v597_v7, %s4713_s10  ;;  %7844 = vst [vmem:[#allocation210_spill] sm:$0xff] %v5991_v33  ;;  %v602_v7 = vld [vmem:[#allocation2 + $0x16a] sm:$0xff]  ;;  %v603_v33 = vld [vmem:[#allocation2 + $0x172] sm:$0xff] }
 0x26c   :  { %1967 = vrot.lane.b32.xlu0 %v598_v18, %s4713_s10 }
 0x26d   :  { %v5993_v44 = vpop.permute.xlu1 %1725 }
 0x26e   :  { %7845 = vst [vmem:[#allocation211_spill] sm:$0xff] %v5993_v44  ;;  %v5997_v21 = vpop.permute.xlu0 %1727  ;;  %v605_v44 = vld [vmem:[#allocation2 + $0x18a] sm:$0xff] }
 0x26f   :  { %1969 = vrot.lane.b32.xlu1 %v599_v54, %s4713_s10  ;;  %v604_v54 = vld [vmem:[#allocation2 + $0x182] sm:$0xff] }
 0x270   :  { %1971 = vrot.lane.b32.xlu0 %v600_v8, %s4713_s10 }
 0x271   :  { %v5999_v4 = vpop.permute.xlu1 %1729 }
 0x272   :  { %v6003_v51 = vpop.permute.xlu0 %1731 }
 0x273   :  { %1973 = vrot.lane.b32.xlu1 %v601_v3, %s4713_s10  ;;  %7846 = vst [vmem:[#allocation212_spill] sm:$0xff] %v6003_v51  ;;  %v606_v3 = vld [vmem:[#allocation2 + $0x1ca] sm:$0xff]  ;;  %v629_v51 = vld [vmem:[#allocation2 + $0x2da] sm:$0xff] }
 0x274   :  { %1975 = vrot.lane.b32.xlu0 %v602_v7, %s4713_s10 }
 0x275   :  { %v6005_v48 = vpop.permute.xlu1 %1733 }
 0x276   :  { %7847 = vst [vmem:[#allocation213_spill] sm:$0xff] %v6005_v48  ;;  %v6009_v18 = vpop.permute.xlu0 %1735  ;;  %v6097_v48 = vld [vmem:[#allocation2 + $0x27a] sm:$0xff] }
 0x277   :  { %1977 = vrot.lane.b32.xlu1 %v603_v33, %s4713_s10  ;;  %7848 = vst [vmem:[#allocation214_spill] sm:$0xff] %v6009_v18  ;;  %v6021_v33 = vld [vmem:[#allocation2 + $0x1e2] sm:$0xff]  ;;  %v6025_v18 = vld [vmem:[#allocation2 + $0x1ea] sm:$0xff] }
 0x278   :  { %1979 = vrot.lane.b32.xlu0 %v604_v54, %s4713_s10 }
 0x279   :  { %v6011_v17 = vpop.permute.xlu1 %1737 }
 0x27a   :  { %7849 = vst [vmem:[#allocation215_spill] sm:$0xff] %v6011_v17  ;;  %v6015_v8 = vpop.permute.xlu0 %1739 }
 0x27b   :  { %1981 = vrot.lane.b32.xlu1 %v605_v44, %s4713_s10  ;;  %7850 = vst [vmem:[#allocation216_spill] sm:$0xff] %v6015_v8  ;;  %v6033_v44 = vld [vmem:[#allocation2 + $0x1fa] sm:$0xff] }
 0x27c   :  { %1983 = vrot.lane.b32.xlu0 %v606_v3, %s4713_s10  ;;  %v6037_v3 = vld [vmem:[#allocation2 + $0x202] sm:$0xff] }
 0x27d   :  { %v6017_v37 = vpop.permute.xlu1 %1741 }
 0x27e   :  { %7851 = vst [vmem:[#allocation217_spill] sm:$0xff] %v6017_v37  ;;  %v6023_v7 = vpop.permute.xlu0 %1743  ;;  %v6049_v37 = vld [vmem:[#allocation2 + $0x21a] sm:$0xff] }
 0x27f   :  { %1985 = vrot.lane.b32.xlu1 %v607_v2, %s4713_s10  ;;  %7852 = vst [vmem:[#allocation218_spill] sm:$0xff] %v6023_v7 }
 0x280   :  { %1987 = vrot.lane.b32.xlu0 %v6021_v33, %s4713_s10 }
 0x281   :  { %v6027_v17 = vpop.permute.xlu1 %1745 }
 0x282   :  { %7853 = vst [vmem:[#allocation219_spill] sm:$0xff] %v6027_v17  ;;  %v6035_v54 = vpop.permute.xlu0 %1747  ;;  %v6045_v17 = vld [vmem:[#allocation2 + $0x212] sm:$0xff] }
 0x283   :  { %1989 = vrot.lane.b32.xlu1 %v6025_v18, %s4713_s10  ;;  %7854 = vst [vmem:[#allocation220_spill] sm:$0xff] %v6035_v54 }
 0x284   :  { %1991 = vrot.lane.b32.xlu0 %v6033_v44, %s4713_s10 }
 0x285   :  { %v6039_v2 = vpop.permute.xlu1 %1749 }
 0x286   :  { %7855 = vst [vmem:[#allocation221_spill] sm:$0xff] %v6039_v2  ;;  %v6047_v7 = vpop.permute.xlu0 %1751  ;;  %v6057_v2 = vld [vmem:[#allocation2 + $0x22a] sm:$0xff] }
 0x287   :  { %1993 = vrot.lane.b32.xlu1 %v6037_v3, %s4713_s10  ;;  %7856 = vst [vmem:[#allocation222_spill] sm:$0xff] %v6047_v7 }
 0x288   :  { %1995 = vrot.lane.b32.xlu0 %v6045_v17, %s4713_s10 }
 0x289   :  { %v6051_v8 = vpop.permute.xlu1 %1753 }
 0x28a   :  { %7857 = vst [vmem:[#allocation223_spill] sm:$0xff] %v6051_v8  ;;  %v6059_v54 = vpop.permute.xlu0 %1755  ;;  %v6069_v8 = vld [vmem:[#allocation2 + $0x242] sm:$0xff] }
 0x28b   :  { %1997 = vrot.lane.b32.xlu1 %v6049_v37, %s4713_s10  ;;  %7858 = vst [vmem:[#allocation224_spill] sm:$0xff] %v6059_v54 }
 0x28c   :  { %1999 = vrot.lane.b32.xlu0 %v6057_v2, %s4713_s10 }
 0x28d   :  { %v6063_v46 = vpop.permute.xlu1 %1757 }
 0x28e   :  { %7859 = vst [vmem:[#allocation225_spill] sm:$0xff] %v6063_v46  ;;  %v6071_v7 = vpop.permute.xlu0 %1759  ;;  %v6081_v46 = vld [vmem:[#allocation2 + $0x25a] sm:$0xff] }
 0x28f   :  { %2001 = vrot.lane.b32.xlu1 %v6061_v45, %s4713_s10  ;;  %7860 = vst [vmem:[#allocation226_spill] sm:$0xff] %v6071_v7 }
 0x290   :  { %2003 = vrot.lane.b32.xlu0 %v6069_v8, %s4713_s10 }
 0x291   :  { %v6075_v50 = vpop.permute.xlu1 %1761 }
 0x292   :  { %7861 = vst [vmem:[#allocation227_spill] sm:$0xff] %v6075_v50  ;;  %v6083_v54 = vpop.permute.xlu0 %1763  ;;  %v6093_v50 = vld [vmem:[#allocation2 + $0x272] sm:$0xff] }
 0x293   :  { %2005 = vrot.lane.b32.xlu1 %v6073_v43, %s4713_s10  ;;  %7862 = vst [vmem:[#allocation228_spill] sm:$0xff] %v6083_v54 }
 0x294   :  { %2007 = vrot.lane.b32.xlu0 %v6081_v46, %s4713_s10 }
 0x295   :  { %v6087_v0 = vpop.permute.xlu1 %1765 }
 0x296   :  { %7863 = vst [vmem:[#allocation229_spill] sm:$0xff] %v6087_v0  ;;  %v6095_v7 = vpop.permute.xlu0 %1767  ;;  %v6105_v0 = vld [vmem:[#allocation2 + $0x28a] sm:$0xff] }
 0x297   :  { %2009 = vrot.lane.b32.xlu1 %v6085_v13, %s4713_s10  ;;  %7864 = vst [vmem:[#allocation230_spill] sm:$0xff] %v6095_v7  ;;  %7866 = vst [vmem:[#allocation232_spill] sm:$0xff] %v6105_v0 }
 0x298   :  { %2011 = vrot.lane.b32.xlu0 %v6093_v50, %s4713_s10 }
 0x299   :  { %v6099_v29 = vpop.permute.xlu1 %1769 }
 0x29a   :  { %7865 = vst [vmem:[#allocation231_spill] sm:$0xff] %v6099_v29  ;;  %v6107_v54 = vpop.permute.xlu0 %1771  ;;  %v6117_v29 = vld [vmem:[#allocation2 + $0x2a2] sm:$0xff] }
 0x29b   :  { %2013 = vrot.lane.b32.xlu1 %v6097_v48, %s4713_s10  ;;  %7867 = vst [vmem:[#allocation233_spill] sm:$0xff] %v6107_v54  ;;  %7870 = vst [vmem:[#allocation236_spill] sm:$0xff] %v6117_v29  ;;  %v626_v54 = vld [vmem:[#allocation2 + $0x2ba] sm:$0xff] }
 0x29c   :  { %2015 = vrot.lane.b32.xlu0 %v6105_v0, %s4713_s10 }
 0x29d   :  { %v6111_v59 = vpop.permute.xlu1 %1773 }
 0x29e   :  { %7869 = vst [vmem:[#allocation235_spill] sm:$0xff] %v6111_v59  ;;  %v6119_v7 = vpop.permute.xlu0 %1775 }
 0x29f   :  { %2017 = vrot.lane.b32.xlu1 %v6109_v55, %s4713_s10  ;;  %7871 = vst [vmem:[#allocation237_spill] sm:$0xff] %v6119_v7  ;;  %v628_v55 = vld [vmem:[#allocation2 + $0x2d2] sm:$0xff] }
 0x2a0   :  { %2019 = vrot.lane.b32.xlu0 %v6117_v29, %s4713_s10 }
 0x2a1   :  { %v6121_v11 = vpop.permute.xlu1 %1777 }
 0x2a2   :  { %7872 = vst [vmem:[#allocation238_spill] sm:$0xff] %v6121_v11  ;;  %v6126_v59 = vpop.permute.xlu0 %1779 }
 0x2a3   :  { %2021 = vrot.lane.b32.xlu1 %v625_v15, %s4713_s10  ;;  %7873 = vst [vmem:[#allocation239_spill] sm:$0xff] %v6126_v59  ;;  %v630_v15 = vld [vmem:[#allocation2 + $0x2ea] sm:$0xff]  ;;  %v631_v59 = vld [vmem:[#allocation2 + $0x2f2] sm:$0xff] }
 0x2a4   :  { %2023 = vrot.lane.b32.xlu0 %v626_v54, %s4713_s10 }
 0x2a5   :  { %v6128_v0 = vpop.permute.xlu1 %1781 }
 0x2a6   :  { %7874 = vst [vmem:[#allocation240_spill] sm:$0xff] %v6128_v0  ;;  %v6132_v7 = vpop.permute.xlu0 %1783 }
 0x2a7   :  { %2025 = vrot.lane.b32.xlu1 %v627_v9, %s4713_s10  ;;  %7875 = vst [vmem:[#allocation241_spill] sm:$0xff] %v6132_v7  ;;  %v632_v9 = vld [vmem:[#allocation2 + $0x302] sm:$0xff]  ;;  %v633_v7 = vld [vmem:[#allocation2 + $0x30a] sm:$0xff] }
 0x2a8   :  { %2027 = vrot.lane.b32.xlu0 %v628_v55, %s4713_s10  ;;  %v634_v55 = vld [vmem:[#allocation2 + $0x31a] sm:$0xff] }
 0x2a9   :  { %v6134_v11 = vpop.permute.xlu1 %1785 }
 0x2aa   :  { %7876 = vst [vmem:[#allocation242_spill] sm:$0xff] %v6134_v11  ;;  %v6138_v29 = vpop.permute.xlu0 %1787 }
 0x2ab   :  { %2029 = vrot.lane.b32.xlu1 %v629_v51, %s4713_s10  ;;  %7877 = vst [vmem:[#allocation243_spill] sm:$0xff] %v6138_v29  ;;  %v635_v29 = vld [vmem:[#allocation2 + $0x322] sm:$0xff] }
 0x2ac   :  { %2031 = vrot.lane.b32.xlu0 %v630_v15, %s4713_s10 }
 0x2ad   :  { %v6140_v62 = vpop.permute.xlu1 %1789 }
 0x2ae   :  { %7878 = vst [vmem:[#allocation244_spill] sm:$0xff] %v6140_v62  ;;  %v6144_v54 = vpop.permute.xlu0 %1919  ;;  %v637_v62 = vld [vmem:[#allocation2 + $0x33a] sm:$0xff] }
 0x2af   :  { %2033 = vrot.lane.b32.xlu1 %v631_v59, %s4713_s10  ;;  %v636_v59 = vld [vmem:[#allocation2 + $0x332] sm:$0xff] }
 0x2b0   :  { %2035 = vrot.lane.b32.xlu0 %v632_v9, %s4713_s10 }
 0x2b1   :  { %v6146_v0 = vpop.permute.xlu1 %1921 }
 0x2b2   :  { %v6150_v51 = vpop.permute.xlu0 %1923 }
 0x2b3   :  { %2037 = vrot.lane.b32.xlu1 %v633_v7, %s4713_s10  ;;  %7879 = vst [vmem:[#allocation245_spill] sm:$0xff] %v6150_v51  ;;  %v639_v7 = vld [vmem:[#allocation2 + $0x30] sm:$0xff]  ;;  %v640_v51 = vld [vmem:[#allocation2 + $0x38] sm:$0xff] }
 0x2b4   :  { %2039 = vrot.lane.b32.xlu0 %v634_v55, %s4713_s10 }
 0x2b5   :  { %v6152_v11 = vpop.permute.xlu1 %1925 }
 0x2b6   :  { %7880 = vst [vmem:[#allocation246_spill] sm:$0xff] %v6152_v11  ;;  %v6156_v15 = vpop.permute.xlu0 %1927 }
 0x2b7   :  { %2041 = vrot.lane.b32.xlu1 %v635_v29, %s4713_s10  ;;  %7881 = vst [vmem:[#allocation247_spill] sm:$0xff] %v6156_v15  ;;  %v641_v29 = vld [vmem:[#allocation2 + $0x48] sm:$0xff]  ;;  %v642_v15 = vld [vmem:[#allocation2 + $0x50] sm:$0xff] }
 0x2b8   :  { %2043 = vrot.lane.b32.xlu0 %v636_v59, %s4713_s10 }
 0x2b9   :  { %v6158_v1 = vpop.permute.xlu1 %1929 }
 0x2ba   :  { %7882 = vst [vmem:[#allocation248_spill] sm:$0xff] %v6158_v1  ;;  %v6162_v9 = vpop.permute.xlu0 %1931 }
 0x2bb   :  { %2045 = vrot.lane.b32.xlu1 %v637_v62, %s4713_s10  ;;  %7883 = vst [vmem:[#allocation249_spill] sm:$0xff] %v6162_v9  ;;  %v643_v62 = vld [vmem:[#allocation2 + $0x60] sm:$0xff]  ;;  %v644_v9 = vld [vmem:[#allocation2 + $0x68] sm:$0xff] }
 0x2bc   :  { %2175 = vrot.lane.b32.xlu0 %v639_v7, %s4714_s11 }
 0x2bd   :  { %v6164_v38 = vpop.permute.xlu1 %1933 }
 0x2be   :  { %7884 = vst [vmem:[#allocation250_spill] sm:$0xff] %v6164_v38  ;;  %v6168_v55 = vpop.permute.xlu0 %1935 }
 0x2bf   :  { %2177 = vrot.lane.b32.xlu1 %v640_v51, %s4714_s11  ;;  %7885 = vst [vmem:[#allocation251_spill] sm:$0xff] %v6168_v55  ;;  %v645_v51 = vld [vmem:[#allocation2 + $0x78] sm:$0xff]  ;;  %v646_v55 = vld [vmem:[#allocation2 + $0x80] sm:$0xff] }
 0x2c0   :  { %2179 = vrot.lane.b32.xlu0 %v641_v29, %s4714_s11 }
 0x2c1   :  { %v6170_v1 = vpop.permute.xlu1 %1937 }
 0x2c2   :  { %7886 = vst [vmem:[#allocation252_spill] sm:$0xff] %v6170_v1  ;;  %v6174_v59 = vpop.permute.xlu0 %1939 }
 0x2c3   :  { %2181 = vrot.lane.b32.xlu1 %v642_v15, %s4714_s11  ;;  %7887 = vst [vmem:[#allocation253_spill] sm:$0xff] %v6174_v59  ;;  %v647_v15 = vld [vmem:[#allocation2 + $0x90] sm:$0xff]  ;;  %v648_v59 = vld [vmem:[#allocation2 + $0x98] sm:$0xff] }
 0x2c4   :  { %2183 = vrot.lane.b32.xlu0 %v643_v62, %s4714_s11 }
 0x2c5   :  { %v6176_v38 = vpop.permute.xlu1 %1941 }
 0x2c6   :  { %7888 = vst [vmem:[#allocation254_spill] sm:$0xff] %v6176_v38  ;;  %v6180_v7 = vpop.permute.xlu0 %1943 }
 0x2c7   :  { %2185 = vrot.lane.b32.xlu1 %v644_v9, %s4714_s11  ;;  %7889 = vst [vmem:[#allocation255_spill] sm:$0xff] %v6180_v7  ;;  %v649_v9 = vld [vmem:[#allocation2 + $0xa8] sm:$0xff]  ;;  %v650_v7 = vld [vmem:[#allocation2 + $0xb0] sm:$0xff] }
 0x2c8   :  { %2187 = vrot.lane.b32.xlu0 %v645_v51, %s4714_s11 }
 0x2c9   :  { %v6182_v11 = vpop.permute.xlu1 %1945 }
 0x2ca   :  { %7890 = vst [vmem:[#allocation256_spill] sm:$0xff] %v6182_v11  ;;  %v6186_v29 = vpop.permute.xlu0 %1947 }
 0x2cb   :  { %2189 = vrot.lane.b32.xlu1 %v646_v55, %s4714_s11  ;;  %7891 = vst [vmem:[#allocation257_spill] sm:$0xff] %v6186_v29  ;;  %v651_v55 = vld [vmem:[#allocation2 + $0xc0] sm:$0xff]  ;;  %v652_v29 = vld [vmem:[#allocation2 + $0xc8] sm:$0xff] }
 0x2cc   :  { %2191 = vrot.lane.b32.xlu0 %v647_v15, %s4714_s11  ;;  %v3398_v15 = vld [vmem:[%s7635_s1] sm:$0xff] }
 0x2cd   :  { %v6188_v1 = vpop.permute.xlu1 %1949 }
 0x2ce   :  { %7892 = vst [vmem:[#allocation258_spill] sm:$0xff] %v6188_v1  ;;  %v6192_v62 = vpop.permute.xlu0 %1951 }
 0x2cf   :  { %2193 = vrot.lane.b32.xlu1 %v648_v59, %s4714_s11  ;;  %7893 = vst [vmem:[#allocation259_spill] sm:$0xff] %v6192_v62  ;;  %v653_v59 = vld [vmem:[#allocation2 + $0xd8] sm:$0xff] }
 0x2d0   :  { %2195 = vrot.lane.b32.xlu0 %v649_v9, %s4714_s11  ;;  %v3399_v9 = vld [vmem:[%s7635_s1 + $0x8] sm:$0xff] }
 0x2d1   :  { %v6194_v38 = vpop.permute.xlu1 %1953 }
 0x2d2   :  { %7894 = vst [vmem:[#allocation260_spill] sm:$0xff] %v6194_v38  ;;  %v6198_v51 = vpop.permute.xlu0 %1955  ;;  %v654_v38 = vld [vmem:[#allocation2 + $0xe0] sm:$0xff] }
 0x2d3   :  { %2197 = vrot.lane.b32.xlu1 %v650_v7, %s4714_s11  ;;  %7895 = vst [vmem:[#allocation261_spill] sm:$0xff] %v6198_v51  ;;  %v4596_v51 = vpack.c.bf16 %v3399_v9, %v3398_v15  ;;  %v672_v15 = vld [vmem:[#allocation2 + $0x1e8] sm:$0xff] }
 0x2d4   :  { %2199 = vrot.lane.b32.xlu0 %v651_v55, %s4714_s11  ;;  %v3400_v55 = vld [vmem:[%s7635_s1 + $0x10] sm:$0xff] }
 0x2d5   :  { %v6200_v11 = vpop.permute.xlu1 %1957  ;;  %4597 = vmatprep.subr.bf16.mxu0 %v4596_v51  ;;  %4606 = vmatprep.subr.bf16.mxu1 %v4596_v51 }
 0x2d6   :  { %7896 = vst [vmem:[#allocation262_spill] sm:$0xff] %v6200_v11  ;;  %v6210_v7 = vpop.permute.xlu0 %1959  ;;  %v3401_v11 = vld [vmem:[%s7635_s1 + $0x18] sm:$0x7]  ;;  %4599 = vmatpush3.bf16.msra.mxu0 %v4596_v51  ;;  %4608 = vmatpush3.bf16.msra.mxu1 %v4596_v51  ;;  %s4716_s1 = smov 21  }
 0x2d7   :  { %2201 = vrot.lane.b32.xlu1 %v652_v29, %s4714_s11  ;;  %7897 = vst [vmem:[#allocation263_spill] sm:$0xff] %v6210_v7  ;;  %v671_v29 = vld [vmem:[#allocation2 + $0x1e0] sm:$0xff] }
 0x2d8   :  { %2203 = vrot.lane.b32.xlu0 %v653_v59, %s4714_s11  ;;  %v4600_v59 = vpack.c.bf16 %v3401_v11, %v3400_v55  ;;  %v704_v11 = vld [vmem:[#allocation2 + $0x39] sm:$0xff] }
 0x2d9   :  { %v6212_v62 = vpop.permute.xlu1 %1961 }
 0x2da   :  { %7898 = vst [vmem:[#allocation264_spill] sm:$0xff] %v6212_v62  ;;  %v6222_v7 = vpop.permute.xlu0 %1963  ;;  %4602 = vmatprep.subr.msk.bf16.mxu0 %vm4601_vm4, %v4600_v59  ;;  %4607 = vmatprep.subr.msk.bf16.mxu1 %vm4601_vm4, %v4600_v59 }
 0x2db   :  { %2205 = vrot.lane.b32.xlu1 %v654_v38, %s4714_s11  ;;  %7899 = vst [vmem:[#allocation265_spill] sm:$0xff] %v6222_v7  ;;  %v703_v38 = vld [vmem:[#allocation2 + $0x31] sm:$0xff]  ;;  %4605 = vmatpush3.bf16.msk.msra.mxu0 %vm4601_vm4, %v4600_v59 }
 0x2dc   :  { %2239 = vrot.lane.b32.xlu0 %v671_v29, %s4714_s11  ;;  %4609 = vmatpush3.bf16.msk.msra.mxu1 %vm4601_vm4, %v4600_v59 }
 0x2dd   :  { %v6224_v9 = vpop.permute.xlu1 %1965 }
 0x2de   :  { %7900 = vst [vmem:[#allocation266_spill] sm:$0xff] %v6224_v9  ;;  %v6228_v62 = vpop.permute.xlu0 %1967 }
 0x2df   :  { %2241 = vrot.lane.b32.xlu1 %v672_v15, %s4714_s11  ;;  %7901 = vst [vmem:[#allocation267_spill] sm:$0xff] %v6228_v62  ;;  %v740_v62 = vld [vmem:[#allocation2 + $0x219] sm:$0xff] }
 0x2e0   :  { %2431 = vrot.lane.b32.xlu0 %v703_v38, %s4716_s1 }
 0x2e1   :  { %v6230_v7 = vpop.permute.xlu1 %1969 }
 0x2e2   :  { %7902 = vst [vmem:[#allocation268_spill] sm:$0xff] %v6230_v7  ;;  %v6235_v51 = vpop.permute.xlu0 %1971 }
 0x2e3   :  { %2495 = vrot.lane.b32.xlu1 %v5781_v47, %s4716_s1  ;;  %7903 = vst [vmem:[#allocation269_spill] sm:$0xff] %v6235_v51  ;;  %v739_v51 = vld [vmem:[#allocation2 + $0x211] sm:$0xff] }
 0x2e4   :  { %2433 = vrot.lane.b32.xlu0 %v704_v11, %s4716_s1  ;;  %v674_v11 = vld [vmem:[#allocation2 + $0x200] sm:$0xff] }
 0x2e5   :  { %v6237_v29 = vpop.permute.xlu1 %1973 }
 0x2e6   :  { %7904 = vst [vmem:[#allocation270_spill] sm:$0xff] %v6237_v29  ;;  %v6242_v55 = vpop.permute.xlu0 %1975 }
 0x2e7   :  { %2497 = vrot.lane.b32.xlu1 %v5785_v16, %s4716_s1  ;;  %7905 = vst [vmem:[#allocation271_spill] sm:$0xff] %v6242_v55  ;;  %v673_v16 = vld [vmem:[#allocation2 + $0x1f8] sm:$0xff] }
 0x2e8   :  { %2687 = vrot.lane.b32.xlu0 %v5889_v41, %s4717_s20  ;;  %v705_v41 = vld [vmem:[#allocation2 + $0x49] sm:$0xff]  ;;  %v676_v55 = vld [vmem:[#allocation2 + $0x218] sm:$0xff] }
 0x2e9   :  { %v6244_v15 = vpop.permute.xlu1 %1977 }
 0x2ea   :  { %7906 = vst [vmem:[#allocation272_spill] sm:$0xff] %v6244_v15  ;;  %v6250_v47 = vpop.permute.xlu0 %1979 }
 0x2eb   :  { %2751 = vrot.lane.b32.xlu1 %v6021_v33, %s4717_s20  ;;  %7907 = vst [vmem:[#allocation273_spill] sm:$0xff] %v6250_v47 }
 0x2ec   :  { %2689 = vrot.lane.b32.xlu0 %v5893_v26, %s4717_s20  ;;  %v706_v26 = vld [vmem:[#allocation2 + $0x51] sm:$0xff] }
 0x2ed   :  { %v6252_v59 = vpop.permute.xlu1 %1981 }
 0x2ee   :  { %7908 = vst [vmem:[#allocation274_spill] sm:$0xff] %v6252_v59  ;;  %v6258_v38 = vpop.permute.xlu0 %1983 }
 0x2ef   :  { %2753 = vrot.lane.b32.xlu1 %v6025_v18, %s4717_s20 }
 0x2f0   :  { %2243 = vrot.lane.b32.xlu0 %v673_v16, %s4714_s11 }
 0x2f1   :  { %v6260_v15 = vpop.permute.xlu1 %1985 }
 0x2f2   :  { %v6264_v33 = vpop.permute.xlu0 %1987 }
 0x2f3   :  { %2245 = vrot.lane.b32.xlu1 %v674_v11, %s4714_s11 }
 0x2f4   :  { %2435 = vrot.lane.b32.xlu0 %v705_v41, %s4716_s1 }
 0x2f5   :  { %v6266_v59 = vpop.permute.xlu1 %1989 }
 0x2f6   :  { %v6271_v18 = vpop.permute.xlu0 %1991 }
 0x2f7   :  { %2499 = vrot.lane.b32.xlu1 %v5793_v14, %s4716_s1 }
 0x2f8   :  { %2437 = vrot.lane.b32.xlu0 %v706_v26, %s4716_s1 }
 0x2f9   :  { %v6273_v47 = vpop.permute.xlu1 %1993 }
 0x2fa   :  { %v6278_v16 = vpop.permute.xlu0 %1995 }
 0x2fb   :  { %2501 = vrot.lane.b32.xlu1 %v5797_v53, %s4716_s1  ;;  %v675_v53 = vld [vmem:[#allocation2 + $0x210] sm:$0xff] }
 0x2fc   :  { %2691 = vrot.lane.b32.xlu0 %v5901_v10, %s4717_s20  ;;  %v707_v10 = vld [vmem:[#allocation2 + $0x61] sm:$0xff] }
 0x2fd   :  { %v6280_v11 = vpop.permute.xlu1 %1997 }
 0x2fe   :  { %v6286_v14 = vpop.permute.xlu0 %1999 }
 0x2ff   :  { %2755 = vrot.lane.b32.xlu1 %v6033_v44, %s4717_s20 }
 0x300   :  { %2693 = vrot.lane.b32.xlu0 %v5905_v42, %s4717_s20  ;;  %v708_v42 = vld [vmem:[#allocation2 + $0x69] sm:$0xff] }
 0x301   :  { %v6288_v41 = vpop.permute.xlu1 %2001 }
 0x302   :  { %v6294_v26 = vpop.permute.xlu0 %2003 }
 0x303   :  { %2757 = vrot.lane.b32.xlu1 %v6037_v3, %s4717_s20 }
 0x304   :  { %2247 = vrot.lane.b32.xlu0 %v675_v53, %s4714_s11 }
 0x305   :  { %v6296_v29 = vpop.permute.xlu1 %2005 }
 0x306   :  { %v6300_v44 = vpop.permute.xlu0 %2007 }
 0x307   :  { %2249 = vrot.lane.b32.xlu1 %v676_v55, %s4714_s11  ;;  %7909 = vst [vmem:[#allocation275_spill] sm:$0xff] %v6300_v44 }
 0x308   :  { %2439 = vrot.lane.b32.xlu0 %v707_v10, %s4716_s1 }
 0x309   :  { %v6302_v7 = vpop.permute.xlu1 %2009 }
 0x30a   :  { %7910 = vst [vmem:[#allocation276_spill] sm:$0xff] %v6302_v7  ;;  %v6306_v3 = vpop.permute.xlu0 %2011  ;;  %v287_v7 = vld [vmem:[#allocation2 + $0x1b8] sm:$0xff] }
 0x30b   :  { %2503 = vrot.lane.b32.xlu1 %v739_v51, %s4716_s1  ;;  %7911 = vst [vmem:[#allocation277_spill] sm:$0xff] %v6306_v3  ;;  %v254_v3 = vld [vmem:[#allocation2] sm:$0xff] }
 0x30c   :  { %2441 = vrot.lane.b32.xlu0 %v708_v42, %s4716_s1 }
 0x30d   :  { %v6308_v9 = vpop.permute.xlu1 %2013 }
 0x30e   :  { %7912 = vst [vmem:[#allocation278_spill] sm:$0xff] %v6308_v9  ;;  %v6312_v55 = vpop.permute.xlu0 %2015 }
 0x30f   :  { %2505 = vrot.lane.b32.xlu1 %v740_v62, %s4716_s1  ;;  %7913 = vst [vmem:[#allocation279_spill] sm:$0xff] %v6312_v55  ;;  %v677_v62 = vld [vmem:[#allocation2 + $0x228] sm:$0xff] }
 0x310   :  { %2695 = vrot.lane.b32.xlu0 %v5913_v22, %s4717_s20 }
 0x311   :  { %v6314_v53 = vpop.permute.xlu1 %2017 }
 0x312   :  { %7914 = vst [vmem:[#allocation280_spill] sm:$0xff] %v6314_v53  ;;  %v6320_v51 = vpop.permute.xlu0 %2019  ;;  %v678_v53 = vld [vmem:[#allocation2 + $0x230] sm:$0xff] }
 0x313   :  { %2759 = vrot.lane.b32.xlu1 %v6045_v17, %s4717_s20  ;;  %7915 = vst [vmem:[#allocation281_spill] sm:$0xff] %v6320_v51  ;;  %v709_v17 = vld [vmem:[#allocation2 + $0x79] sm:$0xff] }
 0x314   :  { %2697 = vrot.lane.b32.xlu0 %v5917_v19, %s4717_s20  ;;  %v710_v19 = vld [vmem:[#allocation2 + $0x81] sm:$0xff] }
 0x315   :  { %v6322_v10 = vpop.permute.xlu1 %2021 }
 0x316   :  { %7916 = vst [vmem:[#allocation282_spill] sm:$0xff] %v6322_v10  ;;  %v6328_v42 = vpop.permute.xlu0 %2023  ;;  %v741_v10 = vld [vmem:[#allocation2 + $0x229] sm:$0xff] }
 0x317   :  { %2761 = vrot.lane.b32.xlu1 %v6049_v37, %s4717_s20  ;;  %7917 = vst [vmem:[#allocation283_spill] sm:$0xff] %v6328_v42  ;;  %v742_v42 = vld [vmem:[#allocation2 + $0x231] sm:$0xff] }
 0x318   :  { %2251 = vrot.lane.b32.xlu0 %v677_v62, %s4714_s11 }
 0x319   :  { %v6330_v55 = vpop.permute.xlu1 %2025 }
 0x31a   :  { %7918 = vst [vmem:[#allocation284_spill] sm:$0xff] %v6330_v55  ;;  %v6334_v22 = vpop.permute.xlu0 %2027  ;;  %v746_v55 = vld [vmem:[#allocation2 + $0x261] sm:$0xff] }
 0x31b   :  { %2253 = vrot.lane.b32.xlu1 %v678_v53, %s4714_s11  ;;  %7919 = vst [vmem:[#allocation285_spill] sm:$0xff] %v6334_v22 }
 0x31c   :  { %2443 = vrot.lane.b32.xlu0 %v709_v17, %s4716_s1 }
 0x31d   :  { %v6336_v51 = vpop.permute.xlu1 %2029 }
 0x31e   :  { %7920 = vst [vmem:[#allocation286_spill] sm:$0xff] %v6336_v51  ;;  %v6340_v37 = vpop.permute.xlu0 %2031  ;;  %v745_v51 = vld [vmem:[#allocation2 + $0x259] sm:$0xff] }
 0x31f   :  { %2507 = vrot.lane.b32.xlu1 %v741_v10, %s4716_s1  ;;  %7921 = vst [vmem:[#allocation287_spill] sm:$0xff] %v6340_v37 }
 0x320   :  { %2445 = vrot.lane.b32.xlu0 %v710_v19, %s4716_s1 }
 0x321   :  { %v6342_v9 = vpop.permute.xlu1 %2033 }
 0x322   :  { %7922 = vst [vmem:[#allocation288_spill] sm:$0xff] %v6342_v9  ;;  %v6346_v53 = vpop.permute.xlu0 %2035 }
 0x323   :  { %2509 = vrot.lane.b32.xlu1 %v742_v42, %s4716_s1  ;;  %7923 = vst [vmem:[#allocation289_spill] sm:$0xff] %v6346_v53  ;;  %v679_v42 = vld [vmem:[#allocation2 + $0x240] sm:$0xff] }
 0x324   :  { %2699 = vrot.lane.b32.xlu0 %v5925_v12, %s4717_s20  ;;  %v711_v12 = vld [vmem:[#allocation2 + $0x91] sm:$0xff] }
 0x325   :  { %v6348_v62 = vpop.permute.xlu1 %2037 }
 0x326   :  { %7924 = vst [vmem:[#allocation290_spill] sm:$0xff] %v6348_v62  ;;  %v6354_v10 = vpop.permute.xlu0 %2039  ;;  %v680_v62 = vld [vmem:[#allocation2 + $0x248] sm:$0xff] }
 0x327   :  { %2763 = vrot.lane.b32.xlu1 %v6057_v2, %s4717_s20  ;;  %7925 = vst [vmem:[#allocation291_spill] sm:$0xff] %v6354_v10 }
 0x328   :  { %2701 = vrot.lane.b32.xlu0 %v5929_v6, %s4717_s20  ;;  %v712_v6 = vld [vmem:[#allocation2 + $0x99] sm:$0xff] }
 0x329   :  { %v6356_v17 = vpop.permute.xlu1 %2041 }
 0x32a   :  { %7926 = vst [vmem:[#allocation292_spill] sm:$0xff] %v6356_v17  ;;  %v6362_v19 = vpop.permute.xlu0 %2043  ;;  %v743_v17 = vld [vmem:[#allocation2 + $0x241] sm:$0xff] }
 0x32b   :  { %2765 = vrot.lane.b32.xlu1 %v6061_v45, %s4717_s20  ;;  %7927 = vst [vmem:[#allocation293_spill] sm:$0xff] %v6362_v19  ;;  %v744_v19 = vld [vmem:[#allocation2 + $0x249] sm:$0xff] }
 0x32c   :  { %2255 = vrot.lane.b32.xlu0 %v679_v42, %s4714_s11 }
 0x32d   :  { %v6364_v53 = vpop.permute.xlu1 %2045 }
 0x32e   :  { %7928 = vst [vmem:[#allocation294_spill] sm:$0xff] %v6364_v53  ;;  %v6368_v2 = vpop.permute.xlu0 %2175  ;;  %v682_v53 = vld [vmem:[#allocation2 + $0x260] sm:$0xff] }
 0x32f   :  { %2257 = vrot.lane.b32.xlu1 %v680_v62, %s4714_s11 }
 0x330   :  { %2447 = vrot.lane.b32.xlu0 %v711_v12, %s4716_s1 }
 0x331   :  { %v6370_v10 = vpop.permute.xlu1 %2177 }
 0x332   :  { %v6374_v45 = vpop.permute.xlu0 %2179 }
 0x333   :  { %2511 = vrot.lane.b32.xlu1 %v743_v17, %s4716_s1 }
 0x334   :  { %2449 = vrot.lane.b32.xlu0 %v712_v6, %s4716_s1 }
 0x335   :  { %v6376_v9 = vpop.permute.xlu1 %2181 }
 0x336   :  { %v6380_v62 = vpop.permute.xlu0 %2183 }
 0x337   :  { %2513 = vrot.lane.b32.xlu1 %v744_v19, %s4716_s1  ;;  %v681_v19 = vld [vmem:[#allocation2 + $0x258] sm:$0xff] }
 0x338   :  { %2703 = vrot.lane.b32.xlu0 %v5937_v25, %s4717_s20  ;;  %v713_v25 = vld [vmem:[#allocation2 + $0xa9] sm:$0xff] }
 0x339   :  { %v6382_v42 = vpop.permute.xlu1 %2185 }
 0x33a   :  { %v6388_v17 = vpop.permute.xlu0 %2187 }
 0x33b   :  { %2767 = vrot.lane.b32.xlu1 %v6069_v8, %s4717_s20 }
 0x33c   :  { %2705 = vrot.lane.b32.xlu0 %v5941_v39, %s4717_s20 }
 0x33d   :  { %v6390_v12 = vpop.permute.xlu1 %2189 }
 0x33e   :  { %v6396_v6 = vpop.permute.xlu0 %2191 }
 0x33f   :  { %2769 = vrot.lane.b32.xlu1 %v6073_v43, %s4717_s20  ;;  %v714_v43 = vld [vmem:[#allocation2 + $0xb1] sm:$0xff] }
 0x340   :  { %2259 = vrot.lane.b32.xlu0 %v681_v19, %s4714_s11 }
 0x341   :  { %v6398_v37 = vpop.permute.xlu1 %2193 }
 0x342   :  { %v6402_v8 = vpop.permute.xlu0 %2195 }
 0x343   :  { %2261 = vrot.lane.b32.xlu1 %v682_v53, %s4714_s11 }
 0x344   :  { %2451 = vrot.lane.b32.xlu0 %v713_v25, %s4716_s1 }
 0x345   :  { %v6404_v22 = vpop.permute.xlu1 %2197 }
 0x346   :  { %v6408_v39 = vpop.permute.xlu0 %2199 }
 0x347   :  { %2515 = vrot.lane.b32.xlu1 %v745_v51, %s4716_s1  ;;  %7929 = vst [vmem:[#allocation295_spill] sm:$0xff] %v6408_v39  ;;  %v715_v39 = vld [vmem:[#allocation2 + $0xc1] sm:$0xff] }
 0x348   :  { %2453 = vrot.lane.b32.xlu0 %v714_v43, %s4716_s1  ;;  %v286_v43 = vld [vmem:[#allocation2 + $0x1b0] sm:$0xff] }
 0x349   :  { %v6410_v1 = vpop.permute.xlu1 %2201 }
 0x34a   :  { %7930 = vst [vmem:[#allocation296_spill] sm:$0xff] %v6410_v1  ;;  %v6414_v53 = vpop.permute.xlu0 %2203  ;;  %v255_v1 = vld [vmem:[#allocation2 + $0x8] sm:$0xff] }
 0x34b   :  { %2517 = vrot.lane.b32.xlu1 %v746_v55, %s4716_s1  ;;  %7931 = vst [vmem:[#allocation297_spill] sm:$0xff] %v6414_v53  ;;  %v683_v55 = vld [vmem:[#allocation2 + $0x270] sm:$0xff]  ;;  %v684_v53 = vld [vmem:[#allocation2 + $0x278] sm:$0xff] }
 0x34c   :  { %2707 = vrot.lane.b32.xlu0 %v5949_v28, %s4717_s20 }
 0x34d   :  { %v6416_v19 = vpop.permute.xlu1 %2205 }
 0x34e   :  { %7932 = vst [vmem:[#allocation298_spill] sm:$0xff] %v6416_v19  ;;  %v2240_v51 = vpop.permute.xlu0 %2239 }
 0x34f   :  { %2771 = vrot.lane.b32.xlu1 %v6081_v46, %s4717_s20  ;;  %v2879_v46 = vsel %vm15_vm0, %v254_v3, %v5261_v56 }
 0x350   :  { %2709 = vrot.lane.b32.xlu0 %v5953_v30, %s4717_s20  ;;  %v2911_v30 = vsel %vm15_vm0, %v286_v43, %v5357_v57  ;;  %v2880_v57 = vsel %vm15_vm0, %v255_v1, %v5267_v60 }
 0x351   :  { %v6422_v25 = vpop.permute.xlu1 %2241  ;;  %v2976_v44 = vsel %vm2943_vm5, %v2911_v30, %v5565_v36  ;;  %v2912_v36 = vsel %vm15_vm0, %v287_v7, %v5359_v61  ;;  %v2945_v60 = vsel %vm2943_vm5, %v2880_v57, %v5463_v52  ;;  %v716_v61 = vld [vmem:[#allocation2 + $0xc9] sm:$0xff] }
 0x352   :  { %v2432_v19 = vpop.permute.xlu0 %2431  ;;  %v3041_v43 = vsel %vm3008_vm6, %v2976_v44, %v5757_v49  ;;  %v2977_v1 = vsel %vm2943_vm5, %v2912_v36, %v5567_v23  ;;  %v748_v44 = vld [vmem:[#allocation2 + $0x279] sm:$0xff] }
 0x353   :  { %2773 = vrot.lane.b32.xlu1 %v6085_v13, %s4717_s20  ;;  %v2944_v13 = vsel %vm2943_vm5, %v2879_v46, %v5461_v27 }
 0x354   :  { %2263 = vrot.lane.b32.xlu0 %v683_v55, %s4714_s11  ;;  %v3009_v56 = vsel %vm3008_vm6, %v2944_v13, %v5661_v40  ;;  %v747_v55 = vld [vmem:[#allocation2 + $0x271] sm:$0xff]  ;;  %v3106_v40 = vsel %vm3073_vm7, %v3041_v43, %v5997_v21  ;;  %v3010_v21 = vsel %vm3008_vm6, %v2945_v60, %v5663_v24  ;;  %v685_v43 = vld [vmem:[#allocation2 + $0x288] sm:$0xff] }
 0x355   :  { %v2496_v28 = vpop.permute.xlu1 %2495  ;;  %v3074_v27 = vsel %vm3073_vm7, %v3009_v56, %v5865_v35  ;;  %v3171_v49 = vsel %vm3138_vm8, %v3106_v40, %v6258_v38  ;;  %v3042_v38 = vsel %vm3008_vm6, %v2977_v1, %v5759_v31  ;;  %v4623_v40 = vld [vmem:[#allocation2 + $0x18] sm:$0xff] }
 0x356   :  { %v2434_v3 = vpop.permute.xlu0 %2433  ;;  %v3139_v46 = vsel %vm3138_vm8, %v3074_v27, %v6144_v54  ;;  %v3236_v54 = vsel %vm3203_vm9, %v3171_v49, %v2240_v51  ;;  %v3107_v24 = vsel %vm3073_vm7, %v3042_v38, %v5999_v4  ;;  %v779_v4 = vld [vmem:[#allocation2 + $0xc2] sm:$0xff] }
 0x357   :  { %2265 = vrot.lane.b32.xlu1 %v684_v53, %s4714_s11  ;;  %v3204_v35 = vsel %vm3203_vm9, %v3139_v46, %v6368_v2  ;;  %v3075_v2 = vsel %vm3073_vm7, %v3010_v21, %v5867_v32  ;;  %v3172_v32 = vsel %vm3138_vm8, %v3107_v24, %v6260_v15  ;;  %v2881_v46 = vsel %vm15_vm0, %v4623_v40, %v5263_v58  ;;  %v749_v58 = vld [vmem:[#allocation2 + $0x289] sm:$0xff] }
 0x358   :  { %2455 = vrot.lane.b32.xlu0 %v715_v39, %s4716_s1  ;;  %v3269_v52 = vsel %vm3268_vm10, %v3204_v35, %v2432_v19  ;;  %v3301_v39 = vsel %vm3268_vm10, %v3236_v54, %v2496_v28  ;;  %v3140_v51 = vsel %vm3138_vm8, %v3075_v2, %v6146_v0  ;;  %v3237_v0 = vsel %vm3203_vm9, %v3172_v32, %v6422_v25  ;;  %v7933_v21 = vld [vmem:[#allocation152_spill] sm:$0xff] }
 0x359   :  { %v2498_v53 = vpop.permute.xlu1 %2497  ;;  %v3205_v19 = vsel %vm3203_vm9, %v3140_v51, %v6370_v10  ;;  %v780_v10 = vld [vmem:[#allocation2 + $0xca] sm:$0xff]  ;;  %v2946_v49 = vsel %vm2943_vm5, %v2881_v46, %v5475_v63  ;;  %v7935_v63 = vld [vmem:[#allocation7_spill] sm:$0xff] }
 0x35a   :  { %v2688_v7 = vpop.permute.xlu0 %2687  ;;  %v3270_v28 = vsel %vm3268_vm10, %v3205_v19, %v2434_v3  ;;  %v3302_v56 = vsel %vm3268_vm10, %v3237_v0, %v2498_v53  ;;  %v686_v53 = vld [vmem:[#allocation2 + $0x290] sm:$0xff]  ;;  %v7936_v2 = vld [vmem:[#allocation212_spill] sm:$0xff]  ;;  %v7940_v0 = vld [vmem:[#allocation94_spill] sm:$0xff] }
 0x35b   :  { %2519 = vrot.lane.b32.xlu1 %v747_v55, %s4716_s1  ;;  %v3334_v23 = vsel %vm3333_vm11, %v3269_v52, %v2688_v7  ;;  %v7934_v52 = vld [vmem:[#allocation182_spill] sm:$0xff]  ;;  %v7939_v51 = vld [vmem:[#allocation65_spill] sm:$0xff] }
 0x35c   :  { %2457 = vrot.lane.b32.xlu0 %v716_v61, %s4716_s1  ;;  %4500 = vmatprep.mubr.msk.f32.mxu0 %vm3409_vm12, %v3334_v23  ;;  %v3011_v61 = vsel %vm3008_vm6, %v2946_v49, %v5667_v20  ;;  %v4626_v20 = vld [vmem:[#allocation2 + $0x1d0] sm:$0xff]  ;;  %v7938_v23 = vld [vmem:[#allocation36_spill] sm:$0xff] }
 0x35d   :  { %v2752_v30 = vpop.permute.xlu1 %2751  ;;  %v2914_v24 = vsel %vm15_vm0, %v4626_v20, %v7938_v23  ;;  %v7948_v20 = vld [vmem:[#allocation8_spill] sm:$0xff] }
 0x35e   :  { %v3366_v31 = vsel %vm3333_vm11, %v3301_v39, %v2752_v30  ;;  %v2690_v13 = vpop.permute.xlu0 %2689 }
 0x35f   :  { %2521 = vrot.lane.b32.xlu1 %v748_v44, %s4716_s1  ;;  %4548 = vmatprep.mubr.msk.f32.mxu1 %vm3409_vm12, %v3366_v31  ;;  %v3335_v55 = vsel %vm3333_vm11, %v3270_v28, %v2690_v13  ;;  %v4625_v44 = vld [vmem:[#allocation2 + $0x20] sm:$0xff]  ;;  %v2979_v28 = vsel %vm2943_vm5, %v2914_v24, %v7940_v0 }
 0x360   :  { %2711 = vrot.lane.b32.xlu0 %v779_v4, %s4717_s20  ;;  %4501 = vmatmul.mubr.msk.f32.vlgmr.msra.gmra.mrb[0].mxu0 %vm3409_vm12, %v3335_v55  ;;  %v2882_v38 = vsel %vm15_vm0, %v4625_v44, %v7935_v63  ;;  %v718_v4 = vld [vmem:[#allocation2 + $0xe1] sm:$0xff] }
 0x361   :  { %v2754_v57 = vpop.permute.xlu1 %2753  ;;  %v2947_v31 = vsel %vm2943_vm5, %v2882_v38, %v7939_v51  ;;  %v7941_v13 = vld [vmem:[#allocation123_spill] sm:$0xff]  ;;  %v655_v38 = vld [vmem:[#allocation2 + $0xf0] sm:$0xff] }
 0x362   :  { %v3367_v15 = vsel %vm3333_vm11, %v3302_v56, %v2754_v57  ;;  %v2244_v25 = vpop.permute.xlu0 %2243  ;;  %v3012_v56 = vsel %vm3008_vm6, %v2947_v31, %v7941_v13  ;;  %v4628_v24 = vld [vmem:[#allocation2 + $0x1e0] sm:$0xff]  ;;  %v7949_v51 = vld [vmem:[#allocation37_spill] sm:$0xff]  ;;  %v7952_v13 = vld [vmem:[#allocation124_spill] sm:$0xff] }
 0x363   :  { %2775 = vrot.lane.b32.xlu1 %v6093_v50, %s4717_s20  ;;  %4549 = vmatmul.mubr.msk.f32.vlgmr.msra.gmra.mrb[0].mxu1 %vm3409_vm12, %v3367_v15  ;;  %v4624_v50 = vld [vmem:[#allocation2 + $0x1c8] sm:$0xff]  ;;  %v2915_v31 = vsel %vm15_vm0, %v4628_v24, %v7949_v51  ;;  %v7951_v0 = vld [vmem:[#allocation95_spill] sm:$0xff] }
 0x364   :  { %2713 = vrot.lane.b32.xlu0 %v780_v10, %s4717_s20  ;;  %v2913_v60 = vsel %vm15_vm0, %v4624_v50, %v5371_v5  ;;  %v3076_v5 = vsel %vm3073_vm7, %v3011_v61, %v7934_v52  ;;  %v750_v10 = vld [vmem:[#allocation2 + $0x291] sm:$0xff]  ;;  %v781_v61 = vld [vmem:[#allocation2 + $0xda] sm:$0xff] }
 0x365   :  { %v2246_v3 = vpop.permute.xlu1 %2245  ;;  %v2978_v35 = vsel %vm2943_vm5, %v2913_v60, %v5571_v34  ;;  %v7937_v34 = vld [vmem:[#allocation245_spill] sm:$0xff]  ;;  %v7964_v51 = vld [vmem:[#allocation215_spill] sm:$0xff] }
 0x366   :  { %v2436_v27 = vpop.permute.xlu0 %2435  ;;  %v3043_v54 = vsel %vm3008_vm6, %v2978_v35, %v7933_v21  ;;  %v3141_v30 = vsel %vm3138_vm8, %v3076_v5, %v7937_v34  ;;  %v7944_v60 = vld [vmem:[#allocation213_spill] sm:$0xff] }
 0x367   :  { %2777 = vrot.lane.b32.xlu1 %v6097_v48, %s4717_s20  ;;  %v717_v48 = vld [vmem:[#allocation2 + $0xd9] sm:$0xff]  ;;  %v3108_v39 = vsel %vm3073_vm7, %v3043_v54, %v7936_v2  ;;  %v3206_v19 = vsel %vm3203_vm9, %v3141_v30, %v6374_v45  ;;  %v4627_v30 = vld [vmem:[#allocation2 + $0x30] sm:$0xff] }
 0x368   :  { %2267 = vrot.lane.b32.xlu0 %v685_v43, %s4714_s11  ;;  %v3173_v32 = vsel %vm3138_vm8, %v3108_v39, %v6264_v33  ;;  %v3271_v57 = vsel %vm3268_vm10, %v3206_v19, %v2436_v27  ;;  %v7942_v43 = vld [vmem:[#allocation153_spill] sm:$0xff]  ;;  %v687_v39 = vld [vmem:[#allocation2 + $0x2a0] sm:$0xff]  ;;  %v2883_v23 = vsel %vm15_vm0, %v4627_v30, %v7948_v20 }
 0x369   :  { %v2500_v36 = vpop.permute.xlu1 %2499  ;;  %v3238_v55 = vsel %vm3203_vm9, %v3173_v32, %v2244_v25  ;;  %v3044_v33 = vsel %vm3008_vm6, %v2979_v28, %v7942_v43  ;;  %v7950_v32 = vld [vmem:[#allocation66_spill] sm:$0xff]  ;;  %v2980_v28 = vsel %vm2943_vm5, %v2915_v31, %v7951_v0  ;;  %v7954_v43 = vld [vmem:[#allocation184_spill] sm:$0xff]  ;;  %v7963_v30 = vld [vmem:[#allocation185_spill] sm:$0xff] }
 0x36a   :  { %v2438_v1 = vpop.permute.xlu0 %2437  ;;  %v3303_v40 = vsel %vm3268_vm10, %v3238_v55, %v2500_v36  ;;  %v3109_v49 = vsel %vm3073_vm7, %v3044_v33, %v7944_v60  ;;  %v2948_v19 = vsel %vm2943_vm5, %v2883_v23, %v7950_v32  ;;  %v7965_v32 = vld [vmem:[#allocation248_spill] sm:$0xff] }
 0x36b   :  { %2269 = vrot.lane.b32.xlu1 %v686_v53, %s4714_s11  ;;  %v7943_v53 = vld [vmem:[#allocation183_spill] sm:$0xff]  ;;  %v3174_v35 = vsel %vm3138_vm8, %v3109_v49, %v6266_v59 }
 0x36c   :  { %2459 = vrot.lane.b32.xlu0 %v717_v48, %s4716_s1  ;;  %v3077_v45 = vsel %vm3073_vm7, %v3012_v56, %v7943_v53  ;;  %v7945_v48 = vld [vmem:[#allocation246_spill] sm:$0xff]  ;;  %v3013_v56 = vsel %vm3008_vm6, %v2948_v19, %v7952_v13  ;;  %v7957_v49 = vld [vmem:[#allocation247_spill] sm:$0xff] }
 0x36d   :  { %v2502_v7 = vpop.permute.xlu1 %2501  ;;  %v3142_v25 = vsel %vm3138_vm8, %v3077_v45, %v7945_v48  ;;  %v3078_v33 = vsel %vm3073_vm7, %v3013_v56, %v7954_v43  ;;  %v4629_v45 = vld [vmem:[#allocation2 + $0x38] sm:$0xff]  ;;  %v752_v56 = vld [vmem:[#allocation2 + $0x2a9] sm:$0xff] }
 0x36e   :  { %v2692_v15 = vpop.permute.xlu0 %2691  ;;  %v3207_v36 = vsel %vm3203_vm9, %v3142_v25, %v6376_v9  ;;  %v7946_v9 = vld [vmem:[#allocation232_spill] sm:$0xff]  ;;  %v3143_v48 = vsel %vm3138_vm8, %v3078_v33, %v7957_v49  ;;  %v784_v33 = vld [vmem:[#allocation2 + $0xfa] sm:$0xff] }
 0x36f   :  { %2523 = vrot.lane.b32.xlu1 %v749_v58, %s4716_s1  ;;  %v3336_v46 = vsel %vm3333_vm11, %v3271_v57, %v2692_v15  ;;  %v3239_v58 = vsel %vm3203_vm9, %v3174_v35, %v2246_v3  ;;  %v3272_v21 = vsel %vm3268_vm10, %v3207_v36, %v2438_v1  ;;  %v782_v3 = vld [vmem:[#allocation2 + $0xe2] sm:$0xff]  ;;  %v7953_v15 = vld [vmem:[#allocation154_spill] sm:$0xff] }
 0x370   :  { %2461 = vrot.lane.b32.xlu0 %v718_v4, %s4716_s1  ;;  %4503 = vmatprep.mubr.msk.f32.mxu0 %vm3409_vm12, %v3336_v46  ;;  %v3304_v52 = vsel %vm3268_vm10, %v3239_v58, %v2502_v7  ;;  %v7947_v7 = vld [vmem:[#allocation234_spill] sm:$0xff]  ;;  %v688_v57 = vld [vmem:[#allocation2 + $0x2a8] sm:$0xff]  ;;  %v7959_v36 = vld [vmem:[#allocation67_spill] sm:$0xff] }
 0x371   :  { %v2756_v50 = vpop.permute.xlu1 %2755  ;;  %v656_v4 = vld [vmem:[#allocation2 + $0xf8] sm:$0xff]  ;;  %v4630_v25 = vld [vmem:[#allocation2 + $0x1e8] sm:$0xff] }
 0x372   :  { %v3368_v27 = vsel %vm3333_vm11, %v3303_v40, %v2756_v50  ;;  %v2694_v54 = vpop.permute.xlu0 %2693  ;;  %v7955_v40 = vld [vmem:[#allocation9_spill] sm:$0xff]  ;;  %v7956_v50 = vld [vmem:[#allocation214_spill] sm:$0xff]  ;;  %v7966_v43 = vld [vmem:[#allocation236_spill] sm:$0xff] }
 0x373   :  { %2525 = vrot.lane.b32.xlu1 %v750_v10, %s4716_s1  ;;  %4551 = vmatprep.mubr.msk.f32.mxu1 %vm3409_vm12, %v3368_v27  ;;  %v3337_v5 = vsel %vm3333_vm11, %v3272_v21, %v2694_v54  ;;  %v3045_v10 = vsel %vm3008_vm6, %v2980_v28, %v7953_v15  ;;  %v2884_v46 = vsel %vm15_vm0, %v4629_v45, %v7955_v40  ;;  %v7958_v27 = vld [vmem:[#allocation38_spill] sm:$0xff]  ;;  %v816_v45 = vld [vmem:[#allocation2 + $0x2aa] sm:$0xff] }
 0x374   :  { %2715 = vrot.lane.b32.xlu0 %v781_v61, %s4717_s20  ;;  %4504 = vmatmul.mubr.msk.f32.gmra.mrb[2].mxu0 %vm3409_vm12, %v3337_v5  ;;  %v3110_v60 = vsel %vm3073_vm7, %v3045_v10, %v7956_v50  ;;  %v2916_v35 = vsel %vm15_vm0, %v4630_v25, %v7958_v27  ;;  %v2949_v61 = vsel %vm2943_vm5, %v2884_v46, %v7959_v36  ;;  %v719_v54 = vld [vmem:[#allocation2 + $0xf1] sm:$0xff]  ;;  %v4631_v46 = vld [vmem:[#allocation2 + $0x48] sm:$0xff] }
 0x375   :  { %v2758_v44 = vpop.permute.xlu1 %2757  ;;  %v3175_v58 = vsel %vm3138_vm8, %v3110_v60, %v6271_v18  ;;  %v3208_v21 = vsel %vm3203_vm9, %v3143_v48, %v6380_v62  ;;  %v7967_v50 = vld [vmem:[#allocation10_spill] sm:$0xff]  ;;  %v7968_v48 = vld [vmem:[#allocation39_spill] sm:$0xff]  ;;  %v7969_v27 = vld [vmem:[#allocation68_spill] sm:$0xff] }
 0x376   :  { %v3369_v59 = vsel %vm3333_vm11, %v3304_v52, %v2758_v44  ;;  %v2248_v63 = vpop.permute.xlu0 %2247  ;;  %v7960_v52 = vld [vmem:[#allocation96_spill] sm:$0xff]  ;;  %v7961_v44 = vld [vmem:[#allocation125_spill] sm:$0xff]  ;;  %v2885_v60 = vsel %vm15_vm0, %v4631_v46, %v7967_v50  ;;  %v4632_v49 = vld [vmem:[#allocation2 + $0x1f8] sm:$0xff] }
 0x377   :  { %2779 = vrot.lane.b32.xlu1 %v7946_v9, %s4717_s20  ;;  %4552 = vmatmul.mubr.msk.f32.gmra.mrb[2].mxu1 %vm3409_vm12, %v3369_v59  ;;  %v2981_v5 = vsel %vm2943_vm5, %v2916_v35, %v7960_v52  ;;  %v3014_v59 = vsel %vm3008_vm6, %v2949_v61, %v7961_v44  ;;  %v3240_v9 = vsel %vm3203_vm9, %v3175_v58, %v2248_v63  ;;  %v657_v36 = vld [vmem:[#allocation2 + $0x108] sm:$0xff]  ;;  %v7970_v61 = vld [vmem:[#allocation97_spill] sm:$0xff] }
 0x378   :  { %2717 = vrot.lane.b32.xlu0 %v782_v3, %s4717_s20  ;;  %v3079_v62 = vsel %vm3073_vm7, %v3014_v59, %v7963_v30  ;;  %v2917_v25 = vsel %vm15_vm0, %v4632_v49, %v7968_v48  ;;  %v2950_v35 = vsel %vm2943_vm5, %v2885_v60, %v7969_v27  ;;  %v7972_v44 = vld [vmem:[#allocation156_spill] sm:$0xff]  ;;  %v7983_v46 = vld [vmem:[#allocation217_spill] sm:$0xff]  ;;  %v7984_v60 = vld [vmem:[#allocation250_spill] sm:$0xff] }
 0x379   :  { %v2250_v1 = vpop.permute.xlu1 %2249  ;;  %v3144_v63 = vsel %vm3138_vm8, %v3079_v62, %v7965_v32  ;;  %v2982_v58 = vsel %vm2943_vm5, %v2917_v25, %v7970_v61  ;;  %v7975_v30 = vld [vmem:[#allocation216_spill] sm:$0xff]  ;;  %v7978_v32 = vld [vmem:[#allocation69_spill] sm:$0xff] }
 0x37a   :  { %v2440_v2 = vpop.permute.xlu0 %2439  ;;  %v3047_v59 = vsel %vm3008_vm6, %v2982_v58, %v7972_v44  ;;  %v721_v48 = vld [vmem:[#allocation2 + $0x109] sm:$0xff] }
 0x37b   :  { %2781 = vrot.lane.b32.xlu1 %v7947_v7, %s4717_s20  ;;  %v3273_v3 = vsel %vm3268_vm10, %v3208_v21, %v2440_v2  ;;  %v7971_v21 = vld [vmem:[#allocation126_spill] sm:$0xff]  ;;  %v3112_v62 = vsel %vm3073_vm7, %v3047_v59, %v7975_v30 }
 0x37c   :  { %2207 = vrot.lane.b32.xlu0 %v655_v38, %s4714_s11  ;;  %v751_v38 = vld [vmem:[#allocation2 + $0x2a1] sm:$0xff] }
 0x37d   :  { %v2504_v34 = vpop.permute.xlu1 %2503  ;;  %v817_v59 = vld [vmem:[#allocation2 + $0x2ba] sm:$0xff] }
 0x37e   :  { %v2442_v55 = vpop.permute.xlu0 %2441  ;;  %v3305_v20 = vsel %vm3268_vm10, %v3240_v9, %v2504_v34  ;;  %v3209_v34 = vsel %vm3203_vm9, %v3144_v63, %v6382_v42  ;;  %v783_v42 = vld [vmem:[#allocation2 + $0xf2] sm:$0xff] }
 0x37f   :  { %2271 = vrot.lane.b32.xlu1 %v687_v39, %s4714_s11  ;;  %v7962_v39 = vld [vmem:[#allocation155_spill] sm:$0xff]  ;;  %v3274_v28 = vsel %vm3268_vm10, %v3209_v34, %v2442_v55  ;;  %v7973_v9 = vld [vmem:[#allocation186_spill] sm:$0xff]  ;;  %v658_v34 = vld [vmem:[#allocation2 + $0x110] sm:$0xff] }
 0x380   :  { %2209 = vrot.lane.b32.xlu0 %v656_v4, %s4714_s11  ;;  %v3046_v18 = vsel %vm3008_vm6, %v2981_v5, %v7962_v39  ;;  %v720_v4 = vld [vmem:[#allocation2 + $0xf9] sm:$0xff] }
 0x381   :  { %v2506_v53 = vpop.permute.xlu1 %2505  ;;  %v3111_v31 = vsel %vm3073_vm7, %v3046_v18, %v7964_v51  ;;  %v689_v5 = vld [vmem:[#allocation2 + $0x2b8] sm:$0xff]  ;;  %v7974_v39 = vld [vmem:[#allocation11_spill] sm:$0xff]  ;;  %v7977_v51 = vld [vmem:[#allocation40_spill] sm:$0xff] }
 0x382   :  { %v2696_v7 = vpop.permute.xlu0 %2695  ;;  %v3176_v19 = vsel %vm3138_vm8, %v3111_v31, %v6273_v47 }
 0x383   :  { %2273 = vrot.lane.b32.xlu1 %v688_v57, %s4714_s11  ;;  %v3338_v23 = vsel %vm3333_vm11, %v3273_v3, %v2696_v7  ;;  %v3241_v0 = vsel %vm3203_vm9, %v3176_v19, %v2250_v1 }
 0x384   :  { %2463 = vrot.lane.b32.xlu0 %v719_v54, %s4716_s1  ;;  %4506 = vmatprep.mubr.msk.f32.mxu0 %vm3409_vm12, %v3338_v23  ;;  %v3306_v57 = vsel %vm3268_vm10, %v3241_v0, %v2506_v53  ;;  %v3015_v54 = vsel %vm3008_vm6, %v2950_v35, %v7971_v21 }
 0x385   :  { %v2760_v24 = vpop.permute.xlu1 %2759  ;;  %v3080_v3 = vsel %vm3073_vm7, %v3015_v54, %v7973_v9  ;;  %v754_v54 = vld [vmem:[#allocation2 + $0x2c1] sm:$0xff] }
 0x386   :  { %v3370_v2 = vsel %vm3333_vm11, %v3305_v20, %v2760_v24  ;;  %v2698_v13 = vpop.permute.xlu0 %2697  ;;  %v7976_v20 = vld [vmem:[#allocation249_spill] sm:$0xff]  ;;  %v4634_v24 = vld [vmem:[#allocation2 + $0x200] sm:$0xff] }
 0x387   :  { %2527 = vrot.lane.b32.xlu1 %v751_v38, %s4716_s1  ;;  %4554 = vmatprep.mubr.msk.f32.mxu1 %vm3409_vm12, %v3370_v2  ;;  %v3339_v15 = vsel %vm3333_vm11, %v3274_v28, %v2698_v13  ;;  %v4633_v38 = vld [vmem:[#allocation2 + $0x50] sm:$0xff]  ;;  %v3145_v23 = vsel %vm3138_vm8, %v3080_v3, %v7976_v20  ;;  %v2918_v31 = vsel %vm15_vm0, %v4634_v24, %v7977_v51  ;;  %v7980_v28 = vld [vmem:[#allocation127_spill] sm:$0xff] }
 0x388   :  { %2465 = vrot.lane.b32.xlu0 %v720_v4, %s4716_s1  ;;  %4507 = vmatmul.mubr.msk.f32.gmra.mrb[4].mxu0 %vm3409_vm12, %v3339_v15  ;;  %v2886_v18 = vsel %vm15_vm0, %v4633_v38, %v7974_v39  ;;  %v3177_v2 = vsel %vm3138_vm8, %v3112_v62, %v6278_v16  ;;  %v3210_v19 = vsel %vm3203_vm9, %v3145_v23, %v6388_v17  ;;  %v7979_v4 = vld [vmem:[#allocation98_spill] sm:$0xff]  ;;  %v4635_v3 = vld [vmem:[#allocation2 + $0x60] sm:$0xff]  ;;  %v4636_v39 = vld [vmem:[#allocation2 + $0x210] sm:$0xff] }
 0x389   :  { %v2762_v10 = vpop.permute.xlu1 %2761  ;;  %v2951_v63 = vsel %vm2943_vm5, %v2886_v18, %v7978_v32  ;;  %v2983_v0 = vsel %vm2943_vm5, %v2918_v31, %v7979_v4  ;;  %v7986_v18 = vld [vmem:[#allocation41_spill] sm:$0xff]  ;;  %v7987_v62 = vld [vmem:[#allocation70_spill] sm:$0xff]  ;;  %v7988_v24 = vld [vmem:[#allocation99_spill] sm:$0xff] }
 0x38a   :  { %v3371_v47 = vsel %vm3333_vm11, %v3306_v57, %v2762_v10  ;;  %v2252_v1 = vpop.permute.xlu0 %2251  ;;  %v3016_v13 = vsel %vm3008_vm6, %v2951_v63, %v7980_v28  ;;  %v690_v10 = vld [vmem:[#allocation2 + $0x2c0] sm:$0xff]  ;;  %v2919_v30 = vsel %vm15_vm0, %v4636_v39, %v7986_v18  ;;  %v786_v23 = vld [vmem:[#allocation2 + $0x112] sm:$0xff]  ;;  %v7989_v31 = vld [vmem:[#allocation128_spill] sm:$0xff] }
 0x38b   :  { %2529 = vrot.lane.b32.xlu1 %v752_v56, %s4716_s1  ;;  %4555 = vmatmul.mubr.msk.f32.gmra.mrb[4].mxu1 %vm3409_vm12, %v3371_v47  ;;  %v3242_v56 = vsel %vm3203_vm9, %v3177_v2, %v2252_v1  ;;  %v7981_v47 = vld [vmem:[#allocation157_spill] sm:$0xff]  ;;  %v2984_v51 = vsel %vm2943_vm5, %v2919_v30, %v7988_v24  ;;  %v818_v2 = vld [vmem:[#allocation2 + $0x2c2] sm:$0xff]  ;;  %v692_v18 = vld [vmem:[#allocation2 + $0x2d8] sm:$0xff] }
 0x38c   :  { %2719 = vrot.lane.b32.xlu0 %v783_v42, %s4717_s20  ;;  %v3048_v16 = vsel %vm3008_vm6, %v2983_v0, %v7981_v47  ;;  %v7982_v42 = vld [vmem:[#allocation187_spill] sm:$0xff]  ;;  %v7991_v4 = vld [vmem:[#allocation188_spill] sm:$0xff] }
 0x38d   :  { %v2254_v55 = vpop.permute.xlu1 %2253  ;;  %v3081_v17 = vsel %vm3073_vm7, %v3016_v13, %v7982_v42  ;;  %v3113_v50 = vsel %vm3073_vm7, %v3048_v16, %v7983_v46  ;;  %v4637_v13 = vld [vmem:[#allocation2 + $0x68] sm:$0xff]  ;;  %v7994_v47 = vld [vmem:[#allocation251_spill] sm:$0xff]  ;;  %v4638_v42 = vld [vmem:[#allocation2 + $0x218] sm:$0xff] }
 0x38e   :  { %v2444_v53 = vpop.permute.xlu0 %2443  ;;  %v3146_v1 = vsel %vm3138_vm8, %v3081_v17, %v7984_v60  ;;  %v3178_v49 = vsel %vm3138_vm8, %v3113_v50, %v6280_v11  ;;  %v7995_v17 = vld [vmem:[#allocation42_spill] sm:$0xff]  ;;  %v659_v60 = vld [vmem:[#allocation2 + $0x120] sm:$0xff] }
 0x38f   :  { %2783 = vrot.lane.b32.xlu1 %v7966_v43, %s4717_s20  ;;  %v3275_v57 = vsel %vm3268_vm10, %v3210_v19, %v2444_v53  ;;  %v3243_v25 = vsel %vm3203_vm9, %v3178_v49, %v2254_v55  ;;  %v7990_v19 = vld [vmem:[#allocation158_spill] sm:$0xff]  ;;  %v7998_v49 = vld [vmem:[#allocation129_spill] sm:$0xff] }
 0x390   :  { %2721 = vrot.lane.b32.xlu0 %v784_v33, %s4717_s20 }
 0x391   :  { %v2508_v40 = vpop.permute.xlu1 %2507 }
 0x392   :  { %v2446_v52 = vpop.permute.xlu0 %2445  ;;  %v3307_v43 = vsel %vm3268_vm10, %v3242_v56, %v2508_v40  ;;  %v3211_v40 = vsel %vm3203_vm9, %v3146_v1, %v6390_v12  ;;  %v722_v12 = vld [vmem:[#allocation2 + $0x111] sm:$0xff]  ;;  %v7997_v1 = vld [vmem:[#allocation100_spill] sm:$0xff] }
 0x393   :  { %2785 = vrot.lane.b32.xlu1 %v816_v45, %s4717_s20  ;;  %v3276_v27 = vsel %vm3268_vm10, %v3211_v40, %v2446_v52  ;;  %v7992_v56 = vld [vmem:[#allocation13_spill] sm:$0xff] }
 0x394   :  { %2211 = vrot.lane.b32.xlu0 %v657_v36, %s4714_s11  ;;  %v753_v36 = vld [vmem:[#allocation2 + $0x2b9] sm:$0xff] }
 0x395   :  { %v2510_v7 = vpop.permute.xlu1 %2509 }
 0x396   :  { %v2700_v15 = vpop.permute.xlu0 %2699  ;;  %v3308_v61 = vsel %vm3268_vm10, %v3243_v25, %v2510_v7  ;;  %v7985_v7 = vld [vmem:[#allocation12_spill] sm:$0xff] }
 0x397   :  { %2275 = vrot.lane.b32.xlu1 %v689_v5, %s4714_s11  ;;  %v3340_v33 = vsel %vm3333_vm11, %v3275_v57, %v2700_v15  ;;  %v785_v5 = vld [vmem:[#allocation2 + $0x10a] sm:$0xff]  ;;  %v2887_v38 = vsel %vm15_vm0, %v4635_v3, %v7985_v7  ;;  %v2888_v57 = vsel %vm15_vm0, %v4637_v13, %v7992_v56  ;;  %v7993_v15 = vld [vmem:[#allocation218_spill] sm:$0xff] }
 0x398   :  { %2213 = vrot.lane.b32.xlu0 %v658_v34, %s4714_s11  ;;  %4509 = vmatprep.mubr.msk.f32.mxu0 %vm3409_vm12, %v3340_v33  ;;  %v2952_v20 = vsel %vm2943_vm5, %v2887_v38, %v7987_v62  ;;  %v3049_v34 = vsel %vm3008_vm6, %v2984_v51, %v7990_v19  ;;  %v7996_v33 = vld [vmem:[#allocation71_spill] sm:$0xff]  ;;  %v660_v3 = vld [vmem:[#allocation2 + $0x128] sm:$0xff]  ;;  %v8003_v19 = vld [vmem:[#allocation14_spill] sm:$0xff] }
 0x399   :  { %v2764_v45 = vpop.permute.xlu1 %2763  ;;  %v3017_v32 = vsel %vm3008_vm6, %v2952_v20, %v7989_v31  ;;  %v724_v51 = vld [vmem:[#allocation2 + $0x129] sm:$0xff] }
 0x39a   :  { %v3372_v53 = vsel %vm3333_vm11, %v3307_v43, %v2764_v45  ;;  %v2702_v35 = vpop.permute.xlu0 %2701  ;;  %v3082_v0 = vsel %vm3073_vm7, %v3017_v32, %v7991_v4  ;;  %v2920_v43 = vsel %vm15_vm0, %v4638_v42, %v7995_v17  ;;  %v2953_v45 = vsel %vm2943_vm5, %v2888_v57, %v7996_v33  ;;  %v756_v32 = vld [vmem:[#allocation2 + $0x2d9] sm:$0xff]  ;;  %v4640_v4 = vld [vmem:[#allocation2 + $0x228] sm:$0xff] }
 0x39b   :  { %2277 = vrot.lane.b32.xlu1 %v690_v10, %s4714_s11  ;;  %4557 = vmatprep.mubr.msk.f32.mxu1 %vm3409_vm12, %v3372_v53  ;;  %v3341_v58 = vsel %vm3333_vm11, %v3276_v27, %v2702_v35  ;;  %v3114_v10 = vsel %vm3073_vm7, %v3049_v34, %v7993_v15  ;;  %v3147_v16 = vsel %vm3138_vm8, %v3082_v0, %v7994_v47  ;;  %v691_v35 = vld [vmem:[#allocation2 + $0x2d0] sm:$0xff]  ;;  %v8004_v0 = vld [vmem:[#allocation43_spill] sm:$0xff]  ;;  %v8005_v13 = vld [vmem:[#allocation72_spill] sm:$0xff] }
 0x39c   :  { %2467 = vrot.lane.b32.xlu0 %v721_v48, %s4716_s1  ;;  %4510 = vmatmul.mubr.msk.f32.gmra.mrb[6].mxu0 %vm3409_vm12, %v3341_v58  ;;  %v3179_v46 = vsel %vm3138_vm8, %v3114_v10, %v6286_v14  ;;  %v3212_v50 = vsel %vm3203_vm9, %v3147_v16, %v6396_v6  ;;  %v2985_v53 = vsel %vm2943_vm5, %v2920_v43, %v7997_v1  ;;  %v787_v57 = vld [vmem:[#allocation2 + $0x122] sm:$0xff]  ;;  %v8006_v15 = vld [vmem:[#allocation101_spill] sm:$0xff]  ;;  %v8007_v47 = vld [vmem:[#allocation130_spill] sm:$0xff] }
 0x39d   :  { %v2766_v21 = vpop.permute.xlu1 %2765  ;;  %v3018_v40 = vsel %vm3008_vm6, %v2953_v45, %v7998_v49  ;;  %v819_v17 = vld [vmem:[#allocation2 + $0x2d2] sm:$0xff]  ;;  %v8008_v43 = vld [vmem:[#allocation160_spill] sm:$0xff]  ;;  %v8010_v1 = vld [vmem:[#allocation15_spill] sm:$0xff] }
 0x39e   :  { %v3373_v11 = vsel %vm3333_vm11, %v3308_v61, %v2766_v21  ;;  %v2256_v55 = vpop.permute.xlu0 %2255  ;;  %v8000_v61 = vld [vmem:[#allocation189_spill] sm:$0xff]  ;;  %v8009_v45 = vld [vmem:[#allocation190_spill] sm:$0xff]  ;;  %v8011_v49 = vld [vmem:[#allocation220_spill] sm:$0xff] }
 0x39f   :  { %2531 = vrot.lane.b32.xlu1 %v753_v36, %s4716_s1  ;;  %4558 = vmatmul.mubr.msk.f32.gmra.mrb[6].mxu1 %vm3409_vm12, %v3373_v11  ;;  %v3244_v48 = vsel %vm3203_vm9, %v3179_v46, %v2256_v55  ;;  %v7999_v36 = vld [vmem:[#allocation159_spill] sm:$0xff]  ;;  %v3083_v6 = vsel %vm3073_vm7, %v3018_v40, %v8000_v61 }
 0x3a0   :  { %2469 = vrot.lane.b32.xlu0 %v722_v12, %s4716_s1  ;;  %v3050_v14 = vsel %vm3008_vm6, %v2985_v53, %v7999_v36  ;;  %v8001_v12 = vld [vmem:[#allocation219_spill] sm:$0xff] }
 0x3a1   :  { %v2258_v52 = vpop.permute.xlu1 %2257 }
 0x3a2   :  { %v2448_v44 = vpop.permute.xlu0 %2447 }
 0x3a3   :  { %2533 = vrot.lane.b32.xlu1 %v754_v54, %s4716_s1  ;;  %v3277_v25 = vsel %vm3268_vm10, %v3212_v50, %v2448_v44  ;;  %v3115_v54 = vsel %vm3073_vm7, %v3050_v14, %v8001_v12  ;;  %v8014_v14 = vld [vmem:[#allocation73_spill] sm:$0xff] }
 0x3a4   :  { %2723 = vrot.lane.b32.xlu0 %v785_v5, %s4717_s20  ;;  %v8002_v5 = vld [vmem:[#allocation252_spill] sm:$0xff] }
 0x3a5   :  { %v2512_v9 = vpop.permute.xlu1 %2511  ;;  %v3148_v55 = vsel %vm3138_vm8, %v3083_v6, %v8002_v5 }
 0x3a6   :  { %v2450_v63 = vpop.permute.xlu0 %2449  ;;  %v3309_v58 = vsel %vm3268_vm10, %v3244_v48, %v2512_v9  ;;  %v3213_v9 = vsel %vm3203_vm9, %v3148_v55, %v6398_v37  ;;  %v723_v37 = vld [vmem:[#allocation2 + $0x121] sm:$0xff]  ;;  %v8012_v48 = vld [vmem:[#allocation253_spill] sm:$0xff] }
 0x3a7   :  { %2787 = vrot.lane.b32.xlu1 %v817_v59, %s4717_s20  ;;  %v3180_v59 = vsel %vm3138_vm8, %v3115_v54, %v6288_v41  ;;  %v3278_v38 = vsel %vm3268_vm10, %v3213_v9, %v2450_v63  ;;  %v8016_v54 = vld [vmem:[#allocation131_spill] sm:$0xff] }
 0x3a8   :  { %2725 = vrot.lane.b32.xlu0 %v786_v23, %s4717_s20  ;;  %v3245_v7 = vsel %vm3203_vm9, %v3180_v59, %v2258_v52  ;;  %v755_v23 = vld [vmem:[#allocation2 + $0x2d1] sm:$0xff]  ;;  %v820_v9 = vld [vmem:[#allocation2 + $0x2da] sm:$0xff] }
 0x3a9   :  { %v2514_v28 = vpop.permute.xlu1 %2513 }
 0x3aa   :  { %v2704_v27 = vpop.permute.xlu0 %2703  ;;  %v3310_v30 = vsel %vm3268_vm10, %v3245_v7, %v2514_v28  ;;  %v2921_v28 = vsel %vm15_vm0, %v4640_v4, %v8004_v0  ;;  %v8018_v7 = vld [vmem:[#allocation191_spill] sm:$0xff]  ;;  %v694_v0 = vld [vmem:[#allocation2 + $0x2f0] sm:$0xff] }
 0x3ab   :  { %2789 = vrot.lane.b32.xlu1 %v818_v2, %s4717_s20  ;;  %v3342_v21 = vsel %vm3333_vm11, %v3277_v25, %v2704_v27  ;;  %v4639_v2 = vld [vmem:[#allocation2 + $0x78] sm:$0xff]  ;;  %v2986_v10 = vsel %vm2943_vm5, %v2921_v28, %v8006_v15  ;;  %v4642_v27 = vld [vmem:[#allocation2 + $0x230] sm:$0xff] }
 0x3ac   :  { %2215 = vrot.lane.b32.xlu0 %v659_v60, %s4714_s11  ;;  %4512 = vmatprep.mubr.msk.f32.mxu0 %vm3409_vm12, %v3342_v21  ;;  %v2889_v34 = vsel %vm15_vm0, %v4639_v2, %v8003_v19  ;;  %v3051_v33 = vsel %vm3008_vm6, %v2986_v10, %v8008_v43  ;;  %v4641_v60 = vld [vmem:[#allocation2 + $0x80] sm:$0xff]  ;;  %v788_v21 = vld [vmem:[#allocation2 + $0x12a] sm:$0xff] }
 0x3ad   :  { %v2768_v11 = vpop.permute.xlu1 %2767  ;;  %v2954_v56 = vsel %vm2943_vm5, %v2889_v34, %v8005_v13  ;;  %v2890_v53 = vsel %vm15_vm0, %v4641_v60, %v8010_v1  ;;  %v3116_v40 = vsel %vm3073_vm7, %v3051_v33, %v8011_v49  ;;  %v693_v2 = vld [vmem:[#allocation2 + $0x2e8] sm:$0xff]  ;;  %v725_v13 = vld [vmem:[#allocation2 + $0x139] sm:$0xff]  ;;  %v4643_v10 = vld [vmem:[#allocation2 + $0x90] sm:$0xff] }
 0x3ae   :  { %v3374_v44 = vsel %vm3333_vm11, %v3309_v58, %v2768_v11  ;;  %v2706_v39 = vpop.permute.xlu0 %2705  ;;  %v3019_v16 = vsel %vm3008_vm6, %v2954_v56, %v8007_v47  ;;  %v2955_v61 = vsel %vm2943_vm5, %v2890_v53, %v8014_v14  ;;  %v3181_v6 = vsel %vm3138_vm8, %v3116_v40, %v6294_v26  ;;  %v8015_v11 = vld [vmem:[#allocation102_spill] sm:$0xff]  ;;  %v8021_v47 = vld [vmem:[#allocation16_spill] sm:$0xff] }
 0x3af   :  { %2279 = vrot.lane.b32.xlu1 %v691_v35, %s4714_s11  ;;  %4560 = vmatprep.mubr.msk.f32.mxu1 %vm3409_vm12, %v3374_v44  ;;  %v3343_v62 = vsel %vm3333_vm11, %v3278_v38, %v2706_v39  ;;  %v3084_v46 = vsel %vm3073_vm7, %v3019_v16, %v8009_v45  ;;  %v8013_v35 = vld [vmem:[#allocation44_spill] sm:$0xff]  ;;  %v3020_v5 = vsel %vm3008_vm6, %v2955_v61, %v8016_v54  ;;  %v8023_v33 = vld [vmem:[#allocation74_spill] sm:$0xff]  ;;  %v8028_v61 = vld [vmem:[#allocation17_spill] sm:$0xff] }
 0x3b0   :  { %2217 = vrot.lane.b32.xlu0 %v660_v3, %s4714_s11  ;;  %4513 = vmatmul.mubr.msk.f32.gmra.mrb[8].mxu0 %vm3409_vm12, %v3343_v62  ;;  %v3149_v25 = vsel %vm3138_vm8, %v3084_v46, %v8012_v48  ;;  %v2922_v36 = vsel %vm15_vm0, %v4642_v27, %v8013_v35  ;;  %v8017_v3 = vld [vmem:[#allocation161_spill] sm:$0xff]  ;;  %v2891_v16 = vsel %vm15_vm0, %v4643_v10, %v8021_v47  ;;  %v726_v46 = vld [vmem:[#allocation2 + $0x141] sm:$0xff]  ;;  %v8026_v48 = vld [vmem:[#allocation162_spill] sm:$0xff] }
 0x3b1   :  { %v2770_v20 = vpop.permute.xlu1 %2769  ;;  %v3214_v58 = vsel %vm3203_vm9, %v3149_v25, %v6402_v8  ;;  %v2987_v12 = vsel %vm2943_vm5, %v2922_v36, %v8015_v11  ;;  %v3085_v8 = vsel %vm3073_vm7, %v3020_v5, %v8018_v7  ;;  %v2956_v45 = vsel %vm2943_vm5, %v2891_v16, %v8023_v33  ;;  %v8025_v1 = vld [vmem:[#allocation132_spill] sm:$0xff]  ;;  %v758_v40 = vld [vmem:[#allocation2 + $0x2f1] sm:$0xff]  ;;  %v8030_v11 = vld [vmem:[#allocation255_spill] sm:$0xff] }
 0x3b2   :  { %v3375_v41 = vsel %vm3333_vm11, %v3310_v30, %v2770_v20  ;;  %v2260_v52 = vpop.permute.xlu0 %2259  ;;  %v3052_v26 = vsel %vm3008_vm6, %v2987_v12, %v8017_v3  ;;  %v8019_v30 = vld [vmem:[#allocation221_spill] sm:$0xff]  ;;  %v8020_v20 = vld [vmem:[#allocation254_spill] sm:$0xff]  ;;  %v3021_v53 = vsel %vm3008_vm6, %v2956_v45, %v8025_v1  ;;  %v8027_v27 = vld [vmem:[#allocation192_spill] sm:$0xff] }
 0x3b3   :  { %2281 = vrot.lane.b32.xlu1 %v692_v18, %s4714_s11  ;;  %4561 = vmatmul.mubr.msk.f32.gmra.mrb[8].mxu1 %vm3409_vm12, %v3375_v41  ;;  %v3246_v55 = vsel %vm3203_vm9, %v3181_v6, %v2260_v52  ;;  %v3117_v62 = vsel %vm3073_vm7, %v3052_v26, %v8019_v30  ;;  %v3150_v41 = vsel %vm3138_vm8, %v3085_v8, %v8020_v20  ;;  %v4645_v14 = vld [vmem:[#allocation2 + $0x98] sm:$0xff]  ;;  %v4646_v54 = vld [vmem:[#allocation2 + $0x248] sm:$0xff]  ;;  %v8034_v26 = vld [vmem:[#allocation295_spill] sm:$0xff] }
 0x3b4   :  { %2471 = vrot.lane.b32.xlu0 %v723_v37, %s4716_s1  ;;  %v3182_v52 = vsel %vm3138_vm8, %v3117_v62, %v6296_v29  ;;  %v3086_v35 = vsel %vm3073_vm7, %v3021_v53, %v8027_v27  ;;  %v2892_v6 = vsel %vm15_vm0, %v4645_v14, %v8028_v61  ;;  %v8031_v5 = vld [vmem:[#allocation46_spill] sm:$0xff]  ;;  %v696_v53 = vld [vmem:[#allocation2 + $0x308] sm:$0xff] }
 0x3b5   :  { %v2262_v24 = vpop.permute.xlu1 %2261  ;;  %v3151_v12 = vsel %vm3138_vm8, %v3086_v35, %v8030_v11  ;;  %v789_v8 = vld [vmem:[#allocation2 + $0x13a] sm:$0xff]  ;;  %v822_v16 = vld [vmem:[#allocation2 + $0x2f2] sm:$0xff]  ;;  %v8045_v14 = vld [vmem:[#allocation76_spill] sm:$0xff] }
 0x3b6   :  { %v2452_v31 = vpop.permute.xlu0 %2451  ;;  %v3216_v7 = vsel %vm3203_vm9, %v3151_v12, %v8034_v26  ;;  %v4648_v27 = vld [vmem:[#allocation2 + $0x258] sm:$0xff]  ;;  %v8044_v35 = vld [vmem:[#allocation47_spill] sm:$0xff]  ;;  %v4649_v26 = vld [vmem:[#allocation2 + $0xb0] sm:$0xff] }
 0x3b7   :  { %2535 = vrot.lane.b32.xlu1 %v755_v23, %s4716_s1  ;;  %v3279_v44 = vsel %vm3268_vm10, %v3214_v58, %v2452_v31  ;;  %v3215_v23 = vsel %vm3203_vm9, %v3150_v41, %v6404_v22  ;;  %v3247_v31 = vsel %vm3203_vm9, %v3182_v52, %v2262_v24  ;;  %v662_v22 = vld [vmem:[#allocation2 + $0x140] sm:$0xff]  ;;  %v8029_v58 = vld [vmem:[#allocation222_spill] sm:$0xff] }
 0x3b8   :  { %2473 = vrot.lane.b32.xlu0 %v724_v51, %s4716_s1  ;;  %v661_v51 = vld [vmem:[#allocation2 + $0x138] sm:$0xff]  ;;  %v8037_v52 = vld [vmem:[#allocation163_spill] sm:$0xff] }
 0x3b9   :  { %v2516_v63 = vpop.permute.xlu1 %2515  ;;  %v8047_v11 = vld [vmem:[#allocation134_spill] sm:$0xff] }
 0x3ba   :  { %v2454_v42 = vpop.permute.xlu0 %2453  ;;  %v3311_v38 = vsel %vm3268_vm10, %v3246_v55, %v2516_v63  ;;  %v2924_v55 = vsel %vm15_vm0, %v4646_v54, %v8031_v5  ;;  %v759_v5 = vld [vmem:[#allocation2 + $0x301] sm:$0xff] }
 0x3bb   :  { %2537 = vrot.lane.b32.xlu1 %v756_v32, %s4716_s1  ;;  %v3280_v32 = vsel %vm3268_vm10, %v3215_v23, %v2454_v42  ;;  %v4644_v42 = vld [vmem:[#allocation2 + $0x240] sm:$0xff] }
 0x3bc   :  { %2727 = vrot.lane.b32.xlu0 %v787_v57, %s4717_s20  ;;  %v757_v57 = vld [vmem:[#allocation2 + $0x2e9] sm:$0xff] }
 0x3bd   :  { %v2518_v50 = vpop.permute.xlu1 %2517 }
 0x3be   :  { %v2708_v59 = vpop.permute.xlu0 %2707  ;;  %v3312_v19 = vsel %vm3268_vm10, %v3247_v31, %v2518_v50  ;;  %v8024_v50 = vld [vmem:[#allocation103_spill] sm:$0xff] }
 0x3bf   :  { %2791 = vrot.lane.b32.xlu1 %v819_v17, %s4717_s20  ;;  %v3344_v39 = vsel %vm3333_vm11, %v3279_v44, %v2708_v59  ;;  %v8022_v17 = vld [vmem:[#allocation45_spill] sm:$0xff]  ;;  %v8032_v44 = vld [vmem:[#allocation75_spill] sm:$0xff] }
 0x3c0   :  { %2729 = vrot.lane.b32.xlu0 %v788_v21, %s4717_s20  ;;  %4515 = vmatprep.mubr.msk.f32.mxu0 %vm3409_vm12, %v3344_v39  ;;  %v2923_v43 = vsel %vm15_vm0, %v4644_v42, %v8022_v17  ;;  %v2957_v59 = vsel %vm2943_vm5, %v2892_v6, %v8032_v44  ;;  %v727_v6 = vld [vmem:[#allocation2 + $0x151] sm:$0xff] }
 0x3c1   :  { %v2772_v18 = vpop.permute.xlu1 %2771  ;;  %v2988_v60 = vsel %vm2943_vm5, %v2923_v43, %v8024_v50 }
 0x3c2   :  { %v3376_v37 = vsel %vm3333_vm11, %v3311_v38, %v2772_v18  ;;  %v2710_v63 = vpop.permute.xlu0 %2709  ;;  %v3053_v25 = vsel %vm3008_vm6, %v2988_v60, %v8026_v48  ;;  %v8035_v38 = vld [vmem:[#allocation104_spill] sm:$0xff]  ;;  %v8036_v18 = vld [vmem:[#allocation133_spill] sm:$0xff]  ;;  %v664_v60 = vld [vmem:[#allocation2 + $0x158] sm:$0xff] }
 0x3c3   :  { %2793 = vrot.lane.b32.xlu1 %v820_v9, %s4717_s20  ;;  %4563 = vmatprep.mubr.msk.f32.mxu1 %vm3409_vm12, %v3376_v37  ;;  %v3345_v34 = vsel %vm3333_vm11, %v3280_v32, %v2710_v63  ;;  %v3118_v21 = vsel %vm3073_vm7, %v3053_v25, %v8029_v58  ;;  %v8033_v9 = vld [vmem:[#allocation275_spill] sm:$0xff]  ;;  %v2989_v39 = vsel %vm2943_vm5, %v2924_v55, %v8035_v38  ;;  %v821_v37 = vld [vmem:[#allocation2 + $0x2ea] sm:$0xff]  ;;  %v8043_v48 = vld [vmem:[#allocation18_spill] sm:$0xff] }
 0x3c4   :  { %2219 = vrot.lane.b32.xlu0 %v661_v51, %s4714_s11  ;;  %4516 = vmatmul.mubr.msk.f32.gmra.mrb[10].mxu0 %vm3409_vm12, %v3345_v34  ;;  %v3183_v3 = vsel %vm3138_vm8, %v3118_v21, %v8033_v9  ;;  %v3022_v30 = vsel %vm3008_vm6, %v2957_v59, %v8036_v18  ;;  %v3054_v23 = vsel %vm3008_vm6, %v2989_v39, %v8037_v52  ;;  %v8038_v51 = vld [vmem:[#allocation193_spill] sm:$0xff]  ;;  %v8048_v55 = vld [vmem:[#allocation164_spill] sm:$0xff]  ;;  %v8049_v59 = vld [vmem:[#allocation194_spill] sm:$0xff] }
 0x3c5   :  { %v2774_v4 = vpop.permute.xlu1 %2773  ;;  %v3087_v31 = vsel %vm3073_vm7, %v3022_v30, %v8038_v51  ;;  %v8046_v58 = vld [vmem:[#allocation105_spill] sm:$0xff]  ;;  %v8051_v38 = vld [vmem:[#allocation224_spill] sm:$0xff] }
 0x3c6   :  { %v3377_v29 = vsel %vm3333_vm11, %v3312_v19, %v2774_v4  ;;  %v2264_v24 = vpop.permute.xlu0 %2263  ;;  %v8039_v19 = vld [vmem:[#allocation223_spill] sm:$0xff]  ;;  %v8040_v4 = vld [vmem:[#allocation256_spill] sm:$0xff]  ;;  %v8052_v18 = vld [vmem:[#allocation257_spill] sm:$0xff] }
 0x3c7   :  { %2283 = vrot.lane.b32.xlu1 %v693_v2, %s4714_s11  ;;  %4564 = vmatmul.mubr.msk.f32.gmra.mrb[10].mxu1 %vm3409_vm12, %v3377_v29  ;;  %v3248_v62 = vsel %vm3203_vm9, %v3183_v3, %v2264_v24  ;;  %v3119_v34 = vsel %vm3073_vm7, %v3054_v23, %v8039_v19  ;;  %v3152_v29 = vsel %vm3138_vm8, %v3087_v31, %v8040_v4  ;;  %v8041_v24 = vld [vmem:[#allocation276_spill] sm:$0xff]  ;;  %v8055_v23 = vld [vmem:[#allocation277_spill] sm:$0xff] }
 0x3c8   :  { %2221 = vrot.lane.b32.xlu0 %v662_v22, %s4714_s11  ;;  %v8056_v31 = vld [vmem:[#allocation297_spill] sm:$0xff] }
 0x3c9   :  { %v2266_v28 = vpop.permute.xlu1 %2265 }
 0x3ca   :  { %v2456_v56 = vpop.permute.xlu0 %2455 }
 0x3cb   :  { %2285 = vrot.lane.b32.xlu1 %v694_v0, %s4714_s11  ;;  %v3281_v20 = vsel %vm3268_vm10, %v3216_v7, %v2456_v56  ;;  %v3184_v0 = vsel %vm3138_vm8, %v3119_v34, %v8041_v24  ;;  %v8050_v7 = vld [vmem:[#allocation19_spill] sm:$0xff] }
 0x3cc   :  { %2475 = vrot.lane.b32.xlu0 %v725_v13, %s4716_s1  ;;  %v8042_v13 = vld [vmem:[#allocation296_spill] sm:$0xff]  ;;  %v8058_v34 = vld [vmem:[#allocation135_spill] sm:$0xff] }
 0x3cd   :  { %v2520_v15 = vpop.permute.xlu1 %2519  ;;  %v3217_v56 = vsel %vm3203_vm9, %v3152_v29, %v8042_v13  ;;  %v8059_v13 = vld [vmem:[#allocation165_spill] sm:$0xff] }
 0x3ce   :  { %v2458_v49 = vpop.permute.xlu0 %2457  ;;  %v3313_v32 = vsel %vm3268_vm10, %v3248_v62, %v2520_v15  ;;  %v3249_v15 = vsel %vm3203_vm9, %v3184_v0, %v2266_v28  ;;  %v663_v28 = vld [vmem:[#allocation2 + $0x150] sm:$0xff]  ;;  %v4650_v62 = vld [vmem:[#allocation2 + $0x260] sm:$0xff] }
 0x3cf   :  { %2539 = vrot.lane.b32.xlu1 %v757_v57, %s4716_s1  ;;  %v790_v57 = vld [vmem:[#allocation2 + $0x142] sm:$0xff]  ;;  %v3282_v10 = vsel %vm3268_vm10, %v3217_v56, %v2458_v49 }
 0x3d0   :  { %2477 = vrot.lane.b32.xlu0 %v726_v46, %s4716_s1  ;;  %v695_v46 = vld [vmem:[#allocation2 + $0x300] sm:$0xff]  ;;  %v760_v0 = vld [vmem:[#allocation2 + $0x309] sm:$0xff] }
 0x3d1   :  { %v2522_v36 = vpop.permute.xlu1 %2521 }
 0x3d2   :  { %v2712_v41 = vpop.permute.xlu0 %2711  ;;  %v3314_v42 = vsel %vm3268_vm10, %v3249_v15, %v2522_v36  ;;  %v2925_v36 = vsel %vm15_vm0, %v4648_v27, %v8044_v35 }
 0x3d3   :  { %2541 = vrot.lane.b32.xlu1 %v758_v40, %s4716_s1  ;;  %v3346_v63 = vsel %vm3333_vm11, %v3281_v20, %v2712_v41  ;;  %v4647_v40 = vld [vmem:[#allocation2 + $0xa8] sm:$0xff]  ;;  %v2990_v21 = vsel %vm2943_vm5, %v2925_v36, %v8046_v58 }
 0x3d4   :  { %2731 = vrot.lane.b32.xlu0 %v789_v8, %s4717_s20  ;;  %4518 = vmatprep.mubr.msk.f32.mxu0 %vm3409_vm12, %v3346_v63  ;;  %v2893_v25 = vsel %vm15_vm0, %v4647_v40, %v8043_v48  ;;  %v3055_v44 = vsel %vm3008_vm6, %v2990_v21, %v8048_v55  ;;  %v2894_v8 = vsel %vm15_vm0, %v4649_v26, %v8050_v7  ;;  %v8053_v20 = vld [vmem:[#allocation48_spill] sm:$0xff]  ;;  %v728_v63 = vld [vmem:[#allocation2 + $0x159] sm:$0xff]  ;;  %v4652_v7 = vld [vmem:[#allocation2 + $0x270] sm:$0xff] }
 0x3d5   :  { %v2776_v2 = vpop.permute.xlu1 %2775  ;;  %v2958_v61 = vsel %vm2943_vm5, %v2893_v25, %v8045_v14  ;;  %v3120_v39 = vsel %vm3073_vm7, %v3055_v44, %v8051_v38  ;;  %v2926_v41 = vsel %vm15_vm0, %v4650_v62, %v8053_v20  ;;  %v823_v25 = vld [vmem:[#allocation2 + $0x302] sm:$0xff] }
 0x3d6   :  { %v3378_v22 = vsel %vm3333_vm11, %v3313_v32, %v2776_v2  ;;  %v2714_v47 = vpop.permute.xlu0 %2713  ;;  %v3023_v12 = vsel %vm3008_vm6, %v2958_v61, %v8047_v11  ;;  %v3185_v51 = vsel %vm3138_vm8, %v3120_v39, %v8055_v23  ;;  %v8057_v2 = vld [vmem:[#allocation106_spill] sm:$0xff]  ;;  %v665_v21 = vld [vmem:[#allocation2 + $0x168] sm:$0xff]  ;;  %v698_v44 = vld [vmem:[#allocation2 + $0x320] sm:$0xff] }
 0x3d7   :  { %2795 = vrot.lane.b32.xlu1 %v821_v37, %s4717_s20  ;;  %4566 = vmatprep.mubr.msk.f32.mxu1 %vm3409_vm12, %v3378_v22  ;;  %v3347_v17 = vsel %vm3333_vm11, %v3282_v10, %v2714_v47  ;;  %v3088_v9 = vsel %vm3073_vm7, %v3023_v12, %v8049_v59  ;;  %v8054_v37 = vld [vmem:[#allocation77_spill] sm:$0xff]  ;;  %v2991_v19 = vsel %vm2943_vm5, %v2926_v41, %v8057_v2  ;;  %v697_v12 = vld [vmem:[#allocation2 + $0x318] sm:$0xff]  ;;  %v8068_v62 = vld [vmem:[#allocation107_spill] sm:$0xff] }
 0x3d8   :  { %2733 = vrot.lane.b32.xlu0 %v790_v57, %s4717_s20  ;;  %4519 = vmatmul.mubr.msk.f32.gmra.mrb[12].mxu0 %vm3409_vm12, %v3347_v17  ;;  %v3153_v30 = vsel %vm3138_vm8, %v3088_v9, %v8052_v18  ;;  %v2959_v52 = vsel %vm2943_vm5, %v2894_v8, %v8054_v37  ;;  %v3056_v56 = vsel %vm3008_vm6, %v2991_v19, %v8059_v13  ;;  %v8060_v57 = vld [vmem:[#allocation195_spill] sm:$0xff]  ;;  %v8066_v8 = vld [vmem:[#allocation49_spill] sm:$0xff]  ;;  %v8067_v39 = vld [vmem:[#allocation78_spill] sm:$0xff] }
 0x3d9   :  { %v2778_v43 = vpop.permute.xlu1 %2777  ;;  %v3218_v32 = vsel %vm3203_vm9, %v3153_v30, %v8056_v31  ;;  %v3024_v4 = vsel %vm3008_vm6, %v2959_v52, %v8058_v34  ;;  %v4651_v9 = vld [vmem:[#allocation2 + $0xc0] sm:$0xff]  ;;  %v2927_v38 = vsel %vm15_vm0, %v4652_v7, %v8066_v8  ;;  %v729_v30 = vld [vmem:[#allocation2 + $0x169] sm:$0xff]  ;;  %v4654_v13 = vld [vmem:[#allocation2 + $0x278] sm:$0xff] }
 0x3da   :  { %v3379_v33 = vsel %vm3333_vm11, %v3314_v42, %v2778_v43  ;;  %v2268_v45 = vpop.permute.xlu0 %2267  ;;  %v3089_v15 = vsel %vm3073_vm7, %v3024_v4, %v8060_v57  ;;  %v8061_v42 = vld [vmem:[#allocation225_spill] sm:$0xff]  ;;  %v8062_v43 = vld [vmem:[#allocation258_spill] sm:$0xff]  ;;  %v2992_v20 = vsel %vm2943_vm5, %v2927_v38, %v8068_v62  ;;  %v8069_v41 = vld [vmem:[#allocation136_spill] sm:$0xff] }
 0x3db   :  { %2797 = vrot.lane.b32.xlu1 %v822_v16, %s4717_s20  ;;  %4567 = vmatmul.mubr.msk.f32.gmra.mrb[12].mxu1 %vm3409_vm12, %v3379_v33  ;;  %v3250_v29 = vsel %vm3203_vm9, %v3185_v51, %v2268_v45  ;;  %v3121_v17 = vsel %vm3073_vm7, %v3056_v56, %v8061_v42  ;;  %v3154_v33 = vsel %vm3138_vm8, %v3089_v15, %v8062_v43  ;;  %v8063_v45 = vld [vmem:[#allocation278_spill] sm:$0xff]  ;;  %v4653_v19 = vld [vmem:[#allocation2 + $0xc8] sm:$0xff]  ;;  %v8072_v34 = vld [vmem:[#allocation21_spill] sm:$0xff] }
 0x3dc   :  { %2223 = vrot.lane.b32.xlu0 %v663_v28, %s4714_s11  ;;  %v761_v23 = vld [vmem:[#allocation2 + $0x319] sm:$0xff]  ;;  %v2896_v4 = vsel %vm15_vm0, %v4653_v19, %v8072_v34  ;;  %v8078_v43 = vld [vmem:[#allocation108_spill] sm:$0xff] }
 0x3dd   :  { %v2270_v50 = vpop.permute.xlu1 %2269  ;;  %v8070_v51 = vld [vmem:[#allocation166_spill] sm:$0xff]  ;;  %v8076_v15 = vld [vmem:[#allocation79_spill] sm:$0xff] }
 0x3de   :  { %v2460_v1 = vpop.permute.xlu0 %2459  ;;  %v3057_v31 = vsel %vm3008_vm6, %v2992_v20, %v8070_v51  ;;  %v8075_v56 = vld [vmem:[#allocation50_spill] sm:$0xff]  ;;  %v699_v20 = vld [vmem:[#allocation2 + $0x330] sm:$0xff]  ;;  %v8086_v19 = vld [vmem:[#allocation51_spill] sm:$0xff] }
 0x3df   :  { %2287 = vrot.lane.b32.xlu1 %v695_v46, %s4714_s11  ;;  %v3283_v22 = vsel %vm3268_vm10, %v3218_v32, %v2460_v1  ;;  %v3186_v46 = vsel %vm3138_vm8, %v3121_v17, %v8063_v45  ;;  %v8071_v32 = vld [vmem:[#allocation196_spill] sm:$0xff]  ;;  %v2928_v57 = vsel %vm15_vm0, %v4654_v13, %v8075_v56  ;;  %v730_v17 = vld [vmem:[#allocation2 + $0x171] sm:$0xff] }
 0x3e0   :  { %2225 = vrot.lane.b32.xlu0 %v664_v60, %s4714_s11  ;;  %v8064_v60 = vld [vmem:[#allocation298_spill] sm:$0xff] }
 0x3e1   :  { %v2524_v49 = vpop.permute.xlu1 %2523  ;;  %v3219_v1 = vsel %vm3203_vm9, %v3154_v33, %v8064_v60  ;;  %v2993_v33 = vsel %vm2943_vm5, %v2928_v57, %v8078_v43  ;;  %v8089_v13 = vld [vmem:[#allocation138_spill] sm:$0xff]  ;;  %v4657_v43 = vld [vmem:[#allocation2 + $0xe0] sm:$0xff] }
 0x3e2   :  { %v2462_v54 = vpop.permute.xlu0 %2461  ;;  %v3315_v10 = vsel %vm3268_vm10, %v3250_v29, %v2524_v49  ;;  %v3251_v49 = vsel %vm3203_vm9, %v3186_v46, %v2270_v50  ;;  %v792_v50 = vld [vmem:[#allocation2 + $0x15a] sm:$0xff] }
 0x3e3   :  { %2289 = vrot.lane.b32.xlu1 %v696_v53, %s4714_s11  ;;  %v791_v53 = vld [vmem:[#allocation2 + $0x152] sm:$0xff]  ;;  %v3284_v40 = vsel %vm3268_vm10, %v3219_v1, %v2462_v54 }
 0x3e4   :  { %2479 = vrot.lane.b32.xlu0 %v727_v6, %s4716_s1  ;;  %v824_v6 = vld [vmem:[#allocation2 + $0x30a] sm:$0xff]  ;;  %v8073_v29 = vld [vmem:[#allocation226_spill] sm:$0xff] }
 0x3e5   :  { %v2526_v3 = vpop.permute.xlu1 %2525 }
 0x3e6   :  { %v2716_v24 = vpop.permute.xlu0 %2715  ;;  %v3316_v27 = vsel %vm3268_vm10, %v3251_v49, %v2526_v3  ;;  %v8065_v3 = vld [vmem:[#allocation20_spill] sm:$0xff]  ;;  %v8080_v49 = vld [vmem:[#allocation167_spill] sm:$0xff] }
 0x3e7   :  { %2543 = vrot.lane.b32.xlu1 %v759_v5, %s4716_s1  ;;  %v3348_v47 = vsel %vm3333_vm11, %v3283_v22, %v2716_v24  ;;  %v666_v5 = vld [vmem:[#allocation2 + $0x170] sm:$0xff]  ;;  %v2895_v26 = vsel %vm15_vm0, %v4651_v9, %v8065_v3  ;;  %v3122_v22 = vsel %vm3073_vm7, %v3057_v31, %v8073_v29  ;;  %v8074_v24 = vld [vmem:[#allocation259_spill] sm:$0xff]  ;;  %v4655_v31 = vld [vmem:[#allocation2 + $0xd8] sm:$0xff] }
 0x3e8   :  { %2481 = vrot.lane.b32.xlu0 %v728_v63, %s4716_s1  ;;  %4521 = vmatprep.mubr.msk.f32.mxu0 %vm3409_vm12, %v3348_v47  ;;  %v2960_v18 = vsel %vm2943_vm5, %v2895_v26, %v8067_v39  ;;  %v8077_v47 = vld [vmem:[#allocation279_spill] sm:$0xff] }
 0x3e9   :  { %v2780_v16 = vpop.permute.xlu1 %2779  ;;  %v3025_v37 = vsel %vm3008_vm6, %v2960_v18, %v8069_v41  ;;  %v825_v3 = vld [vmem:[#allocation2 + $0x31a] sm:$0xff]  ;;  %v826_v39 = vld [vmem:[#allocation2 + $0x322] sm:$0xff] }
 0x3ea   :  { %v3380_v28 = vsel %vm3333_vm11, %v3315_v10, %v2780_v16  ;;  %v2718_v48 = vpop.permute.xlu0 %2717  ;;  %v3090_v63 = vsel %vm3073_vm7, %v3025_v37, %v8071_v32  ;;  %v2961_v10 = vsel %vm2943_vm5, %v2896_v4, %v8076_v15  ;;  %v3187_v16 = vsel %vm3138_vm8, %v3122_v22, %v8077_v47  ;;  %v668_v37 = vld [vmem:[#allocation2 + $0x188] sm:$0xff]  ;;  %v8085_v32 = vld [vmem:[#allocation22_spill] sm:$0xff] }
 0x3eb   :  { %2545 = vrot.lane.b32.xlu1 %v760_v0, %s4716_s1  ;;  %4569 = vmatprep.mubr.msk.f32.mxu1 %vm3409_vm12, %v3380_v28  ;;  %v3349_v35 = vsel %vm3333_vm11, %v3284_v40, %v2718_v48  ;;  %v3155_v0 = vsel %vm3138_vm8, %v3090_v63, %v8074_v24  ;;  %v8079_v28 = vld [vmem:[#allocation137_spill] sm:$0xff]  ;;  %v3058_v40 = vsel %vm3008_vm6, %v2993_v33, %v8080_v49  ;;  %v8087_v4 = vld [vmem:[#allocation80_spill] sm:$0xff]  ;;  %v8092_v33 = vld [vmem:[#allocation23_spill] sm:$0xff] }
 0x3ec   :  { %2735 = vrot.lane.b32.xlu0 %v791_v53, %s4717_s20  ;;  %4522 = vmatmul.mubr.msk.f32.gmra.mrb[14].mxu0 %vm3409_vm12, %v3349_v35  ;;  %v3026_v45 = vsel %vm3008_vm6, %v2961_v10, %v8079_v28  ;;  %v762_v53 = vld [vmem:[#allocation2 + $0x321] sm:$0xff]  ;;  %v8081_v48 = vld [vmem:[#allocation197_spill] sm:$0xff]  ;;  %v2897_v63 = vsel %vm15_vm0, %v4655_v31, %v8085_v32  ;;  %v2898_v28 = vsel %vm15_vm0, %v4657_v43, %v8092_v33 }
 0x3ed   :  { %v2782_v36 = vpop.permute.xlu1 %2781  ;;  %v2962_v29 = vsel %vm2943_vm5, %v2897_v63, %v8087_v4  ;;  %v731_v22 = vld [vmem:[#allocation2 + $0x181] sm:$0xff]  ;;  %v8088_v24 = vld [vmem:[#allocation109_spill] sm:$0xff] }
 0x3ee   :  { %v3381_v14 = vsel %vm3333_vm11, %v3316_v27, %v2782_v36  ;;  %v2208_v61 = vpop.permute.xlu0 %2207  ;;  %v3027_v56 = vsel %vm3008_vm6, %v2962_v29, %v8089_v13  ;;  %v763_v15 = vld [vmem:[#allocation2 + $0x331] sm:$0xff]  ;;  %v8090_v10 = vld [vmem:[#allocation168_spill] sm:$0xff]  ;;  %v828_v4 = vld [vmem:[#allocation2 + $0x33a] sm:$0xff] }
 0x3ef   :  { %2799 = vrot.lane.b32.xlu1 %v823_v25, %s4717_s20  ;;  %4570 = vmatmul.mubr.msk.f32.gmra.mrb[14].mxu1 %vm3409_vm12, %v3381_v14  ;;  %v3220_v42 = vsel %vm3203_vm9, %v3155_v0, %v2208_v61  ;;  %v3091_v25 = vsel %vm3073_vm7, %v3026_v45, %v8081_v48  ;;  %v8082_v14 = vld [vmem:[#allocation227_spill] sm:$0xff]  ;;  %v8083_v61 = vld [vmem:[#allocation260_spill] sm:$0xff]  ;;  %v8096_v48 = vld [vmem:[#allocation81_spill] sm:$0xff] }
 0x3f0   :  { %2737 = vrot.lane.b32.xlu0 %v792_v50, %s4717_s20  ;;  %v3123_v50 = vsel %vm3073_vm7, %v3058_v40, %v8082_v14  ;;  %v8093_v45 = vld [vmem:[#allocation228_spill] sm:$0xff]  ;;  %v827_v32 = vld [vmem:[#allocation2 + $0x332] sm:$0xff] }
 0x3f1   :  { %v2272_v58 = vpop.permute.xlu1 %2271  ;;  %v8095_v49 = vld [vmem:[#allocation52_spill] sm:$0xff]  ;;  %v8106_v43 = vld [vmem:[#allocation53_spill] sm:$0xff] }
 0x3f2   :  { %v2210_v11 = vpop.permute.xlu0 %2209  ;;  %v3252_v46 = vsel %vm3203_vm9, %v3187_v16, %v2272_v58  ;;  %v8091_v16 = vld [vmem:[#allocation198_spill] sm:$0xff]  ;;  %v732_v14 = vld [vmem:[#allocation2 + $0x189] sm:$0xff] }
 0x3f3   :  { %2801 = vrot.lane.b32.xlu1 %v824_v6, %s4717_s20  ;;  %v3156_v6 = vsel %vm3138_vm8, %v3091_v25, %v8083_v61  ;;  %v2963_v25 = vsel %vm2943_vm5, %v2898_v28, %v8096_v48  ;;  %v8107_v28 = vld [vmem:[#allocation82_spill] sm:$0xff]  ;;  %v765_v48 = vld [vmem:[#allocation2 + $0x349] sm:$0xff] }
 0x3f4   :  { %2227 = vrot.lane.b32.xlu0 %v665_v21, %s4714_s11  ;;  %v8084_v21 = vld [vmem:[#allocation280_spill] sm:$0xff] }
 0x3f5   :  { %v2274_v54 = vpop.permute.xlu1 %2273 }
 0x3f6   :  { %v2464_v55 = vpop.permute.xlu0 %2463 }
 0x3f7   :  { %2291 = vrot.lane.b32.xlu1 %v697_v12, %s4714_s11  ;;  %v3285_v60 = vsel %vm3268_vm10, %v3220_v42, %v2464_v55  ;;  %v3188_v12 = vsel %vm3138_vm8, %v3123_v50, %v8084_v21  ;;  %v793_v55 = vld [vmem:[#allocation2 + $0x16a] sm:$0xff]  ;;  %v3092_v42 = vsel %vm3073_vm7, %v3027_v56, %v8091_v16  ;;  %v8098_v50 = vld [vmem:[#allocation110_spill] sm:$0xff]  ;;  %v670_v56 = vld [vmem:[#allocation2 + $0x1a0] sm:$0xff] }
 0x3f8   :  { %2229 = vrot.lane.b32.xlu0 %v666_v5, %s4714_s11  ;;  %v3221_v5 = vsel %vm3203_vm9, %v3156_v6, %v2210_v11  ;;  %v794_v11 = vld [vmem:[#allocation2 + $0x172] sm:$0xff]  ;;  %v8099_v6 = vld [vmem:[#allocation139_spill] sm:$0xff]  ;;  %v8105_v16 = vld [vmem:[#allocation24_spill] sm:$0xff] }
 0x3f9   :  { %v2528_v59 = vpop.permute.xlu1 %2527 }
 0x3fa   :  { %v2466_v52 = vpop.permute.xlu0 %2465  ;;  %v3317_v27 = vsel %vm3268_vm10, %v3252_v46, %v2528_v59 }
 0x3fb   :  { %2293 = vrot.lane.b32.xlu1 %v698_v44, %s4714_s11  ;;  %v3253_v44 = vsel %vm3203_vm9, %v3188_v12, %v2274_v54  ;;  %v3286_v59 = vsel %vm3268_vm10, %v3221_v5, %v2466_v52 }
 0x3fc   :  { %2483 = vrot.lane.b32.xlu0 %v729_v30, %s4716_s1  ;;  %v667_v30 = vld [vmem:[#allocation2 + $0x180] sm:$0xff] }
 0x3fd   :  { %v2530_v2 = vpop.permute.xlu1 %2529 }
 0x3fe   :  { %v2720_v1 = vpop.permute.xlu0 %2719  ;;  %v3318_v26 = vsel %vm3268_vm10, %v3253_v44, %v2530_v2  ;;  %v4656_v2 = vld [vmem:[#allocation2 + $0x288] sm:$0xff]  ;;  %v8100_v44 = vld [vmem:[#allocation169_spill] sm:$0xff] }
 0x3ff   :  { %2547 = vrot.lane.b32.xlu1 %v761_v23, %s4716_s1  ;;  %v3350_v35 = vsel %vm3333_vm11, %v3285_v60, %v2720_v1  ;;  %v700_v23 = vld [vmem:[#allocation2 + $0x338] sm:$0xff]  ;;  %v2929_v34 = vsel %vm15_vm0, %v4656_v2, %v8086_v19  ;;  %v8094_v60 = vld [vmem:[#allocation261_spill] sm:$0xff] }
 0x400   :  { %2485 = vrot.lane.b32.xlu0 %v730_v17, %s4716_s1  ;;  %4524 = vmatprep.mubr.msk.f32.mxu0 %vm3409_vm12, %v3350_v35  ;;  %v2994_v0 = vsel %vm2943_vm5, %v2929_v34, %v8088_v24  ;;  %v3157_v1 = vsel %vm3138_vm8, %v3092_v42, %v8094_v60  ;;  %v8108_v60 = vld [vmem:[#allocation111_spill] sm:$0xff] }
 0x401   :  { %v2784_v36 = vpop.permute.xlu1 %2783  ;;  %v3059_v47 = vsel %vm3008_vm6, %v2994_v0, %v8090_v10  ;;  %v701_v0 = vld [vmem:[#allocation2 + $0x348] sm:$0xff] }
 0x402   :  { %v3382_v58 = vsel %vm3333_vm11, %v3317_v27, %v2784_v36  ;;  %v2722_v9 = vpop.permute.xlu0 %2721  ;;  %v3124_v46 = vsel %vm3073_vm7, %v3059_v47, %v8093_v45  ;;  %v8097_v27 = vld [vmem:[#allocation281_spill] sm:$0xff] }
 0x403   :  { %2549 = vrot.lane.b32.xlu1 %v762_v53, %s4716_s1  ;;  %4572 = vmatprep.mubr.msk.f32.mxu1 %vm3409_vm12, %v3382_v58  ;;  %v3351_v7 = vsel %vm3333_vm11, %v3286_v59, %v2722_v9  ;;  %v4658_v53 = vld [vmem:[#allocation2 + $0x290] sm:$0xff]  ;;  %v3189_v35 = vsel %vm3138_vm8, %v3124_v46, %v8097_v27  ;;  %v3028_v58 = vsel %vm3008_vm6, %v2963_v25, %v8099_v6  ;;  %v8101_v9 = vld [vmem:[#allocation199_spill] sm:$0xff]  ;;  %v8110_v25 = vld [vmem:[#allocation170_spill] sm:$0xff] }
 0x404   :  { %2739 = vrot.lane.b32.xlu0 %v793_v55, %s4717_s20  ;;  %4525 = vmatmul.mubr.msk.f32.gmra.mrb[16].mxu0 %vm3409_vm12, %v3351_v7  ;;  %v2930_v40 = vsel %vm15_vm0, %v4658_v53, %v8095_v49  ;;  %v764_v55 = vld [vmem:[#allocation2 + $0x339] sm:$0xff]  ;;  %v4659_v47 = vld [vmem:[#allocation2 + $0xf0] sm:$0xff]  ;;  %v8109_v53 = vld [vmem:[#allocation140_spill] sm:$0xff] }
 0x405   :  { %v2786_v8 = vpop.permute.xlu1 %2785  ;;  %v2995_v61 = vsel %vm2943_vm5, %v2930_v40, %v8098_v50  ;;  %v2899_v42 = vsel %vm15_vm0, %v4659_v47, %v8105_v16  ;;  %v733_v46 = vld [vmem:[#allocation2 + $0x199] sm:$0xff] }
 0x406   :  { %v3383_v38 = vsel %vm3333_vm11, %v3318_v26, %v2786_v8  ;;  %v2212_v54 = vpop.permute.xlu0 %2211  ;;  %v3060_v59 = vsel %vm3008_vm6, %v2995_v61, %v8100_v44  ;;  %v2964_v45 = vsel %vm2943_vm5, %v2899_v42, %v8107_v28  ;;  %v4661_v50 = vld [vmem:[#allocation2 + $0xf8] sm:$0xff]  ;;  %v8112_v61 = vld [vmem:[#allocation25_spill] sm:$0xff] }
 0x407   :  { %2803 = vrot.lane.b32.xlu1 %v825_v3, %s4717_s20  ;;  %4573 = vmatmul.mubr.msk.f32.gmra.mrb[16].mxu1 %vm3409_vm12, %v3383_v38  ;;  %v3222_v36 = vsel %vm3203_vm9, %v3157_v1, %v2212_v54  ;;  %v3093_v3 = vsel %vm3073_vm7, %v3028_v58, %v8101_v9  ;;  %v8102_v38 = vld [vmem:[#allocation229_spill] sm:$0xff]  ;;  %v8103_v54 = vld [vmem:[#allocation262_spill] sm:$0xff]  ;;  %v3029_v49 = vsel %vm3008_vm6, %v2964_v45, %v8109_v53  ;;  %v8116_v9 = vld [vmem:[#allocation83_spill] sm:$0xff] }
 0x408   :  { %2741 = vrot.lane.b32.xlu0 %v794_v11, %s4717_s20  ;;  %v3125_v11 = vsel %vm3073_vm7, %v3060_v59, %v8102_v38  ;;  %v2900_v6 = vsel %vm15_vm0, %v4661_v50, %v8112_v61  ;;  %v8113_v58 = vld [vmem:[#allocation230_spill] sm:$0xff]  ;;  %v734_v38 = vld [vmem:[#allocation2 + $0x1a1] sm:$0xff]  ;;  %v829_v42 = vld [vmem:[#allocation2 + $0x34a] sm:$0xff] }
 0x409   :  { %v2276_v18 = vpop.permute.xlu1 %2275  ;;  %v8115_v44 = vld [vmem:[#allocation54_spill] sm:$0xff] }
 0x40a   :  { %v2214_v62 = vpop.permute.xlu0 %2213  ;;  %v3254_v21 = vsel %vm3203_vm9, %v3189_v35, %v2276_v18  ;;  %v8111_v35 = vld [vmem:[#allocation200_spill] sm:$0xff] }
 0x40b   :  { %2805 = vrot.lane.b32.xlu1 %v826_v39, %s4717_s20  ;;  %v3158_v39 = vsel %vm3138_vm8, %v3093_v3, %v8103_v54  ;;  %v2965_v3 = vsel %vm2943_vm5, %v2900_v6, %v8116_v9 }
 0x40c   :  { %2231 = vrot.lane.b32.xlu0 %v667_v30, %s4714_s11  ;;  %v8104_v30 = vld [vmem:[#allocation282_spill] sm:$0xff] }
 0x40d   :  { %v2278_v41 = vpop.permute.xlu1 %2277 }
 0x40e   :  { %v2468_v52 = vpop.permute.xlu0 %2467 }
 0x40f   :  { %2295 = vrot.lane.b32.xlu1 %v699_v20, %s4714_s11  ;;  %v3287_v12 = vsel %vm3268_vm10, %v3222_v36, %v2468_v52  ;;  %v3190_v20 = vsel %vm3138_vm8, %v3125_v11, %v8104_v30  ;;  %v795_v52 = vld [vmem:[#allocation2 + $0x182] sm:$0xff]  ;;  %v3094_v36 = vsel %vm3073_vm7, %v3029_v49, %v8111_v35 }
 0x410   :  { %2233 = vrot.lane.b32.xlu0 %v668_v37, %s4714_s11  ;;  %v3223_v37 = vsel %vm3203_vm9, %v3158_v39, %v2214_v62  ;;  %v796_v62 = vld [vmem:[#allocation2 + $0x18a] sm:$0xff]  ;;  %v798_v49 = vld [vmem:[#allocation2 + $0x1a2] sm:$0xff] }
 0x411   :  { %v2532_v51 = vpop.permute.xlu1 %2531  ;;  %v8118_v11 = vld [vmem:[#allocation112_spill] sm:$0xff]  ;;  %v8119_v39 = vld [vmem:[#allocation141_spill] sm:$0xff] }
 0x412   :  { %v2470_v57 = vpop.permute.xlu0 %2469  ;;  %v3319_v26 = vsel %vm3268_vm10, %v3254_v21, %v2532_v51 }
 0x413   :  { %2297 = vrot.lane.b32.xlu1 %v700_v23, %s4714_s11  ;;  %v3255_v23 = vsel %vm3203_vm9, %v3190_v20, %v2278_v41  ;;  %v3288_v51 = vsel %vm3268_vm10, %v3223_v37, %v2470_v57 }
 0x414   :  { %2487 = vrot.lane.b32.xlu0 %v731_v22, %s4716_s1  ;;  %v669_v22 = vld [vmem:[#allocation2 + $0x198] sm:$0xff] }
 0x415   :  { %v2534_v17 = vpop.permute.xlu1 %2533 }
 0x416   :  { %v2724_v5 = vpop.permute.xlu0 %2723  ;;  %v3320_v63 = vsel %vm3268_vm10, %v3255_v23, %v2534_v17  ;;  %v4660_v17 = vld [vmem:[#allocation2 + $0x2a0] sm:$0xff] }
 0x417   :  { %2551 = vrot.lane.b32.xlu1 %v763_v15, %s4716_s1  ;;  %v3352_v7 = vsel %vm3333_vm11, %v3287_v12, %v2724_v5  ;;  %v702_v15 = vld [vmem:[#allocation2 + $0x350] sm:$0xff]  ;;  %v2931_v33 = vsel %vm15_vm0, %v4660_v17, %v8106_v43  ;;  %v8114_v12 = vld [vmem:[#allocation263_spill] sm:$0xff] }
 0x418   :  { %2489 = vrot.lane.b32.xlu0 %v732_v14, %s4716_s1  ;;  %4527 = vmatprep.mubr.msk.f32.mxu0 %vm3409_vm12, %v3352_v7  ;;  %v2996_v1 = vsel %vm2943_vm5, %v2931_v33, %v8108_v60  ;;  %v3159_v5 = vsel %vm3138_vm8, %v3094_v36, %v8114_v12  ;;  %v8120_v23 = vld [vmem:[#allocation171_spill] sm:$0xff]  ;;  %v4663_v12 = vld [vmem:[#allocation2 + $0x108] sm:$0xff] }
 0x419   :  { %v2788_v8 = vpop.permute.xlu1 %2787  ;;  %v3061_v27 = vsel %vm3008_vm6, %v2996_v1, %v8110_v25 }
 0x41a   :  { %v3384_v18 = vsel %vm3333_vm11, %v3319_v26, %v2788_v8  ;;  %v2726_v31 = vpop.permute.xlu0 %2725  ;;  %v3126_v21 = vsel %vm3073_vm7, %v3061_v27, %v8113_v58  ;;  %v8117_v26 = vld [vmem:[#allocation283_spill] sm:$0xff]  ;;  %v830_v27 = vld [vmem:[#allocation2 + $0x352] sm:$0xff] }
 0x41b   :  { %2553 = vrot.lane.b32.xlu1 %v764_v55, %s4716_s1  ;;  %4575 = vmatprep.mubr.msk.f32.mxu1 %vm3409_vm12, %v3384_v18  ;;  %v3353_v2 = vsel %vm3333_vm11, %v3288_v51, %v2726_v31  ;;  %v4662_v55 = vld [vmem:[#allocation2 + $0x2a8] sm:$0xff]  ;;  %v3191_v7 = vsel %vm3138_vm8, %v3126_v21, %v8117_v26  ;;  %v3030_v18 = vsel %vm3008_vm6, %v2965_v3, %v8119_v39  ;;  %v8121_v31 = vld [vmem:[#allocation201_spill] sm:$0xff] }
 0x41c   :  { %2743 = vrot.lane.b32.xlu0 %v795_v52, %s4717_s20  ;;  %4528 = vmatmul.mubr.msk.f32.gmra.mrb[18].mxu0 %vm3409_vm12, %v3353_v2  ;;  %v2932_v59 = vsel %vm15_vm0, %v4662_v55, %v8115_v44  ;;  %v766_v52 = vld [vmem:[#allocation2 + $0x351] sm:$0xff]  ;;  %v8127_v3 = vld [vmem:[#allocation84_spill] sm:$0xff] }
 0x41d   :  { %v2790_v19 = vpop.permute.xlu1 %2789  ;;  %v2997_v54 = vsel %vm2943_vm5, %v2932_v59, %v8118_v11  ;;  %v4664_v44 = vld [vmem:[#allocation2 + $0x2b8] sm:$0xff]  ;;  %v8126_v59 = vld [vmem:[#allocation55_spill] sm:$0xff]  ;;  %v8130_v39 = vld [vmem:[#allocation172_spill] sm:$0xff] }
 0x41e   :  { %v3385_v34 = vsel %vm3333_vm11, %v3320_v63, %v2790_v19  ;;  %v2216_v41 = vpop.permute.xlu0 %2215  ;;  %v3062_v51 = vsel %vm3008_vm6, %v2997_v54, %v8120_v23  ;;  %v2933_v9 = vsel %vm15_vm0, %v4664_v44, %v8126_v59  ;;  %v8132_v23 = vld [vmem:[#allocation27_spill] sm:$0xff] }
 0x41f   :  { %2807 = vrot.lane.b32.xlu1 %v827_v32, %s4717_s20  ;;  %4576 = vmatmul.mubr.msk.f32.gmra.mrb[18].mxu1 %vm3409_vm12, %v3385_v34  ;;  %v3224_v8 = vsel %vm3203_vm9, %v3159_v5, %v2216_v41  ;;  %v3095_v32 = vsel %vm3073_vm7, %v3030_v18, %v8121_v31  ;;  %v8122_v34 = vld [vmem:[#allocation231_spill] sm:$0xff]  ;;  %v8123_v41 = vld [vmem:[#allocation264_spill] sm:$0xff]  ;;  %v8125_v5 = vld [vmem:[#allocation26_spill] sm:$0xff] }
 0x420   :  { %2745 = vrot.lane.b32.xlu0 %v796_v62, %s4717_s20  ;;  %v3127_v62 = vsel %vm3073_vm7, %v3062_v51, %v8122_v34  ;;  %v2901_v55 = vsel %vm15_vm0, %v4663_v12, %v8125_v5  ;;  %v8133_v31 = vld [vmem:[#allocation233_spill] sm:$0xff]  ;;  %v8135_v34 = vld [vmem:[#allocation56_spill] sm:$0xff] }
 0x421   :  { %v2280_v29 = vpop.permute.xlu1 %2279  ;;  %v2966_v26 = vsel %vm2943_vm5, %v2901_v55, %v8127_v3 }
 0x422   :  { %v2218_v24 = vpop.permute.xlu0 %2217  ;;  %v3256_v30 = vsel %vm3203_vm9, %v3191_v7, %v2280_v29  ;;  %v8128_v7 = vld [vmem:[#allocation113_spill] sm:$0xff] }
 0x423   :  { %2809 = vrot.lane.b32.xlu1 %v828_v4, %s4717_s20  ;;  %v3160_v4 = vsel %vm3138_vm8, %v3095_v32, %v8123_v41  ;;  %v8136_v41 = vld [vmem:[#allocation85_spill] sm:$0xff] }
 0x424   :  { %2235 = vrot.lane.b32.xlu0 %v669_v22, %s4714_s11  ;;  %v8124_v22 = vld [vmem:[#allocation284_spill] sm:$0xff] }
 0x425   :  { %v2282_v13 = vpop.permute.xlu1 %2281 }
 0x426   :  { %v2472_v57 = vpop.permute.xlu0 %2471 }
 0x427   :  { %2299 = vrot.lane.b32.xlu1 %v701_v0, %s4714_s11  ;;  %v3289_v20 = vsel %vm3268_vm10, %v3224_v8, %v2472_v57  ;;  %v3192_v0 = vsel %vm3138_vm8, %v3127_v62, %v8124_v22  ;;  %v7174_v57 = vld [vmem:[%s7636_s2] ss:$0 sm:$0xff]  ;;  %v2998_v8 = vsel %vm2943_vm5, %v2933_v9, %v8128_v7 }
 0x428   :  { %2237 = vrot.lane.b32.xlu0 %v670_v56, %s4714_s11  ;;  %v3225_v56 = vsel %vm3203_vm9, %v3160_v4, %v2218_v24  ;;  %v3063_v18 = vsel %vm3008_vm6, %v2998_v8, %v8130_v39 }
 0x429   :  { %v2536_v10 = vpop.permute.xlu1 %2535  ;;  %v3128_v32 = vsel %vm3073_vm7, %v3063_v18, %v8133_v31 }
 0x42a   :  { %v2474_v40 = vpop.permute.xlu0 %2473  ;;  %v3321_v63 = vsel %vm3268_vm10, %v3256_v30, %v2536_v10  ;;  %v3257_v10 = vsel %vm3203_vm9, %v3192_v0, %v2282_v13  ;;  %v8131_v30 = vld [vmem:[#allocation202_spill] sm:$0xff] }
 0x42b   :  { %2301 = vrot.lane.b32.xlu1 %v702_v15, %s4714_s11  ;;  %v797_v15 = vld [vmem:[#allocation2 + $0x19a] sm:$0xff]  ;;  %v3290_v47 = vsel %vm3268_vm10, %v3225_v56, %v2474_v40 }
 0x42c   :  { %2491 = vrot.lane.b32.xlu0 %v733_v46, %s4716_s1  ;;  %v8138_v56 = vld [vmem:[#allocation114_spill] sm:$0xff] }
 0x42d   :  { %v2538_v14 = vpop.permute.xlu1 %2537 }
 0x42e   :  { %v2728_v37 = vpop.permute.xlu0 %2727  ;;  %v3322_v17 = vsel %vm3268_vm10, %v3257_v10, %v2538_v14  ;;  %v8139_v10 = vld [vmem:[#allocation143_spill] sm:$0xff] }
 0x42f   :  { %2555 = vrot.lane.b32.xlu1 %v765_v48, %s4716_s1  ;;  %v3354_v2 = vsel %vm3333_vm11, %v3289_v20, %v2728_v37 }
 0x430   :  { %2493 = vrot.lane.b32.xlu0 %v734_v38, %s4716_s1  ;;  %4530 = vmatprep.mubr.msk.f32.mxu0 %vm3409_vm12, %v3354_v2  ;;  %v8129_v38 = vld [vmem:[#allocation142_spill] sm:$0xff] }
 0x431   :  { %v2792_v19 = vpop.permute.xlu1 %2791  ;;  %v3031_v11 = vsel %vm3008_vm6, %v2966_v26, %v8129_v38 }
 0x432   :  { %v3386_v29 = vsel %vm3333_vm11, %v3321_v63, %v2792_v19  ;;  %v2730_v16 = vpop.permute.xlu0 %2729  ;;  %v3096_v20 = vsel %vm3073_vm7, %v3031_v11, %v8131_v30  ;;  %v8134_v63 = vld [vmem:[#allocation265_spill] sm:$0xff]  ;;  %v4666_v19 = vld [vmem:[#allocation2 + $0x2c0] sm:$0xff] }
 0x433   :  { %2557 = vrot.lane.b32.xlu1 %v766_v52, %s4716_s1  ;;  %4578 = vmatprep.mubr.msk.f32.mxu1 %vm3409_vm12, %v3386_v29  ;;  %v3355_v24 = vsel %vm3333_vm11, %v3290_v47, %v2730_v16  ;;  %v4502_v33 = vpop.f32.mrb[0].mxu0  ;;  %v4665_v52 = vld [vmem:[#allocation2 + $0x110] sm:$0xff]  ;;  %v3161_v2 = vsel %vm3138_vm8, %v3096_v20, %v8134_v63  ;;  %v2934_v62 = vsel %vm15_vm0, %v4666_v19, %v8135_v34 }
 0x434   :  { %v3678_v45 = vadd.f32 %v4502_v33, %v7174_v57  ;;  %2747 = vrot.lane.b32.xlu0 %v797_v15, %s4717_s20  ;;  %v3672_v60 = vpop.f32.mrb[1].mxu0  ;;  %4531 = vmatmul.mubr.msk.f32.gmra.mrb[20].mxu0 %vm3409_vm12, %v3355_v24  ;;  %v2902_v51 = vsel %vm15_vm0, %v4665_v52, %v8132_v23  ;;  %v8137_v29 = vld [vmem:[#allocation285_spill] sm:$0xff]  ;;  %v2999_v15 = vsel %vm2943_vm5, %v2934_v62, %v8138_v56  ;;  %v8141_v33 = vld [vmem:[#allocation203_spill] sm:$0xff] }
 0x435   :  { %v2794_v43 = vpop.permute.xlu1 %2793  ;;  %v3673_v1 = vadd.f32 %v7174_v57, %v3672_v60  ;;  %v2967_v4 = vsel %vm2943_vm5, %v2902_v51, %v8136_v41  ;;  %v3193_v22 = vsel %vm3138_vm8, %v3128_v32, %v8137_v29  ;;  %v8140_v24 = vld [vmem:[#allocation173_spill] sm:$0xff]  ;;  %v4667_v29 = vld [vmem:[#allocation2 + $0x120] sm:$0xff] }
 0x436   :  { %v3387_v28 = vsel %vm3333_vm11, %v3322_v17, %v2794_v43  ;;  %v4550_v46 = vpop.f32.mrb[0].mxu1  ;;  %v3992_v40 = vmax.f32 %v3678_v45, 0.0  ;;  %v2220_v25 = vpop.permute.xlu0 %2219  ;;  %v3032_v47 = vsel %vm3008_vm6, %v2967_v4, %v8139_v10  ;;  %v3064_v43 = vsel %vm3008_vm6, %v2999_v15, %v8140_v24  ;;  %v4668_v15 = vld [vmem:[#allocation2 + $0x128] sm:$0xff]  ;;  %v8146_v10 = vld [vmem:[#allocation29_spill] sm:$0xff]  ;;  %v4670_v24 = vld [vmem:[#allocation2 + $0x2d8] sm:$0xff] }
 0x437   :  { %v3838_v13 = vadd.f32 %v4550_v46, %v7174_v57  ;;  %2811 = vrot.lane.b32.xlu1 %v829_v42, %s4717_s20  ;;  %v3832_v53 = vpop.f32.mrb[1].mxu1  ;;  %4579 = vmatmul.mubr.msk.f32.gmra.mrb[20].mxu1 %vm3409_vm12, %v3387_v28  ;;  %v3991_v36 = vmax.f32 %v3673_v1, 0.0  ;;  %v3226_v0 = vsel %vm3203_vm9, %v3161_v2, %v2220_v25  ;;  %v3097_v28 = vsel %vm3073_vm7, %v3032_v47, %v8141_v33  ;;  %v8142_v1 = vld [vmem:[#allocation235_spill] sm:$0xff] }
 0x438   :  { %v3833_v48 = vadd.f32 %v7174_v57, %v3832_v53  ;;  %4057 = vst.msk [vmem:[#allocation3 + $0x8] sm:$0xff] %vm4055_vm13, %v3992_v40  ;;  %2749 = vrot.lane.b32.xlu0 %v798_v49, %s4717_s20  ;;  %v3129_v53 = vsel %vm3073_vm7, %v3064_v43, %v8142_v1  ;;  %v8143_v49 = vld [vmem:[#allocation266_spill] sm:$0xff]  ;;  %v2904_v47 = vsel %vm15_vm0, %v4668_v15, %v8146_v10  ;;  %v8164_v10 = vld [vmem:[#allocation288_spill] sm:$0xff] }
 0x439   :  { %v4024_v35 = vmax.f32 %v3838_v13, 0.0  ;;  %v2284_v14 = vpop.permute.xlu1 %2283  ;;  %4056 = vst.msk [vmem:[#allocation3] sm:$0xff] %vm4055_vm13, %v3991_v36  ;;  %v3162_v40 = vsel %vm3138_vm8, %v3097_v28, %v8143_v49  ;;  %v8144_v36 = vld [vmem:[#allocation286_spill] sm:$0xff] }
 0x43a   :  { %v4023_v50 = vmax.f32 %v3833_v48, 0.0  ;;  %v2222_v61 = vpop.permute.xlu0 %2221  ;;  %v3258_v16 = vsel %vm3203_vm9, %v3193_v22, %v2284_v14  ;;  %v3194_v14 = vsel %vm3138_vm8, %v3129_v53, %v8144_v36  ;;  %v8145_v22 = vld [vmem:[#allocation28_spill] sm:$0xff]  ;;  %v8148_v43 = vld [vmem:[#allocation58_spill] sm:$0xff] }
 0x43b   :  { %4089 = vst.msk [vmem:[#allocation3 + $0x108] sm:$0xff] %vm4055_vm13, %v4024_v35  ;;  %2813 = vrot.lane.b32.xlu1 %v830_v27, %s4717_s20  ;;  %v2936_v33 = vsel %vm15_vm0, %v4670_v24, %v8148_v43  ;;  %v8149_v28 = vld [vmem:[#allocation86_spill] sm:$0xff]  ;;  %v8152_v53 = vld [vmem:[#allocation116_spill] sm:$0xff] }
 0x43c   :  { %4088 = vst.msk [vmem:[#allocation3 + $0x100] sm:$0xff] %vm4055_vm13, %v4023_v50  ;;  %v3227_v50 = vsel %vm3203_vm9, %v3162_v40, %v2222_v61  ;;  %v3001_v49 = vsel %vm2943_vm5, %v2936_v33, %v8152_v53  ;;  %v8153_v40 = vld [vmem:[#allocation144_spill] sm:$0xff]  ;;  %v8155_v36 = vld [vmem:[#allocation174_spill] sm:$0xff] }
 0x43d   :  { %v2286_v6 = vpop.permute.xlu1 %2285  ;;  %v4671_v53 = vld [vmem:[#allocation2 + $0x138] sm:$0xff] }
 0x43e   :  { %v2476_v58 = vpop.permute.xlu0 %2475  ;;  %v3259_v5 = vsel %vm3203_vm9, %v3194_v14, %v2286_v6 }
 0x43f   :  { %v3291_v42 = vsel %vm3268_vm10, %v3226_v0, %v2476_v58  ;;  %v2903_v0 = vsel %vm15_vm0, %v4667_v29, %v8145_v22  ;;  %v8162_v22 = vld [vmem:[#allocation238_spill] sm:$0xff] }
 0x440   :  { %v4120_v39 = vld [vmem:[#allocation3] ss:$2 sm:$0xff]  ;;  %v4152_v18 = vld [vmem:[#allocation3 + $0x1] ss:$2 sm:$0xff] }
 0x441   :  { %v2540_v21 = vpop.permute.xlu1 %2539  ;;  %v4247_v31 = vmax.f32 %v4120_v39, %v4152_v18 }
 0x442   :  { %v2478_v54 = vpop.permute.xlu0 %2477  ;;  %v3323_v45 = vsel %vm3268_vm10, %v3258_v16, %v2540_v21  ;;  %v4669_v16 = vld [vmem:[#allocation2 + $0x2d0] sm:$0xff] }
 0x443   :  { %v3292_v55 = vsel %vm3268_vm10, %v3227_v50, %v2478_v54  ;;  %v4136_v20 = vld [vmem:[#allocation3 + $0x100] ss:$2 sm:$0xff] }
 0x444   :  { %v8156_v50 = vld [vmem:[#allocation175_spill] sm:$0xff] }
 0x445   :  { %v2542_v37 = vpop.permute.xlu1 %2541 }
 0x446   :  { %v2732_v17 = vpop.permute.xlu0 %2731  ;;  %v3324_v3 = vsel %vm3268_vm10, %v3259_v5, %v2542_v37  ;;  %v4168_v37 = vld [vmem:[#allocation3 + $0x101] ss:$2 sm:$0xff] }
 0x447   :  { %v3356_v46 = vsel %vm3333_vm11, %v3291_v42, %v2732_v17  ;;  %v4505_v13 = vpop.f32.mrb[2].mxu0  ;;  %v4255_v19 = vmax.f32 %v4136_v20, %v4168_v37  ;;  %v8147_v42 = vld [vmem:[#allocation57_spill] sm:$0xff] }
 0x448   :  { %v3688_v25 = vadd.f32 %v4505_v13, %v7174_v57  ;;  %v3682_v27 = vpop.f32.mrb[3].mxu0  ;;  %4533 = vmatprep.mubr.msk.f32.mxu0 %vm3409_vm12, %v3356_v46  ;;  %v2935_v17 = vsel %vm15_vm0, %v4669_v16, %v8147_v42  ;;  %v8150_v46 = vld [vmem:[#allocation87_spill] sm:$0xff] }
 0x449   :  { %v2796_v60 = vpop.permute.xlu1 %2795  ;;  %v3683_v58 = vadd.f32 %v7174_v57, %v3682_v27  ;;  %v8151_v13 = vld [vmem:[#allocation115_spill] sm:$0xff]  ;;  %v8154_v27 = vld [vmem:[#allocation145_spill] sm:$0xff] }
 0x44a   :  { %v3388_v48 = vsel %vm3333_vm11, %v3323_v45, %v2796_v60  ;;  %v4553_v35 = vpop.f32.mrb[2].mxu1  ;;  %v3994_v44 = vmax.f32 %v3688_v25, 0.0  ;;  %v2734_v9 = vpop.permute.xlu0 %2733  ;;  %v2968_v45 = vsel %vm2943_vm5, %v2903_v0, %v8149_v28  ;;  %v2969_v60 = vsel %vm2943_vm5, %v2904_v47, %v8150_v46 }
 0x44b   :  { %v3848_v21 = vadd.f32 %v4553_v35, %v7174_v57  ;;  %v3842_v12 = vpop.f32.mrb[3].mxu1  ;;  %4581 = vmatprep.mubr.msk.f32.mxu1 %vm3409_vm12, %v3388_v48  ;;  %v3993_v26 = vmax.f32 %v3683_v58, 0.0  ;;  %v3357_v61 = vsel %vm3333_vm11, %v3292_v55, %v2734_v9  ;;  %v3000_v1 = vsel %vm2943_vm5, %v2935_v17, %v8151_v13  ;;  %v8159_v9 = vld [vmem:[#allocation237_spill] sm:$0xff] }
 0x44c   :  { %v3843_v59 = vadd.f32 %v7174_v57, %v3842_v12  ;;  %4059 = vst.msk [vmem:[#allocation3 + $0x18] sm:$0xff] %vm4055_vm13, %v3994_v44  ;;  %4534 = vmatmul.mubr.msk.f32.gmra.mrb[22].mxu0 %vm3409_vm12, %v3357_v61  ;;  %v3033_v48 = vsel %vm3008_vm6, %v2968_v45, %v8153_v40  ;;  %v3034_v35 = vsel %vm3008_vm6, %v2969_v60, %v8154_v27  ;;  %v8158_v44 = vld [vmem:[#allocation205_spill] sm:$0xff] }
 0x44d   :  { %v4026_v7 = vmax.f32 %v3848_v21, 0.0  ;;  %v2798_v8 = vpop.permute.xlu1 %2797  ;;  %4058 = vst.msk [vmem:[#allocation3 + $0x10] sm:$0xff] %vm4055_vm13, %v3993_v26  ;;  %v3065_v14 = vsel %vm3008_vm6, %v3000_v1, %v8155_v36  ;;  %v3066_v58 = vsel %vm3008_vm6, %v3001_v49, %v8156_v50  ;;  %v8157_v21 = vld [vmem:[#allocation204_spill] sm:$0xff]  ;;  %v8160_v26 = vld [vmem:[#allocation267_spill] sm:$0xff]  ;;  %v8165_v49 = vld [vmem:[#allocation30_spill] sm:$0xff] }
 0x44e   :  { %v4025_v38 = vmax.f32 %v3843_v59, 0.0  ;;  %v3389_v11 = vsel %vm3333_vm11, %v3324_v3, %v2798_v8  ;;  %v2224_v6 = vpop.permute.xlu0 %2223  ;;  %v3098_v12 = vsel %vm3073_vm7, %v3033_v48, %v8157_v21  ;;  %v3099_v59 = vsel %vm3073_vm7, %v3034_v35, %v8158_v44  ;;  %v4672_v35 = vld [vmem:[#allocation2 + $0x2e8] sm:$0xff]  ;;  %v8166_v36 = vld [vmem:[#allocation59_spill] sm:$0xff] }
 0x44f   :  { %4091 = vst.msk [vmem:[#allocation3 + $0x118] sm:$0xff] %vm4055_vm13, %v4026_v7  ;;  %4582 = vmatmul.mubr.msk.f32.gmra.mrb[22].mxu1 %vm3409_vm12, %v3389_v11  ;;  %v3130_v3 = vsel %vm3073_vm7, %v3065_v14, %v8159_v9  ;;  %v3163_v7 = vsel %vm3138_vm8, %v3098_v12, %v8160_v26  ;;  %v8161_v11 = vld [vmem:[#allocation287_spill] sm:$0xff]  ;;  %v3131_v0 = vsel %vm3073_vm7, %v3066_v58, %v8162_v22  ;;  %v8167_v50 = vld [vmem:[#allocation88_spill] sm:$0xff] }
 0x450   :  { %4090 = vst.msk [vmem:[#allocation3 + $0x110] sm:$0xff] %vm4055_vm13, %v4025_v38  ;;  %v3195_v39 = vsel %vm3138_vm8, %v3130_v3, %v8161_v11  ;;  %v3228_v18 = vsel %vm3203_vm9, %v3163_v7, %v2224_v6  ;;  %v2905_v40 = vsel %vm15_vm0, %v4671_v53, %v8165_v49  ;;  %v2937_v14 = vsel %vm15_vm0, %v4672_v35, %v8166_v36  ;;  %v8182_v53 = vld [vmem:[#allocation240_spill] sm:$0xff] }
 0x451   :  { %v2288_v54 = vpop.permute.xlu1 %2287  ;;  %v2970_v58 = vsel %vm2943_vm5, %v2905_v40, %v8167_v50 }
 0x452   :  { %v7259_v30 = vpop.permute.xlu0 %2225 }
 0x454   :  { %v4184_v23 = vld [vmem:[#allocation3 + $0x10] ss:$2 sm:$0xff]  ;;  %v4216_v51 = vld [vmem:[#allocation3 + $0x11] ss:$2 sm:$0xff] }
 0x455   :  { %v7261_v52 = vpop.permute.xlu1 %2289  ;;  %v4263_v32 = vmax.f32 %v4184_v23, %v4216_v51  ;;  %v3260_v51 = vsel %vm3203_vm9, %v3195_v39, %v2288_v54 }
 0x456   :  { %v2480_v62 = vpop.permute.xlu0 %2479 }
 0x457   :  { %v4200_v63 = vld [vmem:[#allocation3 + $0x110] ss:$2 sm:$0xff]  ;;  %v4232_v2 = vld [vmem:[#allocation3 + $0x111] ss:$2 sm:$0xff]  ;;  %v4279_v41 = vmax.f32 %v4247_v31, %v4263_v32  ;;  %v3293_v31 = vsel %vm3268_vm10, %v3228_v18, %v2480_v62 }
 0x458   :  { %v4271_v34 = vmax.f32 %v4200_v63, %v4232_v2 }
 0x459   :  { %v2544_v4 = vpop.permute.xlu1 %2543  ;;  %4295 = vst.msk [vmem:[#allocation4] sm:$0xff] %vm4055_vm13, %v4279_v41 }
 0x45a   :  { %v4287_v56 = vmax.f32 %v4255_v19, %v4271_v34  ;;  %v2482_v25 = vpop.permute.xlu0 %2481  ;;  %v3325_v19 = vsel %vm3268_vm10, %v3260_v51, %v2544_v4  ;;  %v3196_v4 = vsel %vm3138_vm8, %v3131_v0, %v8164_v10  ;;  %v8177_v0 = vld [vmem:[#allocation289_spill] sm:$0xff]  ;;  %v8179_v10 = vld [vmem:[#allocation147_spill] sm:$0xff] }
 0x45b   :  { %v4508_v55 = vpop.f32.mrb[4].mxu0  ;;  %v3261_v16 = vsel %vm3203_vm9, %v3196_v4, %v7261_v52 }
 0x45c   :  { %4303 = vst.msk [vmem:[#allocation4 + $0x40] sm:$0xff] %vm4055_vm13, %v4287_v56  ;;  %v3698_v61 = vadd.f32 %v4508_v55, %v7174_v57  ;;  %v3692_v8 = vpop.f32.mrb[5].mxu0  ;;  %v8163_v56 = vld [vmem:[#allocation268_spill] sm:$0xff]  ;;  %v8168_v55 = vld [vmem:[#allocation117_spill] sm:$0xff] }
 0x45d   :  { %v2546_v5 = vpop.permute.xlu1 %2545  ;;  %v3693_v20 = vadd.f32 %v7174_v57, %v3692_v8  ;;  %v3164_v15 = vsel %vm3138_vm8, %v3099_v59, %v8163_v56  ;;  %v3002_v44 = vsel %vm2943_vm5, %v2937_v14, %v8168_v55  ;;  %v8169_v59 = vld [vmem:[#allocation146_spill] sm:$0xff] }
 0x45e   :  { %v4556_v38 = vpop.f32.mrb[4].mxu1  ;;  %v3996_v32 = vmax.f32 %v3698_v61, 0.0  ;;  %v2736_v2 = vpop.permute.xlu0 %2735  ;;  %v3229_v47 = vsel %vm3203_vm9, %v3164_v15, %v7259_v30  ;;  %v3326_v24 = vsel %vm3268_vm10, %v3261_v16, %v2546_v5  ;;  %v3035_v9 = vsel %vm3008_vm6, %v2970_v58, %v8169_v59  ;;  %v8170_v61 = vld [vmem:[#allocation176_spill] sm:$0xff] }
 0x45f   :  { %v3858_v37 = vadd.f32 %v4556_v38, %v7174_v57  ;;  %v3852_v23 = vpop.f32.mrb[5].mxu1  ;;  %v3995_v34 = vmax.f32 %v3693_v20, 0.0  ;;  %v3358_v29 = vsel %vm3333_vm11, %v3293_v31, %v2736_v2  ;;  %v3294_v42 = vsel %vm3268_vm10, %v3229_v47, %v2482_v25  ;;  %v8171_v38 = vld [vmem:[#allocation206_spill] sm:$0xff]  ;;  %v8173_v31 = vld [vmem:[#allocation239_spill] sm:$0xff] }
 0x460   :  { %v3853_v63 = vadd.f32 %v7174_v57, %v3852_v23  ;;  %4061 = vst.msk [vmem:[#allocation3 + $0x28] sm:$0xff] %vm4055_vm13, %v3996_v32  ;;  %4536 = vmatprep.mubr.msk.f32.mxu0 %vm3409_vm12, %v3358_v29  ;;  %v3067_v8 = vsel %vm3008_vm6, %v3002_v44, %v8170_v61  ;;  %v3100_v11 = vsel %vm3073_vm7, %v3035_v9, %v8171_v38  ;;  %v8172_v23 = vld [vmem:[#allocation31_spill] sm:$0xff] }
 0x461   :  { %v4028_v41 = vmax.f32 %v3858_v37, 0.0  ;;  %v2800_v6 = vpop.permute.xlu1 %2799  ;;  %4060 = vst.msk [vmem:[#allocation3 + $0x20] sm:$0xff] %vm4055_vm13, %v3995_v34  ;;  %v4673_v37 = vld [vmem:[#allocation2 + $0x140] sm:$0xff]  ;;  %v3132_v32 = vsel %vm3073_vm7, %v3067_v8, %v8173_v31  ;;  %v4674_v34 = vld [vmem:[#allocation2 + $0x2f0] sm:$0xff] }
 0x462   :  { %v4027_v54 = vmax.f32 %v3853_v63, 0.0  ;;  %v3390_v62 = vsel %vm3333_vm11, %v3325_v19, %v2800_v6  ;;  %v2738_v17 = vpop.permute.xlu0 %2737  ;;  %v2906_v51 = vsel %vm15_vm0, %v4673_v37, %v8172_v23  ;;  %v8174_v63 = vld [vmem:[#allocation269_spill] sm:$0xff]  ;;  %v3197_v56 = vsel %vm3138_vm8, %v3132_v32, %v8177_v0 }
 0x463   :  { %4093 = vst.msk [vmem:[#allocation3 + $0x128] sm:$0xff] %vm4055_vm13, %v4028_v41  ;;  %4584 = vmatprep.mubr.msk.f32.mxu1 %vm3409_vm12, %v3390_v62  ;;  %v3359_v43 = vsel %vm3333_vm11, %v3294_v42, %v2738_v17  ;;  %v3165_v2 = vsel %vm3138_vm8, %v3100_v11, %v8174_v63  ;;  %v8175_v41 = vld [vmem:[#allocation60_spill] sm:$0xff]  ;;  %v8176_v6 = vld [vmem:[#allocation89_spill] sm:$0xff] }
 0x464   :  { %4092 = vst.msk [vmem:[#allocation3 + $0x120] sm:$0xff] %vm4055_vm13, %v4027_v54  ;;  %4537 = vmatmul.mubr.msk.f32.gmra.mrb[24].mxu0 %vm3409_vm12, %v3359_v43  ;;  %v2938_v29 = vsel %vm15_vm0, %v4674_v34, %v8175_v41  ;;  %v2971_v22 = vsel %vm2943_vm5, %v2906_v51, %v8176_v6  ;;  %v8178_v54 = vld [vmem:[#allocation118_spill] sm:$0xff]  ;;  %v8180_v17 = vld [vmem:[#allocation177_spill] sm:$0xff]  ;;  %v8181_v43 = vld [vmem:[#allocation207_spill] sm:$0xff] }
 0x465   :  { %v2802_v33 = vpop.permute.xlu1 %2801  ;;  %v3003_v62 = vsel %vm2943_vm5, %v2938_v29, %v8178_v54  ;;  %v3036_v4 = vsel %vm3008_vm6, %v2971_v22, %v8179_v10  ;;  %v4675_v0 = vld [vmem:[#allocation2 + $0x150] sm:$0xff] }
 0x466   :  { %v3391_v30 = vsel %vm3333_vm11, %v3326_v24, %v2802_v33  ;;  %v2228_v28 = vpop.permute.xlu0 %2227  ;;  %v3068_v24 = vsel %vm3008_vm6, %v3003_v62, %v8180_v17  ;;  %v3101_v33 = vsel %vm3073_vm7, %v3036_v4, %v8181_v43  ;;  %v4676_v62 = vld [vmem:[#allocation2 + $0x300] sm:$0xff]  ;;  %v8186_v10 = vld [vmem:[#allocation61_spill] sm:$0xff] }
 0x467   :  { %4585 = vmatmul.mubr.msk.f32.gmra.mrb[24].mxu1 %vm3409_vm12, %v3391_v30  ;;  %v3230_v15 = vsel %vm3203_vm9, %v3165_v2, %v2228_v28  ;;  %v3133_v49 = vsel %vm3073_vm7, %v3068_v24, %v8182_v53  ;;  %v2939_v4 = vsel %vm15_vm0, %v4676_v62, %v8186_v10  ;;  %v8189_v24 = vld [vmem:[#allocation148_spill] sm:$0xff] }
 0x468   :  { %v4154_v35 = vld [vmem:[#allocation3 + $0x21] ss:$2 sm:$0xff] }
 0x469   :  { %v2292_v45 = vpop.permute.xlu1 %2291 }
 0x46a   :  { %v2230_v46 = vpop.permute.xlu0 %2229  ;;  %v3262_v47 = vsel %vm3203_vm9, %v3197_v56, %v2292_v45  ;;  %v8183_v45 = vld [vmem:[#allocation270_spill] sm:$0xff]  ;;  %v8185_v56 = vld [vmem:[#allocation32_spill] sm:$0xff] }
 0x46b   :  { %v4138_v58 = vld [vmem:[#allocation3 + $0x120] ss:$2 sm:$0xff] }
 0x46d   :  { %v2294_v52 = vpop.permute.xlu1 %2293 }
 0x46e   :  { %v2484_v60 = vpop.permute.xlu0 %2483 }
 0x46f   :  { %v4511_v1 = vpop.f32.mrb[6].mxu0  ;;  %v3295_v16 = vsel %vm3268_vm10, %v3230_v15, %v2484_v60  ;;  %v3166_v60 = vsel %vm3138_vm8, %v3101_v33, %v8183_v45  ;;  %v2907_v15 = vsel %vm15_vm0, %v4675_v0, %v8185_v56  ;;  %v4677_v45 = vld [vmem:[#allocation2 + $0x158] sm:$0xff] }
 0x470   :  { %v3708_v48 = vadd.f32 %v4511_v1, %v7174_v57  ;;  %v3702_v25 = vpop.f32.mrb[7].mxu0 }
 0x471   :  { %v2548_v13 = vpop.permute.xlu1 %2547  ;;  %v3703_v21 = vadd.f32 %v7174_v57, %v3702_v25 }
 0x472   :  { %v4559_v27 = vpop.f32.mrb[6].mxu1  ;;  %v3998_v3 = vmax.f32 %v3708_v48, 0.0  ;;  %v2486_v7 = vpop.permute.xlu0 %2485  ;;  %v3327_v30 = vsel %vm3268_vm10, %v3262_v47, %v2548_v13  ;;  %v8184_v48 = vld [vmem:[#allocation290_spill] sm:$0xff]  ;;  %v4122_v13 = vld [vmem:[#allocation3 + $0x20] ss:$2 sm:$0xff] }
 0x473   :  { %v3868_v12 = vadd.f32 %v4559_v27, %v7174_v57  ;;  %v3862_v5 = vpop.f32.mrb[7].mxu1  ;;  %v3997_v39 = vmax.f32 %v3703_v21, 0.0  ;;  %v3198_v25 = vsel %vm3138_vm8, %v3133_v49, %v8184_v48  ;;  %v3231_v27 = vsel %vm3203_vm9, %v3166_v60, %v2230_v46  ;;  %v4170_v21 = vld [vmem:[#allocation3 + $0x121] ss:$2 sm:$0xff]  ;;  %v8187_v47 = vld [vmem:[#allocation90_spill] sm:$0xff]  ;;  %v8192_v60 = vld [vmem:[#allocation33_spill] sm:$0xff] }
 0x474   :  { %v3863_v26 = vadd.f32 %v7174_v57, %v3862_v5  ;;  %4063 = vst.msk [vmem:[#allocation3 + $0x38] sm:$0xff] %vm4055_vm13, %v3998_v3  ;;  %v3263_v36 = vsel %vm3203_vm9, %v3198_v25, %v2294_v52  ;;  %v3296_v14 = vsel %vm3268_vm10, %v3231_v27, %v2486_v7  ;;  %v4248_v9 = vmax.f32 %v4122_v13, %v4154_v35  ;;  %v8193_v48 = vld [vmem:[#allocation241_spill] sm:$0xff]  ;;  %v8194_v27 = vld [vmem:[#allocation271_spill] sm:$0xff]  ;;  %v4678_v35 = vld [vmem:[#allocation2 + $0x308] sm:$0xff] }
 0x475   :  { %v4030_v18 = vmax.f32 %v3868_v12, 0.0  ;;  %v2550_v20 = vpop.permute.xlu1 %2549  ;;  %4062 = vst.msk [vmem:[#allocation3 + $0x30] sm:$0xff] %vm4055_vm13, %v3997_v39  ;;  %v4256_v7 = vmax.f32 %v4138_v58, %v4170_v21  ;;  %v8197_v21 = vld [vmem:[#allocation291_spill] sm:$0xff] }
 0x476   :  { %v4029_v19 = vmax.f32 %v3863_v26, 0.0  ;;  %v2740_v42 = vpop.permute.xlu0 %2739  ;;  %v3328_v12 = vsel %vm3268_vm10, %v3263_v36, %v2550_v20  ;;  %v8195_v36 = vld [vmem:[#allocation62_spill] sm:$0xff] }
 0x477   :  { %4095 = vst.msk [vmem:[#allocation3 + $0x138] sm:$0xff] %vm4055_vm13, %v4030_v18  ;;  %v3360_v28 = vsel %vm3333_vm11, %v3295_v16, %v2740_v42  ;;  %v2972_v16 = vsel %vm2943_vm5, %v2907_v15, %v8187_v47  ;;  %v8188_v42 = vld [vmem:[#allocation119_spill] sm:$0xff] }
 0x478   :  { %4094 = vst.msk [vmem:[#allocation3 + $0x130] sm:$0xff] %vm4055_vm13, %v4029_v19  ;;  %4539 = vmatprep.mubr.msk.f32.mxu0 %vm3409_vm12, %v3360_v28  ;;  %v3004_v17 = vsel %vm2943_vm5, %v2939_v4, %v8188_v42  ;;  %v3037_v43 = vsel %vm3008_vm6, %v2972_v16, %v8189_v24 }
 0x479   :  { %v2804_v1 = vpop.permute.xlu1 %2803 }
 0x47a   :  { %v3392_v40 = vsel %vm3333_vm11, %v3327_v30, %v2804_v1  ;;  %v2742_v50 = vpop.permute.xlu0 %2741  ;;  %v8190_v30 = vld [vmem:[#allocation178_spill] sm:$0xff]  ;;  %v8191_v1 = vld [vmem:[#allocation208_spill] sm:$0xff] }
 0x47b   :  { %4587 = vmatprep.mubr.msk.f32.mxu1 %vm3409_vm12, %v3392_v40  ;;  %v3361_v5 = vsel %vm3333_vm11, %v3296_v14, %v2742_v50  ;;  %v3069_v28 = vsel %vm3008_vm6, %v3004_v17, %v8190_v30  ;;  %v3102_v53 = vsel %vm3073_vm7, %v3037_v43, %v8191_v1  ;;  %v2908_v40 = vsel %vm15_vm0, %v4677_v45, %v8192_v60  ;;  %v8196_v50 = vld [vmem:[#allocation91_spill] sm:$0xff]  ;;  %v8205_v45 = vld [vmem:[#allocation34_spill] sm:$0xff] }
 0x47c   :  { %v4186_v44 = vld [vmem:[#allocation3 + $0x30] ss:$2 sm:$0xff]  ;;  %v4218_v59 = vld [vmem:[#allocation3 + $0x31] ss:$2 sm:$0xff]  ;;  %4540 = vmatmul.mubr.msk.f32.gmra.mrb[26].mxu0 %vm3409_vm12, %v3361_v5  ;;  %v3134_v25 = vsel %vm3073_vm7, %v3069_v28, %v8193_v48  ;;  %v3167_v13 = vsel %vm3138_vm8, %v3102_v53, %v8194_v27  ;;  %v2940_v14 = vsel %vm15_vm0, %v4678_v35, %v8195_v36  ;;  %v2973_v58 = vsel %vm2943_vm5, %v2908_v40, %v8196_v50  ;;  %v8206_v48 = vld [vmem:[#allocation63_spill] sm:$0xff] }
 0x47d   :  { %v2806_v55 = vpop.permute.xlu1 %2805  ;;  %v4264_v3 = vmax.f32 %v4186_v44, %v4218_v59  ;;  %v8199_v59 = vld [vmem:[#allocation149_spill] sm:$0xff]  ;;  %v4680_v40 = vld [vmem:[#allocation2 + $0x318] sm:$0xff]  ;;  %v8207_v27 = vld [vmem:[#allocation92_spill] sm:$0xff] }
 0x47e   :  { %v3393_v46 = vsel %vm3333_vm11, %v3328_v12, %v2806_v55  ;;  %v2232_v8 = vpop.permute.xlu0 %2231  ;;  %v3199_v12 = vsel %vm3138_vm8, %v3134_v25, %v8197_v21  ;;  %v8198_v55 = vld [vmem:[#allocation120_spill] sm:$0xff]  ;;  %v2941_v25 = vsel %vm15_vm0, %v4680_v40, %v8206_v48  ;;  %v4681_v35 = vld [vmem:[#allocation2 + $0x170] sm:$0xff]  ;;  %v8208_v36 = vld [vmem:[#allocation35_spill] sm:$0xff] }
 0x47f   :  { %v4202_v26 = vld [vmem:[#allocation3 + $0x130] ss:$2 sm:$0xff]  ;;  %v4234_v52 = vld [vmem:[#allocation3 + $0x131] ss:$2 sm:$0xff]  ;;  %4588 = vmatmul.mubr.msk.f32.gmra.mrb[26].mxu1 %vm3409_vm12, %v3393_v46  ;;  %v4280_v38 = vmax.f32 %v4248_v9, %v4264_v3  ;;  %v3232_v5 = vsel %vm3203_vm9, %v3167_v13, %v2232_v8  ;;  %v3005_v44 = vsel %vm2943_vm5, %v2940_v14, %v8198_v55  ;;  %v3038_v46 = vsel %vm3008_vm6, %v2973_v58, %v8199_v59  ;;  %v4682_v50 = vld [vmem:[#allocation2 + $0x320] sm:$0xff] }
 0x480   :  { %v4272_v61 = vmax.f32 %v4202_v26, %v4234_v52  ;;  %v8200_v52 = vld [vmem:[#allocation179_spill] sm:$0xff]  ;;  %v2910_v14 = vsel %vm15_vm0, %v4681_v35, %v8208_v36  ;;  %v8209_v58 = vld [vmem:[#allocation64_spill] sm:$0xff]  ;;  %v8211_v55 = vld [vmem:[#allocation150_spill] sm:$0xff] }
 0x481   :  { %v2296_v11 = vpop.permute.xlu1 %2295  ;;  %4296 = vst.msk [vmem:[#allocation4 + $0x8] sm:$0xff] %vm4055_vm13, %v4280_v38  ;;  %v2942_v21 = vsel %vm15_vm0, %v4682_v50, %v8209_v58  ;;  %v8223_v48 = vld [vmem:[#allocation274_spill] sm:$0xff] }
 0x482   :  { %v4288_v39 = vmax.f32 %v4256_v7, %v4272_v61  ;;  %v2234_v18 = vpop.permute.xlu0 %2233  ;;  %v3264_v9 = vsel %vm3203_vm9, %v3199_v12, %v2296_v11  ;;  %v3070_v7 = vsel %vm3008_vm6, %v3005_v44, %v8200_v52  ;;  %v8201_v61 = vld [vmem:[#allocation209_spill] sm:$0xff]  ;;  %v8213_v52 = vld [vmem:[#allocation122_spill] sm:$0xff] }
 0x483   :  { %v4514_v37 = vpop.f32.mrb[8].mxu0  ;;  %v3103_v38 = vsel %vm3073_vm7, %v3038_v46, %v8201_v61  ;;  %v8210_v12 = vld [vmem:[#allocation121_spill] sm:$0xff]  ;;  %v8214_v61 = vld [vmem:[#allocation180_spill] sm:$0xff] }
 0x484   :  { %4304 = vst.msk [vmem:[#allocation4 + $0x48] sm:$0xff] %vm4055_vm13, %v4288_v39  ;;  %v3718_v23 = vadd.f32 %v4514_v37, %v7174_v57  ;;  %v3712_v51 = vpop.f32.mrb[9].mxu0 }
 0x485   :  { %v2298_v20 = vpop.permute.xlu1 %2297  ;;  %v3713_v32 = vadd.f32 %v7174_v57, %v3712_v51 }
 0x486   :  { %v4562_v31 = vpop.f32.mrb[8].mxu1  ;;  %v4000_v19 = vmax.f32 %v3718_v23, 0.0  ;;  %v2488_v41 = vpop.permute.xlu0 %2487  ;;  %v8202_v23 = vld [vmem:[#allocation242_spill] sm:$0xff] }
 0x487   :  { %v3878_v63 = vadd.f32 %v4562_v31, %v7174_v57  ;;  %v3872_v2 = vpop.f32.mrb[9].mxu1  ;;  %v3999_v29 = vmax.f32 %v3713_v32, 0.0  ;;  %v3297_v3 = vsel %vm3268_vm10, %v3232_v5, %v2488_v41  ;;  %v3135_v51 = vsel %vm3073_vm7, %v3070_v7, %v8202_v23  ;;  %v8203_v31 = vld [vmem:[#allocation272_spill] sm:$0xff] }
 0x488   :  { %v3873_v34 = vadd.f32 %v7174_v57, %v3872_v2  ;;  %4065 = vst.msk [vmem:[#allocation3 + $0x48] sm:$0xff] %vm4055_vm13, %v4000_v19  ;;  %v3168_v11 = vsel %vm3138_vm8, %v3103_v38, %v8203_v31  ;;  %v3006_v5 = vsel %vm2943_vm5, %v2941_v25, %v8210_v12  ;;  %v3007_v7 = vsel %vm2943_vm5, %v2942_v21, %v8213_v52  ;;  %v8216_v31 = vld [vmem:[#allocation151_spill] sm:$0xff] }
 0x489   :  { %v4032_v6 = vmax.f32 %v3878_v63, 0.0  ;;  %v2552_v22 = vpop.permute.xlu1 %2551  ;;  %4064 = vst.msk [vmem:[#allocation3 + $0x40] sm:$0xff] %vm4055_vm13, %v3999_v29  ;;  %v8204_v63 = vld [vmem:[#allocation292_spill] sm:$0xff]  ;;  %v3233_v19 = vsel %vm3203_vm9, %v3168_v11, %v2234_v18  ;;  %v3071_v38 = vsel %vm3008_vm6, %v3006_v5, %v8214_v61 }
 0x48a   :  { %v4031_v54 = vmax.f32 %v3873_v34, 0.0  ;;  %v2490_v33 = vpop.permute.xlu0 %2489  ;;  %v3329_v39 = vsel %vm3268_vm10, %v3264_v9, %v2552_v22  ;;  %v3200_v2 = vsel %vm3138_vm8, %v3135_v51, %v8204_v63 }
 0x48b   :  { %4097 = vst.msk [vmem:[#allocation3 + $0x148] sm:$0xff] %vm4055_vm13, %v4032_v6  ;;  %v3265_v34 = vsel %vm3203_vm9, %v3200_v2, %v2298_v20  ;;  %v3298_v41 = vsel %vm3268_vm10, %v3233_v19, %v2490_v33  ;;  %v8218_v2 = vld [vmem:[#allocation243_spill] sm:$0xff] }
 0x48c   :  { %4096 = vst.msk [vmem:[#allocation3 + $0x140] sm:$0xff] %vm4055_vm13, %v4031_v54  ;;  %v3136_v19 = vsel %vm3073_vm7, %v3071_v38, %v8218_v2 }
 0x48d   :  { %v2554_v49 = vpop.permute.xlu1 %2553 }
 0x48e   :  { %v2744_v26 = vpop.permute.xlu0 %2743  ;;  %v3330_v6 = vsel %vm3268_vm10, %v3265_v34, %v2554_v49  ;;  %v4679_v49 = vld [vmem:[#allocation2 + $0x168] sm:$0xff]  ;;  %v8219_v34 = vld [vmem:[#allocation273_spill] sm:$0xff] }
 0x48f   :  { %v3362_v8 = vsel %vm3333_vm11, %v3297_v3, %v2744_v26  ;;  %v2909_v60 = vsel %vm15_vm0, %v4679_v49, %v8205_v45  ;;  %v8212_v3 = vld [vmem:[#allocation93_spill] sm:$0xff] }
 0x490   :  { %4542 = vmatprep.mubr.msk.f32.mxu0 %vm3409_vm12, %v3362_v8  ;;  %v2974_v13 = vsel %vm2943_vm5, %v2909_v60, %v8207_v27  ;;  %v4124_v59 = vld [vmem:[#allocation3 + $0x40] ss:$2 sm:$0xff]  ;;  %v4156_v46 = vld [vmem:[#allocation3 + $0x41] ss:$2 sm:$0xff]  ;;  %v2975_v26 = vsel %vm2943_vm5, %v2910_v14, %v8212_v3 }
 0x491   :  { %v2808_v37 = vpop.permute.xlu1 %2807  ;;  %v3039_v44 = vsel %vm3008_vm6, %v2974_v13, %v8211_v55  ;;  %v3040_v11 = vsel %vm3008_vm6, %v2975_v26, %v8216_v31 }
 0x492   :  { %v3394_v32 = vsel %vm3333_vm11, %v3329_v39, %v2808_v37  ;;  %v2746_v29 = vpop.permute.xlu0 %2745  ;;  %v8215_v39 = vld [vmem:[#allocation210_spill] sm:$0xff] }
 0x493   :  { %4590 = vmatprep.mubr.msk.f32.mxu1 %vm3409_vm12, %v3394_v32  ;;  %v3363_v22 = vsel %vm3333_vm11, %v3298_v41, %v2746_v29  ;;  %v3104_v8 = vsel %vm3073_vm7, %v3039_v44, %v8215_v39  ;;  %v4140_v37 = vld [vmem:[#allocation3 + $0x140] ss:$2 sm:$0xff]  ;;  %v4172_v23 = vld [vmem:[#allocation3 + $0x141] ss:$2 sm:$0xff]  ;;  %v8217_v32 = vld [vmem:[#allocation181_spill] sm:$0xff] }
 0x494   :  { %4543 = vmatmul.mubr.msk.f32.gmra.mrb[28].mxu0 %vm3409_vm12, %v3363_v22  ;;  %v3072_v63 = vsel %vm3008_vm6, %v3007_v7, %v8217_v32  ;;  %v3169_v41 = vsel %vm3138_vm8, %v3104_v8, %v8219_v34  ;;  %v8220_v22 = vld [vmem:[#allocation293_spill] sm:$0xff] }
 0x495   :  { %v2810_v0 = vpop.permute.xlu1 %2809 }
 0x496   :  { %v3395_v56 = vsel %vm3333_vm11, %v3330_v6, %v2810_v0  ;;  %v2236_v15 = vpop.permute.xlu0 %2235  ;;  %v3201_v0 = vsel %vm3138_vm8, %v3136_v19, %v8220_v22 }
 0x497   :  { %4591 = vmatmul.mubr.msk.f32.gmra.mrb[28].mxu1 %vm3409_vm12, %v3395_v56  ;;  %v4517_v54 = vpop.f32.mrb[10].mxu0  ;;  %v4249_v56 = vmax.f32 %v4124_v59, %v4156_v46 }
 0x498   :  { %v3728_v62 = vadd.f32 %v4517_v54, %v7174_v57  ;;  %v3722_v20 = vpop.f32.mrb[11].mxu0  ;;  %v3234_v54 = vsel %vm3203_vm9, %v3169_v41, %v2236_v15  ;;  %v8222_v15 = vld [vmem:[#allocation244_spill] sm:$0xff] }
 0x499   :  { %v2300_v18 = vpop.permute.xlu1 %2299  ;;  %v3723_v4 = vadd.f32 %v7174_v57, %v3722_v20  ;;  %v3137_v40 = vsel %vm3073_vm7, %v3072_v63, %v8222_v15 }
 0x49a   :  { %v4565_v10 = vpop.f32.mrb[10].mxu1  ;;  %v4002_v42 = vmax.f32 %v3728_v62, 0.0  ;;  %v2238_v24 = vpop.permute.xlu0 %2237 }
 0x49b   :  { %v3888_v47 = vadd.f32 %v4565_v10, %v7174_v57  ;;  %v3882_v16 = vpop.f32.mrb[11].mxu1  ;;  %v4001_v43 = vmax.f32 %v3723_v4, 0.0  ;;  %v4257_v4 = vmax.f32 %v4140_v37, %v4172_v23 }
 0x49c   :  { %v3883_v17 = vadd.f32 %v7174_v57, %v3882_v16  ;;  %4067 = vst.msk [vmem:[#allocation3 + $0x58] sm:$0xff] %vm4055_vm13, %v4002_v42 }
 0x49d   :  { %v4034_v33 = vmax.f32 %v3888_v47, 0.0  ;;  %v2302_v30 = vpop.permute.xlu1 %2301  ;;  %4066 = vst.msk [vmem:[#allocation3 + $0x50] sm:$0xff] %vm4055_vm13, %v4001_v43  ;;  %v3266_v47 = vsel %vm3203_vm9, %v3201_v0, %v2300_v18  ;;  %v8221_v43 = vld [vmem:[#allocation211_spill] sm:$0xff] }
 0x49e   :  { %v4033_v28 = vmax.f32 %v3883_v17, 0.0  ;;  %v2492_v1 = vpop.permute.xlu0 %2491 }
 0x49f   :  { %4099 = vst.msk [vmem:[#allocation3 + $0x158] sm:$0xff] %vm4055_vm13, %v4034_v33  ;;  %v3299_v42 = vsel %vm3268_vm10, %v3234_v54, %v2492_v1  ;;  %v3105_v33 = vsel %vm3073_vm7, %v3040_v11, %v8221_v43  ;;  %v8224_v1 = vld [vmem:[#allocation294_spill] sm:$0xff] }
 0x4a0   :  { %4098 = vst.msk [vmem:[#allocation3 + $0x150] sm:$0xff] %vm4055_vm13, %v4033_v28  ;;  %v3170_v25 = vsel %vm3138_vm8, %v3105_v33, %v8223_v48  ;;  %v3202_v13 = vsel %vm3138_vm8, %v3137_v40, %v8224_v1 }
 0x4a1   :  { %v2556_v53 = vpop.permute.xlu1 %2555  ;;  %v3267_v35 = vsel %vm3203_vm9, %v3202_v13, %v2302_v30 }
 0x4a2   :  { %v2494_v9 = vpop.permute.xlu0 %2493  ;;  %v3331_v49 = vsel %vm3268_vm10, %v3266_v47, %v2556_v53  ;;  %v3235_v53 = vsel %vm3203_vm9, %v3170_v25, %v2238_v24 }
 0x4a3   :  { %v3300_v36 = vsel %vm3268_vm10, %v3235_v53, %v2494_v9 }
 0x4a4   :  { %v4188_v29 = vld [vmem:[#allocation3 + $0x50] ss:$2 sm:$0xff]  ;;  %v4220_v6 = vld [vmem:[#allocation3 + $0x51] ss:$2 sm:$0xff] }
 0x4a5   :  { %v2558_v51 = vpop.permute.xlu1 %2557  ;;  %v4265_v62 = vmax.f32 %v4188_v29, %v4220_v6 }
 0x4a6   :  { %v2748_v17 = vpop.permute.xlu0 %2747  ;;  %v3332_v50 = vsel %vm3268_vm10, %v3267_v35, %v2558_v51 }
 0x4a7   :  { %v4204_v20 = vld [vmem:[#allocation3 + $0x150] ss:$2 sm:$0xff]  ;;  %v4236_v10 = vld [vmem:[#allocation3 + $0x151] ss:$2 sm:$0xff]  ;;  %v4281_v28 = vmax.f32 %v4249_v56, %v4265_v62  ;;  %v3364_v45 = vsel %vm3333_vm11, %v3299_v42, %v2748_v17 }
 0x4a8   :  { %v4273_v16 = vmax.f32 %v4204_v20, %v4236_v10  ;;  %4545 = vmatprep.mubr.msk.f32.mxu0 %vm3409_vm12, %v3364_v45 }
 0x4a9   :  { %v2812_v60 = vpop.permute.xlu1 %2811  ;;  %4297 = vst.msk [vmem:[#allocation4 + $0x10] sm:$0xff] %vm4055_vm13, %v4281_v28 }
 0x4aa   :  { %v4289_v18 = vmax.f32 %v4257_v4, %v4273_v16  ;;  %v3396_v27 = vsel %vm3333_vm11, %v3331_v49, %v2812_v60  ;;  %v2750_v14 = vpop.permute.xlu0 %2749 }
 0x4ab   :  { %4593 = vmatprep.mubr.msk.f32.mxu1 %vm3409_vm12, %v3396_v27  ;;  %v3365_v58 = vsel %vm3333_vm11, %v3300_v36, %v2750_v14  ;;  %v4520_v12 = vpop.f32.mrb[12].mxu0 }
 0x4ac   :  { %4305 = vst.msk [vmem:[#allocation4 + $0x50] sm:$0xff] %vm4055_vm13, %v4289_v18  ;;  %v3738_v55 = vadd.f32 %v4520_v12, %v7174_v57  ;;  %v3732_v24 = vpop.f32.mrb[13].mxu0  ;;  %4546 = vmatmul.mubr.msk.f32.gmra.mrb[30].mxu0 %vm3409_vm12, %v3365_v58 }
 0x4ad   :  { %v2814_v21 = vpop.permute.xlu1 %2813  ;;  %v3733_v59 = vadd.f32 %v7174_v57, %v3732_v24 }
 0x4ae   :  { %v3397_v5 = vsel %vm3333_vm11, %v3332_v50, %v2814_v21  ;;  %v4568_v44 = vpop.f32.mrb[12].mxu1  ;;  %v4004_v9 = vmax.f32 %v3738_v55, 0.0 }
 0x4af   :  { %v3898_v30 = vadd.f32 %v4568_v44, %v7174_v57  ;;  %v3892_v46 = vpop.f32.mrb[13].mxu1  ;;  %4594 = vmatmul.mubr.msk.f32.gmra.mrb[30].mxu1 %vm3409_vm12, %v3397_v5  ;;  %v4003_v26 = vmax.f32 %v3733_v59, 0.0 }
 0x4b0   :  { %v3893_v3 = vadd.f32 %v7174_v57, %v3892_v46  ;;  %4069 = vst.msk [vmem:[#allocation3 + $0x68] sm:$0xff] %vm4055_vm13, %v4004_v9 }
 0x4b1   :  { %v4036_v52 = vmax.f32 %v3898_v30, 0.0  ;;  %4068 = vst.msk [vmem:[#allocation3 + $0x60] sm:$0xff] %vm4055_vm13, %v4003_v26 }
 0x4b2   :  { %v4035_v7 = vmax.f32 %v3893_v3, 0.0 }
 0x4b3   :  { %4101 = vst.msk [vmem:[#allocation3 + $0x168] sm:$0xff] %vm4055_vm13, %v4036_v52 }
 0x4b4   :  { %4100 = vst.msk [vmem:[#allocation3 + $0x160] sm:$0xff] %vm4055_vm13, %v4035_v7 }
 0x4b8   :  { %v4126_v19 = vld [vmem:[#allocation3 + $0x60] ss:$2 sm:$0xff]  ;;  %v4158_v34 = vld [vmem:[#allocation3 + $0x61] ss:$2 sm:$0xff] }
 0x4b9   :  { %v4250_v0 = vmax.f32 %v4126_v19, %v4158_v34 }
 0x4bb   :  { %v4142_v41 = vld [vmem:[#allocation3 + $0x160] ss:$2 sm:$0xff]  ;;  %v4174_v29 = vld [vmem:[#allocation3 + $0x161] ss:$2 sm:$0xff] }
 0x4bc   :  { %v4258_v20 = vmax.f32 %v4142_v41, %v4174_v29  ;;  %v7574_v41 = vld [vmem:[%s7636_s2] ss:$0 sm:$0xff]  ;;  %s4718_s2 = smov [#allocation4]  }
 0x4bd   :  { %s4316_s25 = sshll.u32 %s4718_s2, 4  ;;  %s4317_s25 = int_to_ptr.vmem [resolvable:$true] %s4316_s25 }
 0x4be   :  { %s4684_s26 = scalar_lea.vmem %s4317_s25, 2048  ;;  %p4689_p1 = scmp.lt.s32.totalorder %s4317_s25, %s4317_s25 }
 0x4bf   :  { %v4523_v61 = vpop.f32.mrb[14].mxu0  ;;  %p4685_p0 = scmp.ne.s32.totalorder %s4317_s25, %s4684_s26  ;;  %p4690_p2 = scmp.lt.s32.totalorder %s4684_s26, %s4684_s26 }
 0x4c0   :  { %v3748_v38 = vadd.f32 %v4523_v61, %v7174_v57  ;;  %v3742_v39 = vpop.f32.mrb[15].mxu0 }
 0x4c1   :  { %v3743_v37 = vadd.f32 %v7174_v57, %v3742_v39  ;;  %p4691_p3 = por %p4690_p2, %p4689_p1 }
 0x4c2   :  { %v4571_v8 = vpop.f32.mrb[14].mxu1  ;;  %v4006_v31 = vmax.f32 %v3748_v38, 0.0 }
 0x4c3   :  { %v3908_v23 = vadd.f32 %v4571_v8, %v7174_v57  ;;  %v3902_v51 = vpop.f32.mrb[15].mxu1  ;;  %v4005_v32 = vmax.f32 %v3743_v37, 0.0  ;;  %p4692_p4 = pnand %p4691_p3, %p4685_p0 }
 0x4c4   :  { %v3903_v11 = vadd.f32 %v7174_v57, %v3902_v51  ;;  %4071 = vst.msk [vmem:[#allocation3 + $0x78] sm:$0xff] %vm4055_vm13, %v4006_v31 }
 0x4c5   :  { %v4038_v63 = vmax.f32 %v3908_v23, 0.0  ;;  %4070 = vst.msk [vmem:[#allocation3 + $0x70] sm:$0xff] %vm4055_vm13, %v4005_v32 }
 0x4c6   :  { %v4037_v2 = vmax.f32 %v3903_v11, 0.0 }
 0x4c7   :  { %4103 = vst.msk [vmem:[#allocation3 + $0x178] sm:$0xff] %vm4055_vm13, %v4038_v63 }
 0x4c8   :  { %4102 = vst.msk [vmem:[#allocation3 + $0x170] sm:$0xff] %vm4055_vm13, %v4037_v2 }
 0x4cc   :  { %v4190_v6 = vld [vmem:[#allocation3 + $0x70] ss:$2 sm:$0xff]  ;;  %v4222_v22 = vld [vmem:[#allocation3 + $0x71] ss:$2 sm:$0xff] }
 0x4cd   :  { %v4266_v56 = vmax.f32 %v4190_v6, %v4222_v22 }
 0x4cf   :  { %v4206_v54 = vld [vmem:[#allocation3 + $0x170] ss:$2 sm:$0xff]  ;;  %v4238_v62 = vld [vmem:[#allocation3 + $0x171] ss:$2 sm:$0xff]  ;;  %v4282_v4 = vmax.f32 %v4250_v0, %v4266_v56 }
 0x4d0   :  { %v4274_v10 = vmax.f32 %v4206_v54, %v4238_v62 }
 0x4d1   :  { %4298 = vst.msk [vmem:[#allocation4 + $0x18] sm:$0xff] %vm4055_vm13, %v4282_v4 }
 0x4d2   :  { %v4290_v47 = vmax.f32 %v4258_v20, %v4274_v10 }
 0x4d4   :  { %4306 = vst.msk [vmem:[#allocation4 + $0x58] sm:$0xff] %vm4055_vm13, %v4290_v47 }
 0x4d7   :  { %v4526_v16 = vpop.f32.mrb[16].mxu0 }
 0x4d8   :  { %v3758_v42 = vadd.f32 %v4526_v16, %v7174_v57  ;;  %v3752_v17 = vpop.f32.mrb[17].mxu0 }
 0x4d9   :  { %v3753_v33 = vadd.f32 %v7174_v57, %v3752_v17 }
 0x4da   :  { %v4574_v43 = vpop.f32.mrb[16].mxu1  ;;  %v4008_v45 = vmax.f32 %v3758_v42, 0.0 }
 0x4db   :  { %v3918_v28 = vadd.f32 %v4574_v43, %v7174_v57  ;;  %v3912_v49 = vpop.f32.mrb[17].mxu1  ;;  %v4007_v15 = vmax.f32 %v3753_v33, 0.0 }
 0x4dc   :  { %v3913_v60 = vadd.f32 %v7174_v57, %v3912_v49  ;;  %4073 = vst.msk [vmem:[#allocation3 + $0x88] sm:$0xff] %vm4055_vm13, %v4008_v45 }
 0x4dd   :  { %v4040_v40 = vmax.f32 %v3918_v28, 0.0  ;;  %4072 = vst.msk [vmem:[#allocation3 + $0x80] sm:$0xff] %vm4055_vm13, %v4007_v15 }
 0x4de   :  { %v4039_v48 = vmax.f32 %v3913_v60, 0.0 }
 0x4df   :  { %4105 = vst.msk [vmem:[#allocation3 + $0x188] sm:$0xff] %vm4055_vm13, %v4040_v40 }
 0x4e0   :  { %4104 = vst.msk [vmem:[#allocation3 + $0x180] sm:$0xff] %vm4055_vm13, %v4039_v48 }
 0x4e4   :  { %v4128_v12 = vld [vmem:[#allocation3 + $0x80] ss:$2 sm:$0xff]  ;;  %v4160_v5 = vld [vmem:[#allocation3 + $0x81] ss:$2 sm:$0xff] }
 0x4e5   :  { %v4251_v30 = vmax.f32 %v4128_v12, %v4160_v5 }
 0x4e7   :  { %v4144_v55 = vld [vmem:[#allocation3 + $0x180] ss:$2 sm:$0xff]  ;;  %v4176_v24 = vld [vmem:[#allocation3 + $0x181] ss:$2 sm:$0xff] }
 0x4e8   :  { %v4259_v26 = vmax.f32 %v4144_v55, %v4176_v24 }
 0x4ef   :  { %v4529_v25 = vpop.f32.mrb[18].mxu0 }
 0x4f0   :  { %v3768_v18 = vadd.f32 %v4529_v25, %v7174_v57  ;;  %v3762_v27 = vpop.f32.mrb[19].mxu0 }
 0x4f1   :  { %v3763_v13 = vadd.f32 %v7174_v57, %v3762_v27 }
 0x4f2   :  { %v4577_v1 = vpop.f32.mrb[18].mxu1  ;;  %v4010_v36 = vmax.f32 %v3768_v18, 0.0 }
 0x4f3   :  { %v3928_v53 = vadd.f32 %v4577_v1, %v7174_v57  ;;  %v3922_v35 = vpop.f32.mrb[19].mxu1  ;;  %v4009_v50 = vmax.f32 %v3763_v13, 0.0 }
 0x4f4   :  { %v3923_v14 = vadd.f32 %v7174_v57, %v3922_v35  ;;  %4075 = vst.msk [vmem:[#allocation3 + $0x98] sm:$0xff] %vm4055_vm13, %v4010_v36 }
 0x4f5   :  { %v4042_v58 = vmax.f32 %v3928_v53, 0.0  ;;  %4074 = vst.msk [vmem:[#allocation3 + $0x90] sm:$0xff] %vm4055_vm13, %v4009_v50 }
 0x4f6   :  { %v4041_v21 = vmax.f32 %v3923_v14, 0.0 }
 0x4f7   :  { %4107 = vst.msk [vmem:[#allocation3 + $0x198] sm:$0xff] %vm4055_vm13, %v4042_v58 }
 0x4f8   :  { %4106 = vst.msk [vmem:[#allocation3 + $0x190] sm:$0xff] %vm4055_vm13, %v4041_v21 }
 0x4fc   :  { %v4192_v44 = vld [vmem:[#allocation3 + $0x90] ss:$2 sm:$0xff]  ;;  %v4224_v59 = vld [vmem:[#allocation3 + $0x91] ss:$2 sm:$0xff] }
 0x4fd   :  { %v4267_v46 = vmax.f32 %v4192_v44, %v4224_v59 }
 0x4ff   :  { %v4208_v9 = vld [vmem:[#allocation3 + $0x190] ss:$2 sm:$0xff]  ;;  %v4240_v3 = vld [vmem:[#allocation3 + $0x191] ss:$2 sm:$0xff]  ;;  %v4283_v7 = vmax.f32 %v4251_v30, %v4267_v46 }
 0x500   :  { %v4275_v52 = vmax.f32 %v4208_v9, %v4240_v3 }
 0x501   :  { %4299 = vst.msk [vmem:[#allocation4 + $0x20] sm:$0xff] %vm4055_vm13, %v4283_v7 }
 0x502   :  { %v4291_v61 = vmax.f32 %v4259_v26, %v4275_v52 }
 0x504   :  { %4307 = vst.msk [vmem:[#allocation4 + $0x60] sm:$0xff] %vm4055_vm13, %v4291_v61 }
 0x507   :  { %v4532_v38 = vpop.f32.mrb[20].mxu0 }
 0x508   :  { %v3778_v39 = vadd.f32 %v4532_v38, %v7174_v57  ;;  %v3772_v8 = vpop.f32.mrb[21].mxu0 }
 0x509   :  { %v3773_v23 = vadd.f32 %v7174_v57, %v3772_v8 }
 0x50a   :  { %v4580_v37 = vpop.f32.mrb[20].mxu1  ;;  %v4012_v11 = vmax.f32 %v3778_v39, 0.0 }
 0x50b   :  { %v3938_v51 = vadd.f32 %v4580_v37, %v7174_v57  ;;  %v3932_v31 = vpop.f32.mrb[21].mxu1  ;;  %v4011_v63 = vmax.f32 %v3773_v23, 0.0 }
 0x50c   :  { %v3933_v32 = vadd.f32 %v7174_v57, %v3932_v31  ;;  %4077 = vst.msk [vmem:[#allocation3 + $0xa8] sm:$0xff] %vm4055_vm13, %v4012_v11 }
 0x50d   :  { %v4044_v2 = vmax.f32 %v3938_v51, 0.0  ;;  %4076 = vst.msk [vmem:[#allocation3 + $0xa0] sm:$0xff] %vm4055_vm13, %v4011_v63 }
 0x50e   :  { %v4043_v19 = vmax.f32 %v3933_v32, 0.0 }
 0x50f   :  { %4109 = vst.msk [vmem:[#allocation3 + $0x1a8] sm:$0xff] %vm4055_vm13, %v4044_v2 }
 0x510   :  { %4108 = vst.msk [vmem:[#allocation3 + $0x1a0] sm:$0xff] %vm4055_vm13, %v4043_v19 }
 0x514   :  { %v4130_v47 = vld [vmem:[#allocation3 + $0xa0] ss:$2 sm:$0xff]  ;;  %v4162_v16 = vld [vmem:[#allocation3 + $0xa1] ss:$2 sm:$0xff] }
 0x515   :  { %v4252_v28 = vmax.f32 %v4130_v47, %v4162_v16 }
 0x517   :  { %v4146_v42 = vld [vmem:[#allocation3 + $0x1a0] ss:$2 sm:$0xff]  ;;  %v4178_v17 = vld [vmem:[#allocation3 + $0x1a1] ss:$2 sm:$0xff] }
 0x518   :  { %v4260_v15 = vmax.f32 %v4146_v42, %v4178_v17 }
 0x51f   :  { %v4535_v34 = vpop.f32.mrb[22].mxu0 }
 0x520   :  { %v3788_v29 = vadd.f32 %v7574_v41, %v4535_v34  ;;  %v3782_v57 = vpop.f32.mrb[23].mxu0 }
 0x521   :  { %v3783_v22 = vadd.f32 %v7574_v41, %v3782_v57 }
 0x522   :  { %v4583_v6 = vpop.f32.mrb[22].mxu1  ;;  %v4014_v54 = vmax.f32 %v3788_v29, 0.0 }
 0x523   :  { %v3948_v0 = vadd.f32 %v7574_v41, %v4583_v6  ;;  %v3942_v56 = vpop.f32.mrb[23].mxu1  ;;  %v4013_v20 = vmax.f32 %v3783_v22, 0.0 }
 0x524   :  { %v3943_v62 = vadd.f32 %v7574_v41, %v3942_v56  ;;  %4079 = vst.msk [vmem:[#allocation3 + $0xb8] sm:$0xff] %vm4055_vm13, %v4014_v54 }
 0x525   :  { %v4046_v10 = vmax.f32 %v3948_v0, 0.0  ;;  %4078 = vst.msk [vmem:[#allocation3 + $0xb0] sm:$0xff] %vm4055_vm13, %v4013_v20 }
 0x526   :  { %v4045_v4 = vmax.f32 %v3943_v62, 0.0 }
 0x527   :  { %4111 = vst.msk [vmem:[#allocation3 + $0x1b8] sm:$0xff] %vm4055_vm13, %v4046_v10 }
 0x528   :  { %4110 = vst.msk [vmem:[#allocation3 + $0x1b0] sm:$0xff] %vm4055_vm13, %v4045_v4 }
 0x52c   :  { %v4194_v43 = vld [vmem:[#allocation3 + $0xb0] ss:$2 sm:$0xff]  ;;  %v4226_v33 = vld [vmem:[#allocation3 + $0xb1] ss:$2 sm:$0xff] }
 0x52d   :  { %v4268_v49 = vmax.f32 %v4194_v43, %v4226_v33 }
 0x52f   :  { %v4210_v45 = vld [vmem:[#allocation3 + $0x1b0] ss:$2 sm:$0xff]  ;;  %v4242_v60 = vld [vmem:[#allocation3 + $0x1b1] ss:$2 sm:$0xff]  ;;  %v4284_v48 = vmax.f32 %v4252_v28, %v4268_v49 }
 0x530   :  { %v4276_v40 = vmax.f32 %v4210_v45, %v4242_v60 }
 0x531   :  { %4300 = vst.msk [vmem:[#allocation4 + $0x28] sm:$0xff] %vm4055_vm13, %v4284_v48 }
 0x532   :  { %v4292_v25 = vmax.f32 %v4260_v15, %v4276_v40 }
 0x534   :  { %4308 = vst.msk [vmem:[#allocation4 + $0x68] sm:$0xff] %vm4055_vm13, %v4292_v25 }
 0x537   :  { %v4538_v18 = vpop.f32.mrb[24].mxu0 }
 0x538   :  { %v3798_v27 = vadd.f32 %v7574_v41, %v4538_v18  ;;  %v3792_v1 = vpop.f32.mrb[25].mxu0 }
 0x539   :  { %v3793_v53 = vadd.f32 %v7574_v41, %v3792_v1 }
 0x53a   :  { %v4586_v13 = vpop.f32.mrb[24].mxu1  ;;  %v4016_v14 = vmax.f32 %v3798_v27, 0.0 }
 0x53b   :  { %v3958_v35 = vadd.f32 %v7574_v41, %v4586_v13  ;;  %v3952_v36 = vpop.f32.mrb[25].mxu1  ;;  %v4015_v58 = vmax.f32 %v3793_v53, 0.0 }
 0x53c   :  { %v3953_v50 = vadd.f32 %v7574_v41, %v3952_v36  ;;  %4081 = vst.msk [vmem:[#allocation3 + $0xc8] sm:$0xff] %vm4055_vm13, %v4016_v14 }
 0x53d   :  { %v4048_v21 = vmax.f32 %v3958_v35, 0.0  ;;  %4080 = vst.msk [vmem:[#allocation3 + $0xc0] sm:$0xff] %vm4055_vm13, %v4015_v58 }
 0x53e   :  { %v4047_v12 = vmax.f32 %v3953_v50, 0.0 }
 0x53f   :  { %4113 = vst.msk [vmem:[#allocation3 + $0x1c8] sm:$0xff] %vm4055_vm13, %v4048_v21 }
 0x540   :  { %4112 = vst.msk [vmem:[#allocation3 + $0x1c0] sm:$0xff] %vm4055_vm13, %v4047_v12 }
 0x544   :  { %v4132_v61 = vld [vmem:[#allocation3 + $0xc0] ss:$2 sm:$0xff]  ;;  %v4164_v38 = vld [vmem:[#allocation3 + $0xc1] ss:$2 sm:$0xff] }
 0x545   :  { %v4253_v51 = vmax.f32 %v4132_v61, %v4164_v38 }
 0x547   :  { %v4148_v39 = vld [vmem:[#allocation3 + $0x1c0] ss:$2 sm:$0xff]  ;;  %v4180_v8 = vld [vmem:[#allocation3 + $0x1c1] ss:$2 sm:$0xff] }
 0x548   :  { %v4261_v63 = vmax.f32 %v4148_v39, %v4180_v8 }
 0x54f   :  { %v4541_v5 = vpop.f32.mrb[26].mxu0 }
 0x550   :  { %v3808_v55 = vadd.f32 %v7574_v41, %v4541_v5  ;;  %v3802_v24 = vpop.f32.mrb[27].mxu0 }
 0x551   :  { %v3803_v59 = vadd.f32 %v7574_v41, %v3802_v24 }
 0x552   :  { %v4589_v44 = vpop.f32.mrb[26].mxu1  ;;  %v4018_v9 = vmax.f32 %v3808_v55, 0.0 }
 0x553   :  { %v3968_v30 = vadd.f32 %v7574_v41, %v4589_v44  ;;  %v3962_v46 = vpop.f32.mrb[27].mxu1  ;;  %v4017_v26 = vmax.f32 %v3803_v59, 0.0 }
 0x554   :  { %v3963_v3 = vadd.f32 %v7574_v41, %v3962_v46  ;;  %4083 = vst.msk [vmem:[#allocation3 + $0xd8] sm:$0xff] %vm4055_vm13, %v4018_v9 }
 0x555   :  { %v4050_v52 = vmax.f32 %v3968_v30, 0.0  ;;  %4082 = vst.msk [vmem:[#allocation3 + $0xd0] sm:$0xff] %vm4055_vm13, %v4017_v26 }
 0x556   :  { %v4049_v7 = vmax.f32 %v3963_v3, 0.0 }
 0x557   :  { %4115 = vst.msk [vmem:[#allocation3 + $0x1d8] sm:$0xff] %vm4055_vm13, %v4050_v52 }
 0x558   :  { %4114 = vst.msk [vmem:[#allocation3 + $0x1d0] sm:$0xff] %vm4055_vm13, %v4049_v7 }
 0x55c   :  { %v4196_v37 = vld [vmem:[#allocation3 + $0xd0] ss:$2 sm:$0xff]  ;;  %v4228_v23 = vld [vmem:[#allocation3 + $0xd1] ss:$2 sm:$0xff] }
 0x55d   :  { %v4269_v31 = vmax.f32 %v4196_v37, %v4228_v23 }
 0x55f   :  { %v4212_v11 = vld [vmem:[#allocation3 + $0x1d0] ss:$2 sm:$0xff]  ;;  %v4244_v32 = vld [vmem:[#allocation3 + $0x1d1] ss:$2 sm:$0xff]  ;;  %v4285_v19 = vmax.f32 %v4253_v51, %v4269_v31 }
 0x560   :  { %v4277_v2 = vmax.f32 %v4212_v11, %v4244_v32 }
 0x561   :  { %4301 = vst.msk [vmem:[#allocation4 + $0x30] sm:$0xff] %vm4055_vm13, %v4285_v19 }
 0x562   :  { %v4293_v34 = vmax.f32 %v4261_v63, %v4277_v2 }
 0x564   :  { %4309 = vst.msk [vmem:[#allocation4 + $0x70] sm:$0xff] %vm4055_vm13, %v4293_v34 }
 0x567   :  { %v4544_v29 = vpop.f32.mrb[28].mxu0 }
 0x568   :  { %v3818_v57 = vadd.f32 %v7574_v41, %v4544_v29  ;;  %v3812_v6 = vpop.f32.mrb[29].mxu0 }
 0x569   :  { %v3813_v0 = vadd.f32 %v7574_v41, %v3812_v6 }
 0x56a   :  { %v4592_v22 = vpop.f32.mrb[28].mxu1  ;;  %v4020_v62 = vmax.f32 %v3818_v57, 0.0 }
 0x56b   :  { %v3978_v56 = vadd.f32 %v7574_v41, %v4592_v22  ;;  %v3972_v54 = vpop.f32.mrb[29].mxu1  ;;  %v4019_v10 = vmax.f32 %v3813_v0, 0.0 }
 0x56c   :  { %v3973_v20 = vadd.f32 %v7574_v41, %v3972_v54  ;;  %4085 = vst.msk [vmem:[#allocation3 + $0xe8] sm:$0xff] %vm4055_vm13, %v4020_v62 }
 0x56d   :  { %v4052_v4 = vmax.f32 %v3978_v56, 0.0  ;;  %4084 = vst.msk [vmem:[#allocation3 + $0xe0] sm:$0xff] %vm4055_vm13, %v4019_v10 }
 0x56e   :  { %v4051_v47 = vmax.f32 %v3973_v20, 0.0 }
 0x56f   :  { %4117 = vst.msk [vmem:[#allocation3 + $0x1e8] sm:$0xff] %vm4055_vm13, %v4052_v4 }
 0x570   :  { %4116 = vst.msk [vmem:[#allocation3 + $0x1e0] sm:$0xff] %vm4055_vm13, %v4051_v47 }
 0x574   :  { %v4134_v25 = vld [vmem:[#allocation3 + $0xe0] ss:$2 sm:$0xff]  ;;  %v4166_v18 = vld [vmem:[#allocation3 + $0xe1] ss:$2 sm:$0xff] }
 0x577   :  { %v4150_v27 = vld [vmem:[#allocation3 + $0x1e0] ss:$2 sm:$0xff]  ;;  %v4182_v1 = vld [vmem:[#allocation3 + $0x1e1] ss:$2 sm:$0xff] }
 0x578   :  { %v4262_v50 = vmax.f32 %v4150_v27, %v4182_v1 }
 0x57f   :  { %v4547_v16 = vpop.f32.mrb[30].mxu0 }
 0x580   :  { %v3828_v42 = vadd.f32 %v7574_v41, %v4547_v16  ;;  %v3822_v17 = vpop.f32.mrb[31].mxu0 }
 0x581   :  { %v3823_v33 = vadd.f32 %v7574_v41, %v3822_v17 }
 0x582   :  { %v4595_v43 = vpop.f32.mrb[30].mxu1  ;;  %v4022_v45 = vmax.f32 %v3828_v42, 0.0 }
 0x583   :  { %v3988_v28 = vadd.f32 %v7574_v41, %v4595_v43  ;;  %v3982_v49 = vpop.f32.mrb[31].mxu1  ;;  %v4021_v15 = vmax.f32 %v3823_v33, 0.0 }
 0x584   :  { %v3983_v60 = vadd.f32 %v7574_v41, %v3982_v49  ;;  %4087 = vst.msk [vmem:[#allocation3 + $0xf8] sm:$0xff] %vm4055_vm13, %v4022_v45  ;;  %v4254_v41 = vmax.f32 %v4134_v25, %v4166_v18 }
 0x585   :  { %v4054_v40 = vmax.f32 %v3988_v28, 0.0  ;;  %4086 = vst.msk [vmem:[#allocation3 + $0xf0] sm:$0xff] %vm4055_vm13, %v4021_v15 }
 0x586   :  { %v4053_v48 = vmax.f32 %v3983_v60, 0.0 }
 0x587   :  { %4119 = vst.msk [vmem:[#allocation3 + $0x1f8] sm:$0xff] %vm4055_vm13, %v4054_v40 }
 0x588   :  { %4118 = vst.msk [vmem:[#allocation3 + $0x1f0] sm:$0xff] %vm4055_vm13, %v4053_v48 }
 0x58c   :  { %v4198_v13 = vld [vmem:[#allocation3 + $0xf0] ss:$2 sm:$0xff]  ;;  %v4230_v53 = vld [vmem:[#allocation3 + $0xf1] ss:$2 sm:$0xff] }
 0x58d   :  { %v4270_v35 = vmax.f32 %v4198_v13, %v4230_v53 }
 0x58f   :  { %v4214_v36 = vld [vmem:[#allocation3 + $0x1f0] ss:$2 sm:$0xff]  ;;  %v4246_v14 = vld [vmem:[#allocation3 + $0x1f1] ss:$2 sm:$0xff]  ;;  %v4286_v21 = vmax.f32 %v4254_v41, %v4270_v35 }
 0x590   :  { %v4278_v58 = vmax.f32 %v4214_v36, %v4246_v14 }
 0x591   :  { %4302 = vst.msk [vmem:[#allocation4 + $0x38] sm:$0xff] %vm4055_vm13, %v4286_v21 }
 0x592   :  { %v4294_v12 = vmax.f32 %v4262_v50, %v4278_v58 }
 0x594   :  { %4310 = vst.msk [vmem:[#allocation4 + $0x78] sm:$0xff] %vm4055_vm13, %v4294_v12 }
 0x595   :  { %4695 = shalt.err (!%p4692_p4)
}
 0x596   :  { %s4696_s28 = scalar_lea.hbm %s7637_s3, 2048 }
 0x597   :  { %p4697_p5 = scmp.ne.s32.totalorder %s7637_s3, %s4696_s28  ;;  %p4700_p6 = scmp.lt.u32.totalorder %s4696_s28, %s7637_s3 }
 0x599   :  { %p4702_p7 = pnand %p4700_p6, %p4697_p5 }
 0x59b   :  { %4705 = shalt.err (!%p4702_p7)
}
 0x59c   :  { %s4719_s7 = smov 128   ;;  %s4720_s8 = smov 8  }
 0x59d   :  { %4322 = dma.vmem_to_hbm [thread:$0]  %s4317_s25, 2048, %s7637_s3, [#allocation5], %s4719_s7, %s4719_s7, %s4720_s8  }
 0x59e   :  { %4706 = dma.done.wait [#allocation5], 2048  }
 0x59f   :  { %4707 = vsyncadd [#allocation5], 4294965248 }
 0x5a0   :  { %4326 = vsyncpa [#allocation5], 1 }

</bundles_post_ra>
